<compile_context>
chip_gen: v7x
topology: tpu7x:2x2x1
jax: 0.10.0
libtpu: 0.0.40
codegen_flags: <defaults>
</compile_context>

<pallas_src>
import math
from functools import partial

import jax
import jax.numpy as jnp
from jax.experimental import pallas as pl
from jax.experimental.pallas import tpu as pltpu


# =============================================================================
# Shifted-window preparation (shared by conv and maxpool)
# =============================================================================

def _prepare_windows(x_nhwc, kh, kw, stride, padding, pad_value):
    """Split a padded NHWC tensor into stride-parity grids so that every conv/pool
    tap becomes a contiguous row-window (static offset) of a flattened grid.

    Returns:
      x_split: (P, N, R_in, C)  parity grids, rows flattened row-major (width Wq)
      taps:    list of (parity_slot, row_offset, weight_tap_index)
      geom:    (Ho, Wo, Wq, R_out)  -- kernel computes Ho*Wq rows, cols >= Wo are
               garbage and sliced off afterwards.
    """
    N, H, W, C = x_nhwc.shape
    s = stride
    Ho = (H + 2 * padding - kh) // s + 1
    Wo = (W + 2 * padding - kw) // s + 1
    Hp, Wp = H + 2 * padding, W + 2 * padding
    Wq = -(-Wp // s)                       # parity-grid width
    R_out = Ho * Wq                        # rows computed per image

    parities, taps = [], []
    for i in range(kh):
        for j in range(kw):
            key = (i % s, j % s)
            if key not in parities:
                parities.append(key)
            taps.append((parities.index(key), (i // s) * Wq + (j // s), i * kw + j))
    max_off = max(off for _, off, _ in taps)
    rows_needed = max_off + R_out
    Hq = max(-(-rows_needed // Wq), -(-Hp // s))   # parity-grid height

    H_total, W_total = Hq * s, Wq * s
    pad_b = H_total - H - padding
    pad_r = W_total - W - padding
    x_p = jnp.pad(x_nhwc,
                  ((0, 0), (padding, pad_b), (padding, pad_r), (0, 0)),
                  constant_values=pad_value)
    grids = [x_p[:, a::s, b::s, :].reshape(N, Hq * Wq, C) for (a, b) in parities]
    x_split = jnp.stack(grids, axis=0)     # (P, N, Hq*Wq, C): same bytes as x_p
    return x_split, taps, (Ho, Wo, Wq, R_out)


# =============================================================================
# Conv (tap-accumulating matmul) with fused BN(+ReLU) epilogue
# =============================================================================

def _conv_tap_kernel(x_ref, w_ref, scale_ref, shift_ref, o_ref, *,
                     taps, rows, relu, affine):
    acc = None
    for (p, off, t) in taps:               # static, unrolled
        xt = x_ref[p, 0, off:off + rows, :]          # (rows, Cin)
        y = jnp.dot(xt, w_ref[t, :, :], preferred_element_type=jnp.float32)
        acc = y if acc is None else acc + y
    if affine:
        acc = acc * scale_ref[...] + shift_ref[...]  # folded BatchNorm
    if relu:
        acc = jnp.maximum(acc, 0.0)
    o_ref[0, :, :] = acc.astype(o_ref.dtype)


def conv2d_bn(x_nhwc, w, kh, kw, stride, padding, scale=None, shift=None, relu=False):
    """Conv2d (no bias), optional fused per-channel affine (folded BN) + ReLU.
    w: (kh*kw, Cin, Cout)."""
    N, H, W, Cin = x_nhwc.shape
    T, Cin_w, Cout = w.shape
    assert T == kh * kw and Cin_w == Cin
    x_split, taps, (Ho, Wo, Wq, R_out) = _prepare_windows(
        x_nhwc, kh, kw, stride, padding, pad_value=0.0)
    P, _, R_in, _ = x_split.shape
    affine = scale is not None
    if not affine:
        scale = jnp.ones((Cout,), jnp.float32)
        shift = jnp.zeros((Cout,), jnp.float32)

    out = pl.pallas_call(
        partial(_conv_tap_kernel, taps=tuple(taps), rows=R_out,
                relu=relu, affine=affine),
        out_shape=jax.ShapeDtypeStruct((N, R_out, Cout), jnp.float32),
        grid=(N,),
        in_specs=[
            pl.BlockSpec((P, 1, R_in, Cin), lambda n: (0, n, 0, 0)),
            pl.BlockSpec((T, Cin, Cout), lambda n: (0, 0, 0)),
            pl.BlockSpec((1, Cout), lambda n: (0, 0)),
            pl.BlockSpec((1, Cout), lambda n: (0, 0)),
        ],
        out_specs=pl.BlockSpec((1, R_out, Cout), lambda n: (n, 0, 0)),
        compiler_params=pltpu.CompilerParams(dimension_semantics=("parallel",)),
    )(x_split, w, scale.reshape(1, Cout), shift.reshape(1, Cout))
    return out.reshape(N, Ho, Wq, Cout)[:, :, :Wo, :]


# =============================================================================
# MaxPool (tap-accumulating max, same windowing machinery)
# =============================================================================

def _pool_tap_kernel(x_ref, o_ref, *, taps, rows):
    acc = None
    for (p, off, _t) in taps:
        v = x_ref[p, 0, off:off + rows, :]
        acc = v if acc is None else jnp.maximum(acc, v)
    o_ref[0, :, :] = acc


def maxpool2d(x_nhwc, size, stride, padding=0):
    N, H, W, C = x_nhwc.shape
    x_split, taps, (Ho, Wo, Wq, R_out) = _prepare_windows(
        x_nhwc, size, size, stride, padding, pad_value=-jnp.inf)
    P, _, R_in, _ = x_split.shape
    out = pl.pallas_call(
        partial(_pool_tap_kernel, taps=tuple(taps), rows=R_out),
        out_shape=jax.ShapeDtypeStruct((N, R_out, C), x_nhwc.dtype),
        grid=(N,),
        in_specs=[pl.BlockSpec((P, 1, R_in, C), lambda n: (0, n, 0, 0))],
        out_specs=pl.BlockSpec((1, R_out, C), lambda n: (n, 0, 0)),
        compiler_params=pltpu.CompilerParams(dimension_semantics=("parallel",)),
    )(x_split)
    return out.reshape(N, Ho, Wq, C)[:, :, :Wo, :]


# =============================================================================
# Lane-dense, row-tiled elementwise kernels (BN+ReLU, residual add)
# =============================================================================

def _lane_fold(flat, C):
    """Fold consecutive rows into the lane dim so the last dim becomes 128."""
    rows = flat.shape[0]
    f = 1
    if C < 128 and 128 % C == 0:
        f = 128 // C
        while f > 1 and rows % f != 0:
            f //= 2
    if f > 1:
        flat = flat.reshape(rows // f, C * f)
    return flat, f


def _affine_act_kernel(x_ref, scale_ref, shift_ref, o_ref, *, relu):
    y = x_ref[...] * scale_ref[...] + shift_ref[...]
    if relu:
        y = jnp.maximum(y, 0.0)
    o_ref[...] = y


def bn_act(x_nhwc, scale, shift, relu=True, row_tile=1024):
    """Per-channel affine (folded BatchNorm, eval mode) + optional ReLU."""
    N, H, W, C = x_nhwc.shape
    flat, f = _lane_fold(x_nhwc.reshape(N * H * W, C), C)
    sc = jnp.tile(scale, f).reshape(1, C * f)
    sh = jnp.tile(shift, f).reshape(1, C * f)
    R, Cf = flat.shape
    tr = R if R <= row_tile else row_tile
    out = pl.pallas_call(
        partial(_affine_act_kernel, relu=relu),
        out_shape=jax.ShapeDtypeStruct((R, Cf), flat.dtype),
        grid=(pl.cdiv(R, tr),),
        in_specs=[pl.BlockSpec((tr, Cf), lambda i: (i, 0)),
                  pl.BlockSpec((1, Cf), lambda i: (0, 0)),
                  pl.BlockSpec((1, Cf), lambda i: (0, 0))],
        out_specs=pl.BlockSpec((tr, Cf), lambda i: (i, 0)),
        compiler_params=pltpu.CompilerParams(dimension_semantics=("parallel",)),
    )(flat, sc, sh)
    return out.reshape(N, H, W, C)


def _add_kernel(a_ref, b_ref, o_ref):
    o_ref[...] = a_ref[...] + b_ref[...]


def residual_add(a, b, row_tile=1024):
    N, H, W, C = a.shape
    fa, _ = _lane_fold(a.reshape(N * H * W, C), C)
    fb, _ = _lane_fold(b.reshape(N * H * W, C), C)
    R, Cf = fa.shape
    tr = R if R <= row_tile else row_tile
    out = pl.pallas_call(
        _add_kernel,
        out_shape=jax.ShapeDtypeStruct((R, Cf), fa.dtype),
        grid=(pl.cdiv(R, tr),),
        in_specs=[pl.BlockSpec((tr, Cf), lambda i: (i, 0)),
                  pl.BlockSpec((tr, Cf), lambda i: (i, 0))],
        out_specs=pl.BlockSpec((tr, Cf), lambda i: (i, 0)),
        compiler_params=pltpu.CompilerParams(dimension_semantics=("parallel",)),
    )(fa, fb)
    return out.reshape(N, H, W, C)


# =============================================================================
# Parameters (arrays only) + static architecture description
# =============================================================================

def init_conv(key, kh, kw, cin, cout):
    fan_out = cout * kh * kw                       # kaiming_normal_, mode='fan_out'
    std = math.sqrt(2.0 / fan_out)
    w = jax.random.normal(key, (kh, kw, cin, cout), jnp.float32) * std
    return w.reshape(kh * kw, cin, cout)


def init_bn(c, eps=1e-5):
    gamma = jnp.ones((c,), jnp.float32)
    beta = jnp.zeros((c,), jnp.float32)
    mean = jnp.zeros((c,), jnp.float32)
    var = jnp.ones((c,), jnp.float32)
    scale = gamma / jnp.sqrt(var + eps)
    shift = beta - mean * scale
    return scale, shift


def build_resnetv2(key, *, input_channels, num_filters, first_layer_kernel_size,
                   blocks_per_layer_list, block_strides_list, growth_factor):
    keys = iter(jax.random.split(key, 256))
    params = {"first_conv": init_conv(next(keys), first_layer_kernel_size,
                                      first_layer_kernel_size,
                                      input_channels, num_filters)}
    arch = []                      # static (strides / downsample flags) -> jit closure
    inplanes = num_filters
    current = num_filters
    layer_params = []
    for num_blocks, stride in zip(blocks_per_layer_list, block_strides_list):
        planes = current
        blocks_p, blocks_a = [], []
        for b in range(num_blocks):
            s = stride if b == 0 else 1
            p = {"bn1": init_bn(inplanes),
                 "conv1": init_conv(next(keys), 3, 3, inplanes, planes),
                 "bn2": init_bn(planes),
                 "conv2": init_conv(next(keys), 3, 3, planes, planes)}
            has_ds = (b == 0)      # _make_layer always attaches a downsample to block 0
            if has_ds:
                p["ds_conv"] = init_conv(next(keys), 1, 1, inplanes, planes)
                p["ds_bn"] = init_bn(planes)
            blocks_p.append(p)
            blocks_a.append({"stride": s, "has_ds": has_ds})
            inplanes = planes
        layer_params.append(blocks_p)
        arch.append(blocks_a)
        current *= growth_factor
    params["layers"] = layer_params
    params["final_bn"] = init_bn(current // growth_factor)   # expansion = 1
    return params, arch


# =============================================================================
# Forward pass (BasicBlockV2 / ResNetV2 semantics)
# =============================================================================

def basic_block_v2(x, p, a):
    t = bn_act(x, *p["bn1"], relu=True)                    # pre-activation
    if a["has_ds"]:
        residual = conv2d_bn(t, p["ds_conv"], 1, 1, a["stride"], 0,
                             scale=p["ds_bn"][0], shift=p["ds_bn"][1], relu=False)
    else:
        residual = x
    out = conv2d_bn(t, p["conv1"], 3, 3, a["stride"], 1,
                    scale=p["bn2"][0], shift=p["bn2"][1], relu=True)  # conv1+bn2+relu fused
    out = conv2d_bn(out, p["conv2"], 3, 3, 1, 1)                      # conv2
    return residual_add(out, residual)


def resnet_v2_forward(x_nchw, params, *, arch, first_layer_kernel_size,
                      first_layer_conv_stride, first_layer_padding,
                      first_pool_size, first_pool_stride, first_pool_padding):
    x = jnp.transpose(x_nchw, (0, 2, 3, 1))                # NCHW -> NHWC
    h = conv2d_bn(x, params["first_conv"], first_layer_kernel_size,
                  first_layer_kernel_size, first_layer_conv_stride,
                  first_layer_padding)
    h = maxpool2d(h, first_pool_size, first_pool_stride, first_pool_padding)
    for layer_p, layer_a in zip(params["layers"], arch):
        for p, a in zip(layer_p, layer_a):
            h = basic_block_v2(h, p, a)
    h = bn_act(h, *params["final_bn"], relu=True)
    return jnp.transpose(h, (0, 3, 1, 2))                  # back to NCHW


# =============================================================================
# Demo
# =============================================================================

if __name__ == "__main__":
    cfg = dict(
        input_channels=4,
        num_filters=16,
        first_layer_kernel_size=3,
        first_layer_conv_stride=1,
        first_layer_padding=1,
        blocks_per_layer_list=[1, 1],
        block_strides_list=[1, 2],
        first_pool_size=2,
        first_pool_stride=2,
        first_pool_padding=0,
        growth_factor=2,
    )

    key = jax.random.PRNGKey(0)
    k_params, k_x = jax.random.split(key)
    params, arch = build_resnetv2(
        k_params,
        input_channels=cfg["input_channels"],
        num_filters=cfg["num_filters"],
        first_layer_kernel_size=cfg["first_layer_kernel_size"],
        blocks_per_layer_list=cfg["blocks_per_layer_list"],
        block_strides_list=cfg["block_strides_list"],
        growth_factor=cfg["growth_factor"],
    )

    x = jax.random.normal(k_x, (2, 4, 16, 16), jnp.float32)  # NCHW like PyTorch

    fwd = jax.jit(partial(
        resnet_v2_forward,
        arch=arch,
        first_layer_kernel_size=cfg["first_layer_kernel_size"],
        first_layer_conv_stride=cfg["first_layer_conv_stride"],
        first_layer_padding=cfg["first_layer_padding"],
        first_pool_size=cfg["first_pool_size"],
        first_pool_stride=cfg["first_pool_stride"],
        first_pool_padding=cfg["first_pool_padding"],
    ))

    out = fwd(x, params)
    jax.block_until_ready(out)

    # conv(3x3,s1,p1): 16x16 -> pool 2x2: 8x8 -> layer0 (s1): 8x8x16 -> layer1 (s2): 4x4x32
    assert out.shape == (2, 32, 4, 4), out.shape
    assert bool(jnp.all(jnp.isfinite(out)))
    print("KERNEL_OK")
</pallas_src>

<mosaic_0001>
module attributes {stable_mosaic.version = 11 : i64} {
  func.func @_conv_tap_kernel(%arg0: i32, %arg1: memref<1x1x342x4xf32, #tpu.memory_space<vmem>>, %arg2: memref<9x4x16xf32, #tpu.memory_space<vmem>>, %arg3: memref<1x16xf32, #tpu.memory_space<vmem>>, %arg4: memref<1x16xf32, #tpu.memory_space<vmem>>, %arg5: memref<1x288x16xf32, #tpu.memory_space<vmem>>) attributes {dimension_semantics = [#tpu.dimension_semantics<parallel>], iteration_bounds = array<i64: 2>, scalar_prefetch = 0 : i64, scratch_operands = 0 : i64, tpu.core_type = #tpu.core_type<tc>, window_params = [{transform_indices = @transform_0, window_bounds = array<i64: 1, 1, 342, 4>}, {pipeline_mode = #tpu.pipeline_mode<synchronous>, transform_indices = @transform_1, window_bounds = array<i64: 9, 4, 16>}, {pipeline_mode = #tpu.pipeline_mode<synchronous>, transform_indices = @transform_2, window_bounds = array<i64: 1, 16>}, {pipeline_mode = #tpu.pipeline_mode<synchronous>, transform_indices = @transform_3, window_bounds = array<i64: 1, 16>}, {transform_indices = @transform_4, window_bounds = array<i64: 1, 288, 16>}]} {
    %c0 = arith.constant 0 : index
    %c0_0 = arith.constant 0 : index
    %c0_1 = arith.constant 0 : index
    %c0_2 = arith.constant 0 : index
    %0 = vector.load %arg1[%c0, %c0_0, %c0_1, %c0_2] : memref<1x1x342x4xf32, #tpu.memory_space<vmem>>, vector<1x1x288x4xf32>
    %1 = vector.shape_cast %0 : vector<1x1x288x4xf32> to vector<288x4xf32>
    %c0_3 = arith.constant 0 : index
    %c0_4 = arith.constant 0 : index
    %c0_5 = arith.constant 0 : index
    %2 = vector.load %arg2[%c0_3, %c0_4, %c0_5] : memref<9x4x16xf32, #tpu.memory_space<vmem>>, vector<1x4x16xf32>
    %3 = vector.shape_cast %2 : vector<1x4x16xf32> to vector<4x16xf32>
    %cst = arith.constant dense<0.000000e+00> : vector<288x16xf32>
    %4 = tpu.matmul %1, %3, %cst {dimension_numbers = #tpu.dot_dimension_numbers<[1], [0], [0], [1], [0, 0, 1, 1], [], []>} : vector<288x4xf32>, vector<4x16xf32>, vector<288x16xf32> -> vector<288x16xf32>
    %c0_6 = arith.constant 0 : index
    %c0_7 = arith.constant 0 : index
    %c1 = arith.constant 1 : index
    %c0_8 = arith.constant 0 : index
    %5 = vector.load %arg1[%c0_6, %c0_7, %c1, %c0_8] : memref<1x1x342x4xf32, #tpu.memory_space<vmem>>, vector<1x1x288x4xf32>
    %6 = vector.shape_cast %5 : vector<1x1x288x4xf32> to vector<288x4xf32>
    %c1_9 = arith.constant 1 : index
    %c0_10 = arith.constant 0 : index
    %c0_11 = arith.constant 0 : index
    %7 = vector.load %arg2[%c1_9, %c0_10, %c0_11] : memref<9x4x16xf32, #tpu.memory_space<vmem>>, vector<1x4x16xf32>
    %8 = vector.shape_cast %7 : vector<1x4x16xf32> to vector<4x16xf32>
    %cst_12 = arith.constant dense<0.000000e+00> : vector<288x16xf32>
    %9 = tpu.matmul %6, %8, %cst_12 {dimension_numbers = #tpu.dot_dimension_numbers<[1], [0], [0], [1], [0, 0, 1, 1], [], []>} : vector<288x4xf32>, vector<4x16xf32>, vector<288x16xf32> -> vector<288x16xf32>
    %10 = arith.addf %4, %9 : vector<288x16xf32>
    %c0_13 = arith.constant 0 : index
    %c0_14 = arith.constant 0 : index
    %c2 = arith.constant 2 : index
    %c0_15 = arith.constant 0 : index
    %11 = vector.load %arg1[%c0_13, %c0_14, %c2, %c0_15] : memref<1x1x342x4xf32, #tpu.memory_space<vmem>>, vector<1x1x288x4xf32>
    %12 = vector.shape_cast %11 : vector<1x1x288x4xf32> to vector<288x4xf32>
    %c2_16 = arith.constant 2 : index
    %c0_17 = arith.constant 0 : index
    %c0_18 = arith.constant 0 : index
    %13 = vector.load %arg2[%c2_16, %c0_17, %c0_18] : memref<9x4x16xf32, #tpu.memory_space<vmem>>, vector<1x4x16xf32>
    %14 = vector.shape_cast %13 : vector<1x4x16xf32> to vector<4x16xf32>
    %cst_19 = arith.constant dense<0.000000e+00> : vector<288x16xf32>
    %15 = tpu.matmul %12, %14, %cst_19 {dimension_numbers = #tpu.dot_dimension_numbers<[1], [0], [0], [1], [0, 0, 1, 1], [], []>} : vector<288x4xf32>, vector<4x16xf32>, vector<288x16xf32> -> vector<288x16xf32>
    %16 = arith.addf %10, %15 : vector<288x16xf32>
    %c0_20 = arith.constant 0 : index
    %c0_21 = arith.constant 0 : index
    %c18 = arith.constant 18 : index
    %c0_22 = arith.constant 0 : index
    %17 = vector.load %arg1[%c0_20, %c0_21, %c18, %c0_22] : memref<1x1x342x4xf32, #tpu.memory_space<vmem>>, vector<1x1x288x4xf32>
    %18 = vector.shape_cast %17 : vector<1x1x288x4xf32> to vector<288x4xf32>
    %c3 = arith.constant 3 : index
    %c0_23 = arith.constant 0 : index
    %c0_24 = arith.constant 0 : index
    %19 = vector.load %arg2[%c3, %c0_23, %c0_24] : memref<9x4x16xf32, #tpu.memory_space<vmem>>, vector<1x4x16xf32>
    %20 = vector.shape_cast %19 : vector<1x4x16xf32> to vector<4x16xf32>
    %cst_25 = arith.constant dense<0.000000e+00> : vector<288x16xf32>
    %21 = tpu.matmul %18, %20, %cst_25 {dimension_numbers = #tpu.dot_dimension_numbers<[1], [0], [0], [1], [0, 0, 1, 1], [], []>} : vector<288x4xf32>, vector<4x16xf32>, vector<288x16xf32> -> vector<288x16xf32>
    %22 = arith.addf %16, %21 : vector<288x16xf32>
    %c0_26 = arith.constant 0 : index
    %c0_27 = arith.constant 0 : index
    %c19 = arith.constant 19 : index
    %c0_28 = arith.constant 0 : index
    %23 = vector.load %arg1[%c0_26, %c0_27, %c19, %c0_28] : memref<1x1x342x4xf32, #tpu.memory_space<vmem>>, vector<1x1x288x4xf32>
    %24 = vector.shape_cast %23 : vector<1x1x288x4xf32> to vector<288x4xf32>
    %c4 = arith.constant 4 : index
    %c0_29 = arith.constant 0 : index
    %c0_30 = arith.constant 0 : index
    %25 = vector.load %arg2[%c4, %c0_29, %c0_30] : memref<9x4x16xf32, #tpu.memory_space<vmem>>, vector<1x4x16xf32>
    %26 = vector.shape_cast %25 : vector<1x4x16xf32> to vector<4x16xf32>
    %cst_31 = arith.constant dense<0.000000e+00> : vector<288x16xf32>
    %27 = tpu.matmul %24, %26, %cst_31 {dimension_numbers = #tpu.dot_dimension_numbers<[1], [0], [0], [1], [0, 0, 1, 1], [], []>} : vector<288x4xf32>, vector<4x16xf32>, vector<288x16xf32> -> vector<288x16xf32>
    %28 = arith.addf %22, %27 : vector<288x16xf32>
    %c0_32 = arith.constant 0 : index
    %c0_33 = arith.constant 0 : index
    %c20 = arith.constant 20 : index
    %c0_34 = arith.constant 0 : index
    %29 = vector.load %arg1[%c0_32, %c0_33, %c20, %c0_34] : memref<1x1x342x4xf32, #tpu.memory_space<vmem>>, vector<1x1x288x4xf32>
    %30 = vector.shape_cast %29 : vector<1x1x288x4xf32> to vector<288x4xf32>
    %c5 = arith.constant 5 : index
    %c0_35 = arith.constant 0 : index
    %c0_36 = arith.constant 0 : index
    %31 = vector.load %arg2[%c5, %c0_35, %c0_36] : memref<9x4x16xf32, #tpu.memory_space<vmem>>, vector<1x4x16xf32>
    %32 = vector.shape_cast %31 : vector<1x4x16xf32> to vector<4x16xf32>
    %cst_37 = arith.constant dense<0.000000e+00> : vector<288x16xf32>
    %33 = tpu.matmul %30, %32, %cst_37 {dimension_numbers = #tpu.dot_dimension_numbers<[1], [0], [0], [1], [0, 0, 1, 1], [], []>} : vector<288x4xf32>, vector<4x16xf32>, vector<288x16xf32> -> vector<288x16xf32>
    %34 = arith.addf %28, %33 : vector<288x16xf32>
    %c0_38 = arith.constant 0 : index
    %c0_39 = arith.constant 0 : index
    %c36 = arith.constant 36 : index
    %c0_40 = arith.constant 0 : index
    %35 = vector.load %arg1[%c0_38, %c0_39, %c36, %c0_40] : memref<1x1x342x4xf32, #tpu.memory_space<vmem>>, vector<1x1x288x4xf32>
    %36 = vector.shape_cast %35 : vector<1x1x288x4xf32> to vector<288x4xf32>
    %c6 = arith.constant 6 : index
    %c0_41 = arith.constant 0 : index
    %c0_42 = arith.constant 0 : index
    %37 = vector.load %arg2[%c6, %c0_41, %c0_42] : memref<9x4x16xf32, #tpu.memory_space<vmem>>, vector<1x4x16xf32>
    %38 = vector.shape_cast %37 : vector<1x4x16xf32> to vector<4x16xf32>
    %cst_43 = arith.constant dense<0.000000e+00> : vector<288x16xf32>
    %39 = tpu.matmul %36, %38, %cst_43 {dimension_numbers = #tpu.dot_dimension_numbers<[1], [0], [0], [1], [0, 0, 1, 1], [], []>} : vector<288x4xf32>, vector<4x16xf32>, vector<288x16xf32> -> vector<288x16xf32>
    %40 = arith.addf %34, %39 : vector<288x16xf32>
    %c0_44 = arith.constant 0 : index
    %c0_45 = arith.constant 0 : index
    %c37 = arith.constant 37 : index
    %c0_46 = arith.constant 0 : index
    %41 = vector.load %arg1[%c0_44, %c0_45, %c37, %c0_46] : memref<1x1x342x4xf32, #tpu.memory_space<vmem>>, vector<1x1x288x4xf32>
    %42 = vector.shape_cast %41 : vector<1x1x288x4xf32> to vector<288x4xf32>
    %c7 = arith.constant 7 : index
    %c0_47 = arith.constant 0 : index
    %c0_48 = arith.constant 0 : index
    %43 = vector.load %arg2[%c7, %c0_47, %c0_48] : memref<9x4x16xf32, #tpu.memory_space<vmem>>, vector<1x4x16xf32>
    %44 = vector.shape_cast %43 : vector<1x4x16xf32> to vector<4x16xf32>
    %cst_49 = arith.constant dense<0.000000e+00> : vector<288x16xf32>
    %45 = tpu.matmul %42, %44, %cst_49 {dimension_numbers = #tpu.dot_dimension_numbers<[1], [0], [0], [1], [0, 0, 1, 1], [], []>} : vector<288x4xf32>, vector<4x16xf32>, vector<288x16xf32> -> vector<288x16xf32>
    %46 = arith.addf %40, %45 : vector<288x16xf32>
    %c0_50 = arith.constant 0 : index
    %c0_51 = arith.constant 0 : index
    %c38 = arith.constant 38 : index
    %c0_52 = arith.constant 0 : index
    %47 = vector.load %arg1[%c0_50, %c0_51, %c38, %c0_52] : memref<1x1x342x4xf32, #tpu.memory_space<vmem>>, vector<1x1x288x4xf32>
    %48 = vector.shape_cast %47 : vector<1x1x288x4xf32> to vector<288x4xf32>
    %c8 = arith.constant 8 : index
    %c0_53 = arith.constant 0 : index
    %c0_54 = arith.constant 0 : index
    %49 = vector.load %arg2[%c8, %c0_53, %c0_54] : memref<9x4x16xf32, #tpu.memory_space<vmem>>, vector<1x4x16xf32>
    %50 = vector.shape_cast %49 : vector<1x4x16xf32> to vector<4x16xf32>
    %cst_55 = arith.constant dense<0.000000e+00> : vector<288x16xf32>
    %51 = tpu.matmul %48, %50, %cst_55 {dimension_numbers = #tpu.dot_dimension_numbers<[1], [0], [0], [1], [0, 0, 1, 1], [], []>} : vector<288x4xf32>, vector<4x16xf32>, vector<288x16xf32> -> vector<288x16xf32>
    %52 = arith.addf %46, %51 : vector<288x16xf32>
    %c0_56 = arith.constant 0 : index
    %c0_57 = arith.constant 0 : index
    %c0_58 = arith.constant 0 : index
    %53 = vector.load %arg5[%c0_56, %c0_57, %c0_58] : memref<1x288x16xf32, #tpu.memory_space<vmem>>, vector<1x288x16xf32>
    %54 = vector.shape_cast %53 : vector<1x288x16xf32> to vector<288x16xf32>
    %55 = vector.shape_cast %52 : vector<288x16xf32> to vector<1x288x16xf32>
    tpu.vector_store %arg5[%c0_56, %c0_57, %c0_58], %55 {strides = array<i32>} : memref<1x288x16xf32, #tpu.memory_space<vmem>>, vector<1x288x16xf32>,
    return
  }
  func.func @transform_0(%arg0: i32) -> (i32, i32, i32, i32) {
    %c0_i32 = arith.constant 0 : i32
    %c0_i32_0 = arith.constant 0 : i32
    %c0_i32_1 = arith.constant 0 : i32
    %c0_i32_2 = arith.constant 0 : i32
    return %c0_i32, %arg0, %c0_i32_0, %c0_i32_1 : i32, i32, i32, i32
  }
  func.func @transform_1(%arg0: i32) -> (i32, i32, i32) {
    %c0_i32 = arith.constant 0 : i32
    %c0_i32_0 = arith.constant 0 : i32
    %c0_i32_1 = arith.constant 0 : i32
    %c0_i32_2 = arith.constant 0 : i32
    return %c0_i32, %c0_i32_0, %c0_i32_1 : i32, i32, i32
  }
  func.func @transform_2(%arg0: i32) -> (i32, i32) {
    %c0_i32 = arith.constant 0 : i32
    %c0_i32_0 = arith.constant 0 : i32
    %c0_i32_1 = arith.constant 0 : i32
    return %c0_i32, %c0_i32_0 : i32, i32
  }
  func.func @transform_3(%arg0: i32) -> (i32, i32) {
    %c0_i32 = arith.constant 0 : i32
    %c0_i32_0 = arith.constant 0 : i32
    %c0_i32_1 = arith.constant 0 : i32
    return %c0_i32, %c0_i32_0 : i32, i32
  }
  func.func @transform_4(%arg0: i32) -> (i32, i32, i32) {
    %c0_i32 = arith.constant 0 : i32
    %c0_i32_0 = arith.constant 0 : i32
    %c0_i32_1 = arith.constant 0 : i32
    return %arg0, %c0_i32, %c0_i32_0 : i32, i32, i32
  }
}

module attributes {stable_mosaic.version = 11 : i64} {
  func.func @_pool_tap_kernel(%arg0: i32, %arg1: memref<4x1x64x16xf32, #tpu.memory_space<vmem>>, %arg2: memref<1x64x16xf32, #tpu.memory_space<vmem>>) attributes {dimension_semantics = [#tpu.dimension_semantics<parallel>], iteration_bounds = array<i64: 2>, scalar_prefetch = 0 : i64, scratch_operands = 0 : i64, tpu.core_type = #tpu.core_type<tc>, window_params = [{transform_indices = @transform_0, window_bounds = array<i64: 4, 1, 64, 16>}, {transform_indices = @transform_1, window_bounds = array<i64: 1, 64, 16>}]} {
    %c0 = arith.constant 0 : index
    %c0_0 = arith.constant 0 : index
    %c0_1 = arith.constant 0 : index
    %c0_2 = arith.constant 0 : index
    %0 = vector.load %arg1[%c0, %c0_0, %c0_1, %c0_2] : memref<4x1x64x16xf32, #tpu.memory_space<vmem>>, vector<1x1x64x16xf32>
    %1 = vector.shape_cast %0 : vector<1x1x64x16xf32> to vector<64x16xf32>
    %c1 = arith.constant 1 : index
    %c0_3 = arith.constant 0 : index
    %c0_4 = arith.constant 0 : index
    %c0_5 = arith.constant 0 : index
    %2 = vector.load %arg1[%c1, %c0_3, %c0_4, %c0_5] : memref<4x1x64x16xf32, #tpu.memory_space<vmem>>, vector<1x1x64x16xf32>
    %3 = vector.shape_cast %2 : vector<1x1x64x16xf32> to vector<64x16xf32>
    %4 = arith.maximumf %1, %3 : vector<64x16xf32>
    %c2 = arith.constant 2 : index
    %c0_6 = arith.constant 0 : index
    %c0_7 = arith.constant 0 : index
    %c0_8 = arith.constant 0 : index
    %5 = vector.load %arg1[%c2, %c0_6, %c0_7, %c0_8] : memref<4x1x64x16xf32, #tpu.memory_space<vmem>>, vector<1x1x64x16xf32>
    %6 = vector.shape_cast %5 : vector<1x1x64x16xf32> to vector<64x16xf32>
    %7 = arith.maximumf %4, %6 : vector<64x16xf32>
    %c3 = arith.constant 3 : index
    %c0_9 = arith.constant 0 : index
    %c0_10 = arith.constant 0 : index
    %c0_11 = arith.constant 0 : index
    %8 = vector.load %arg1[%c3, %c0_9, %c0_10, %c0_11] : memref<4x1x64x16xf32, #tpu.memory_space<vmem>>, vector<1x1x64x16xf32>
    %9 = vector.shape_cast %8 : vector<1x1x64x16xf32> to vector<64x16xf32>
    %10 = arith.maximumf %7, %9 : vector<64x16xf32>
    %c0_12 = arith.constant 0 : index
    %c0_13 = arith.constant 0 : index
    %c0_14 = arith.constant 0 : index
    %11 = vector.load %arg2[%c0_12, %c0_13, %c0_14] : memref<1x64x16xf32, #tpu.memory_space<vmem>>, vector<1x64x16xf32>
    %12 = vector.shape_cast %11 : vector<1x64x16xf32> to vector<64x16xf32>
    %13 = vector.shape_cast %10 : vector<64x16xf32> to vector<1x64x16xf32>
    tpu.vector_store %arg2[%c0_12, %c0_13, %c0_14], %13 {strides = array<i32>} : memref<1x64x16xf32, #tpu.memory_space<vmem>>, vector<1x64x16xf32>,
    return
  }
  func.func @transform_0(%arg0: i32) -> (i32, i32, i32, i32) {
    %c0_i32 = arith.constant 0 : i32
    %c0_i32_0 = arith.constant 0 : i32
    %c0_i32_1 = arith.constant 0 : i32
    %c0_i32_2 = arith.constant 0 : i32
    return %c0_i32, %arg0, %c0_i32_0, %c0_i32_1 : i32, i32, i32, i32
  }
  func.func @transform_1(%arg0: i32) -> (i32, i32, i32) {
    %c0_i32 = arith.constant 0 : i32
    %c0_i32_0 = arith.constant 0 : i32
    %c0_i32_1 = arith.constant 0 : i32
    return %arg0, %c0_i32, %c0_i32_0 : i32, i32, i32
  }
}

module attributes {stable_mosaic.version = 11 : i64} {
  func.func @_affine_act_kernel(%arg0: i32, %arg1: memref<16x128xf32, #tpu.memory_space<vmem>>, %arg2: memref<1x128xf32, #tpu.memory_space<vmem>>, %arg3: memref<1x128xf32, #tpu.memory_space<vmem>>, %arg4: memref<16x128xf32, #tpu.memory_space<vmem>>) attributes {dimension_semantics = [#tpu.dimension_semantics<parallel>], iteration_bounds = array<i64: 1>, scalar_prefetch = 0 : i64, scratch_operands = 0 : i64, tpu.core_type = #tpu.core_type<tc>, window_params = [{transform_indices = @transform_0, window_bounds = array<i64: 16, 128>}, {pipeline_mode = #tpu.pipeline_mode<synchronous>, transform_indices = @transform_1, window_bounds = array<i64: 1, 128>}, {pipeline_mode = #tpu.pipeline_mode<synchronous>, transform_indices = @transform_2, window_bounds = array<i64: 1, 128>}, {transform_indices = @transform_3, window_bounds = array<i64: 16, 128>}]} {
    %c0 = arith.constant 0 : index
    %c0_0 = arith.constant 0 : index
    %0 = vector.load %arg1[%c0, %c0_0] : memref<16x128xf32, #tpu.memory_space<vmem>>, vector<16x128xf32>
    %c0_1 = arith.constant 0 : index
    %c0_2 = arith.constant 0 : index
    %1 = vector.load %arg2[%c0_1, %c0_2] : memref<1x128xf32, #tpu.memory_space<vmem>>, vector<1x128xf32>
    %2 = vector.broadcast %1 : vector<1x128xf32> to vector<16x128xf32>
    %3 = arith.mulf %0, %2 : vector<16x128xf32>
    %c0_3 = arith.constant 0 : index
    %c0_4 = arith.constant 0 : index
    %4 = vector.load %arg3[%c0_3, %c0_4] : memref<1x128xf32, #tpu.memory_space<vmem>>, vector<1x128xf32>
    %5 = vector.broadcast %4 : vector<1x128xf32> to vector<16x128xf32>
    %6 = arith.addf %3, %5 : vector<16x128xf32>
    %cst = arith.constant 0.000000e+00 : f32
    %7 = vector.broadcast %cst : f32 to vector<16x128xf32>
    %8 = arith.maximumf %6, %7 : vector<16x128xf32>
    %c0_5 = arith.constant 0 : index
    %c0_6 = arith.constant 0 : index
    %9 = vector.load %arg4[%c0_5, %c0_6] : memref<16x128xf32, #tpu.memory_space<vmem>>, vector<16x128xf32>
    tpu.vector_store %arg4[%c0_5, %c0_6], %8 {strides = array<i32>} : memref<16x128xf32, #tpu.memory_space<vmem>>, vector<16x128xf32>,
    return
  }
  func.func @transform_0(%arg0: i32) -> (i32, i32) {
    %c0_i32 = arith.constant 0 : i32
    %c0_i32_0 = arith.constant 0 : i32
    return %arg0, %c0_i32 : i32, i32
  }
  func.func @transform_1(%arg0: i32) -> (i32, i32) {
    %c0_i32 = arith.constant 0 : i32
    %c0_i32_0 = arith.constant 0 : i32
    %c0_i32_1 = arith.constant 0 : i32
    return %c0_i32, %c0_i32_0 : i32, i32
  }
  func.func @transform_2(%arg0: i32) -> (i32, i32) {
    %c0_i32 = arith.constant 0 : i32
    %c0_i32_0 = arith.constant 0 : i32
    %c0_i32_1 = arith.constant 0 : i32
    return %c0_i32, %c0_i32_0 : i32, i32
  }
  func.func @transform_3(%arg0: i32) -> (i32, i32) {
    %c0_i32 = arith.constant 0 : i32
    %c0_i32_0 = arith.constant 0 : i32
    return %arg0, %c0_i32 : i32, i32
  }
}

module attributes {stable_mosaic.version = 11 : i64} {
  func.func @_conv_tap_kernel(%arg0: i32, %arg1: memref<1x1x110x16xf32, #tpu.memory_space<vmem>>, %arg2: memref<9x16x16xf32, #tpu.memory_space<vmem>>, %arg3: memref<1x16xf32, #tpu.memory_space<vmem>>, %arg4: memref<1x16xf32, #tpu.memory_space<vmem>>, %arg5: memref<1x80x16xf32, #tpu.memory_space<vmem>>) attributes {dimension_semantics = [#tpu.dimension_semantics<parallel>], iteration_bounds = array<i64: 2>, scalar_prefetch = 0 : i64, scratch_operands = 0 : i64, tpu.core_type = #tpu.core_type<tc>, window_params = [{transform_indices = @transform_0, window_bounds = array<i64: 1, 1, 110, 16>}, {pipeline_mode = #tpu.pipeline_mode<synchronous>, transform_indices = @transform_1, window_bounds = array<i64: 9, 16, 16>}, {pipeline_mode = #tpu.pipeline_mode<synchronous>, transform_indices = @transform_2, window_bounds = array<i64: 1, 16>}, {pipeline_mode = #tpu.pipeline_mode<synchronous>, transform_indices = @transform_3, window_bounds = array<i64: 1, 16>}, {transform_indices = @transform_4, window_bounds = array<i64: 1, 80, 16>}]} {
    %c0 = arith.constant 0 : index
    %c0_0 = arith.constant 0 : index
    %c0_1 = arith.constant 0 : index
    %c0_2 = arith.constant 0 : index
    %0 = vector.load %arg1[%c0, %c0_0, %c0_1, %c0_2] : memref<1x1x110x16xf32, #tpu.memory_space<vmem>>, vector<1x1x80x16xf32>
    %1 = vector.shape_cast %0 : vector<1x1x80x16xf32> to vector<80x16xf32>
    %c0_3 = arith.constant 0 : index
    %c0_4 = arith.constant 0 : index
    %c0_5 = arith.constant 0 : index
    %2 = vector.load %arg2[%c0_3, %c0_4, %c0_5] : memref<9x16x16xf32, #tpu.memory_space<vmem>>, vector<1x16x16xf32>
    %3 = vector.shape_cast %2 : vector<1x16x16xf32> to vector<16x16xf32>
    %cst = arith.constant dense<0.000000e+00> : vector<80x16xf32>
    %4 = tpu.matmul %1, %3, %cst {dimension_numbers = #tpu.dot_dimension_numbers<[1], [0], [0], [1], [0, 0, 1, 1], [], []>} : vector<80x16xf32>, vector<16x16xf32>, vector<80x16xf32> -> vector<80x16xf32>
    %c0_6 = arith.constant 0 : index
    %c0_7 = arith.constant 0 : index
    %c1 = arith.constant 1 : index
    %c0_8 = arith.constant 0 : index
    %5 = vector.load %arg1[%c0_6, %c0_7, %c1, %c0_8] : memref<1x1x110x16xf32, #tpu.memory_space<vmem>>, vector<1x1x80x16xf32>
    %6 = vector.shape_cast %5 : vector<1x1x80x16xf32> to vector<80x16xf32>
    %c1_9 = arith.constant 1 : index
    %c0_10 = arith.constant 0 : index
    %c0_11 = arith.constant 0 : index
    %7 = vector.load %arg2[%c1_9, %c0_10, %c0_11] : memref<9x16x16xf32, #tpu.memory_space<vmem>>, vector<1x16x16xf32>
    %8 = vector.shape_cast %7 : vector<1x16x16xf32> to vector<16x16xf32>
    %cst_12 = arith.constant dense<0.000000e+00> : vector<80x16xf32>
    %9 = tpu.matmul %6, %8, %cst_12 {dimension_numbers = #tpu.dot_dimension_numbers<[1], [0], [0], [1], [0, 0, 1, 1], [], []>} : vector<80x16xf32>, vector<16x16xf32>, vector<80x16xf32> -> vector<80x16xf32>
    %10 = arith.addf %4, %9 : vector<80x16xf32>
    %c0_13 = arith.constant 0 : index
    %c0_14 = arith.constant 0 : index
    %c2 = arith.constant 2 : index
    %c0_15 = arith.constant 0 : index
    %11 = vector.load %arg1[%c0_13, %c0_14, %c2, %c0_15] : memref<1x1x110x16xf32, #tpu.memory_space<vmem>>, vector<1x1x80x16xf32>
    %12 = vector.shape_cast %11 : vector<1x1x80x16xf32> to vector<80x16xf32>
    %c2_16 = arith.constant 2 : index
    %c0_17 = arith.constant 0 : index
    %c0_18 = arith.constant 0 : index
    %13 = vector.load %arg2[%c2_16, %c0_17, %c0_18] : memref<9x16x16xf32, #tpu.memory_space<vmem>>, vector<1x16x16xf32>
    %14 = vector.shape_cast %13 : vector<1x16x16xf32> to vector<16x16xf32>
    %cst_19 = arith.constant dense<0.000000e+00> : vector<80x16xf32>
    %15 = tpu.matmul %12, %14, %cst_19 {dimension_numbers = #tpu.dot_dimension_numbers<[1], [0], [0], [1], [0, 0, 1, 1], [], []>} : vector<80x16xf32>, vector<16x16xf32>, vector<80x16xf32> -> vector<80x16xf32>
    %16 = arith.addf %10, %15 : vector<80x16xf32>
    %c0_20 = arith.constant 0 : index
    %c0_21 = arith.constant 0 : index
    %c10 = arith.constant 10 : index
    %c0_22 = arith.constant 0 : index
    %17 = vector.load %arg1[%c0_20, %c0_21, %c10, %c0_22] : memref<1x1x110x16xf32, #tpu.memory_space<vmem>>, vector<1x1x80x16xf32>
    %18 = vector.shape_cast %17 : vector<1x1x80x16xf32> to vector<80x16xf32>
    %c3 = arith.constant 3 : index
    %c0_23 = arith.constant 0 : index
    %c0_24 = arith.constant 0 : index
    %19 = vector.load %arg2[%c3, %c0_23, %c0_24] : memref<9x16x16xf32, #tpu.memory_space<vmem>>, vector<1x16x16xf32>
    %20 = vector.shape_cast %19 : vector<1x16x16xf32> to vector<16x16xf32>
    %cst_25 = arith.constant dense<0.000000e+00> : vector<80x16xf32>
    %21 = tpu.matmul %18, %20, %cst_25 {dimension_numbers = #tpu.dot_dimension_numbers<[1], [0], [0], [1], [0, 0, 1, 1], [], []>} : vector<80x16xf32>, vector<16x16xf32>, vector<80x16xf32> -> vector<80x16xf32>
    %22 = arith.addf %16, %21 : vector<80x16xf32>
    %c0_26 = arith.constant 0 : index
    %c0_27 = arith.constant 0 : index
    %c11 = arith.constant 11 : index
    %c0_28 = arith.constant 0 : index
    %23 = vector.load %arg1[%c0_26, %c0_27, %c11, %c0_28] : memref<1x1x110x16xf32, #tpu.memory_space<vmem>>, vector<1x1x80x16xf32>
    %24 = vector.shape_cast %23 : vector<1x1x80x16xf32> to vector<80x16xf32>
    %c4 = arith.constant 4 : index
    %c0_29 = arith.constant 0 : index
    %c0_30 = arith.constant 0 : index
    %25 = vector.load %arg2[%c4, %c0_29, %c0_30] : memref<9x16x16xf32, #tpu.memory_space<vmem>>, vector<1x16x16xf32>
    %26 = vector.shape_cast %25 : vector<1x16x16xf32> to vector<16x16xf32>
    %cst_31 = arith.constant dense<0.000000e+00> : vector<80x16xf32>
    %27 = tpu.matmul %24, %26, %cst_31 {dimension_numbers = #tpu.dot_dimension_numbers<[1], [0], [0], [1], [0, 0, 1, 1], [], []>} : vector<80x16xf32>, vector<16x16xf32>, vector<80x16xf32> -> vector<80x16xf32>
    %28 = arith.addf %22, %27 : vector<80x16xf32>
    %c0_32 = arith.constant 0 : index
    %c0_33 = arith.constant 0 : index
    %c12 = arith.constant 12 : index
    %c0_34 = arith.constant 0 : index
    %29 = vector.load %arg1[%c0_32, %c0_33, %c12, %c0_34] : memref<1x1x110x16xf32, #tpu.memory_space<vmem>>, vector<1x1x80x16xf32>
    %30 = vector.shape_cast %29 : vector<1x1x80x16xf32> to vector<80x16xf32>
    %c5 = arith.constant 5 : index
    %c0_35 = arith.constant 0 : index
    %c0_36 = arith.constant 0 : index
    %31 = vector.load %arg2[%c5, %c0_35, %c0_36] : memref<9x16x16xf32, #tpu.memory_space<vmem>>, vector<1x16x16xf32>
    %32 = vector.shape_cast %31 : vector<1x16x16xf32> to vector<16x16xf32>
    %cst_37 = arith.constant dense<0.000000e+00> : vector<80x16xf32>
    %33 = tpu.matmul %30, %32, %cst_37 {dimension_numbers = #tpu.dot_dimension_numbers<[1], [0], [0], [1], [0, 0, 1, 1], [], []>} : vector<80x16xf32>, vector<16x16xf32>, vector<80x16xf32> -> vector<80x16xf32>
    %34 = arith.addf %28, %33 : vector<80x16xf32>
    %c0_38 = arith.constant 0 : index
    %c0_39 = arith.constant 0 : index
    %c20 = arith.constant 20 : index
    %c0_40 = arith.constant 0 : index
    %35 = vector.load %arg1[%c0_38, %c0_39, %c20, %c0_40] : memref<1x1x110x16xf32, #tpu.memory_space<vmem>>, vector<1x1x80x16xf32>
    %36 = vector.shape_cast %35 : vector<1x1x80x16xf32> to vector<80x16xf32>
    %c6 = arith.constant 6 : index
    %c0_41 = arith.constant 0 : index
    %c0_42 = arith.constant 0 : index
    %37 = vector.load %arg2[%c6, %c0_41, %c0_42] : memref<9x16x16xf32, #tpu.memory_space<vmem>>, vector<1x16x16xf32>
    %38 = vector.shape_cast %37 : vector<1x16x16xf32> to vector<16x16xf32>
    %cst_43 = arith.constant dense<0.000000e+00> : vector<80x16xf32>
    %39 = tpu.matmul %36, %38, %cst_43 {dimension_numbers = #tpu.dot_dimension_numbers<[1], [0], [0], [1], [0, 0, 1, 1], [], []>} : vector<80x16xf32>, vector<16x16xf32>, vector<80x16xf32> -> vector<80x16xf32>
    %40 = arith.addf %34, %39 : vector<80x16xf32>
    %c0_44 = arith.constant 0 : index
    %c0_45 = arith.constant 0 : index
    %c21 = arith.constant 21 : index
    %c0_46 = arith.constant 0 : index
    %41 = vector.load %arg1[%c0_44, %c0_45, %c21, %c0_46] : memref<1x1x110x16xf32, #tpu.memory_space<vmem>>, vector<1x1x80x16xf32>
    %42 = vector.shape_cast %41 : vector<1x1x80x16xf32> to vector<80x16xf32>
    %c7 = arith.constant 7 : index
    %c0_47 = arith.constant 0 : index
    %c0_48 = arith.constant 0 : index
    %43 = vector.load %arg2[%c7, %c0_47, %c0_48] : memref<9x16x16xf32, #tpu.memory_space<vmem>>, vector<1x16x16xf32>
    %44 = vector.shape_cast %43 : vector<1x16x16xf32> to vector<16x16xf32>
    %cst_49 = arith.constant dense<0.000000e+00> : vector<80x16xf32>
    %45 = tpu.matmul %42, %44, %cst_49 {dimension_numbers = #tpu.dot_dimension_numbers<[1], [0], [0], [1], [0, 0, 1, 1], [], []>} : vector<80x16xf32>, vector<16x16xf32>, vector<80x16xf32> -> vector<80x16xf32>
    %46 = arith.addf %40, %45 : vector<80x16xf32>
    %c0_50 = arith.constant 0 : index
    %c0_51 = arith.constant 0 : index
    %c22 = arith.constant 22 : index
    %c0_52 = arith.constant 0 : index
    %47 = vector.load %arg1[%c0_50, %c0_51, %c22, %c0_52] : memref<1x1x110x16xf32, #tpu.memory_space<vmem>>, vector<1x1x80x16xf32>
    %48 = vector.shape_cast %47 : vector<1x1x80x16xf32> to vector<80x16xf32>
    %c8 = arith.constant 8 : index
    %c0_53 = arith.constant 0 : index
    %c0_54 = arith.constant 0 : index
    %49 = vector.load %arg2[%c8, %c0_53, %c0_54] : memref<9x16x16xf32, #tpu.memory_space<vmem>>, vector<1x16x16xf32>
    %50 = vector.shape_cast %49 : vector<1x16x16xf32> to vector<16x16xf32>
    %cst_55 = arith.constant dense<0.000000e+00> : vector<80x16xf32>
    %51 = tpu.matmul %48, %50, %cst_55 {dimension_numbers = #tpu.dot_dimension_numbers<[1], [0], [0], [1], [0, 0, 1, 1], [], []>} : vector<80x16xf32>, vector<16x16xf32>, vector<80x16xf32> -> vector<80x16xf32>
    %52 = arith.addf %46, %51 : vector<80x16xf32>
    %c0_56 = arith.constant 0 : index
    %c0_57 = arith.constant 0 : index
    %53 = vector.load %arg3[%c0_56, %c0_57] : memref<1x16xf32, #tpu.memory_space<vmem>>, vector<1x16xf32>
    %54 = vector.broadcast %53 : vector<1x16xf32> to vector<80x16xf32>
    %55 = arith.mulf %52, %54 : vector<80x16xf32>
    %c0_58 = arith.constant 0 : index
    %c0_59 = arith.constant 0 : index
    %56 = vector.load %arg4[%c0_58, %c0_59] : memref<1x16xf32, #tpu.memory_space<vmem>>, vector<1x16xf32>
    %57 = vector.broadcast %56 : vector<1x16xf32> to vector<80x16xf32>
    %58 = arith.addf %55, %57 : vector<80x16xf32>
    %cst_60 = arith.constant 0.000000e+00 : f32
    %59 = vector.broadcast %cst_60 : f32 to vector<80x16xf32>
    %60 = arith.maximumf %58, %59 : vector<80x16xf32>
    %c0_61 = arith.constant 0 : index
    %c0_62 = arith.constant 0 : index
    %c0_63 = arith.constant 0 : index
    %61 = vector.load %arg5[%c0_61, %c0_62, %c0_63] : memref<1x80x16xf32, #tpu.memory_space<vmem>>, vector<1x80x16xf32>
    %62 = vector.shape_cast %61 : vector<1x80x16xf32> to vector<80x16xf32>
    %63 = vector.shape_cast %60 : vector<80x16xf32> to vector<1x80x16xf32>
    tpu.vector_store %arg5[%c0_61, %c0_62, %c0_63], %63 {strides = array<i32>} : memref<1x80x16xf32, #tpu.memory_space<vmem>>, vector<1x80x16xf32>,
    return
  }
  func.func @transform_0(%arg0: i32) -> (i32, i32, i32, i32) {
    %c0_i32 = arith.constant 0 : i32
    %c0_i32_0 = arith.constant 0 : i32
    %c0_i32_1 = arith.constant 0 : i32
    %c0_i32_2 = arith.constant 0 : i32
    return %c0_i32, %arg0, %c0_i32_0, %c0_i32_1 : i32, i32, i32, i32
  }
  func.func @transform_1(%arg0: i32) -> (i32, i32, i32) {
    %c0_i32 = arith.constant 0 : i32
    %c0_i32_0 = arith.constant 0 : i32
    %c0_i32_1 = arith.constant 0 : i32
    %c0_i32_2 = arith.constant 0 : i32
    return %c0_i32, %c0_i32_0, %c0_i32_1 : i32, i32, i32
  }
  func.func @transform_2(%arg0: i32) -> (i32, i32) {
    %c0_i32 = arith.constant 0 : i32
    %c0_i32_0 = arith.constant 0 : i32
    %c0_i32_1 = arith.constant 0 : i32
    return %c0_i32, %c0_i32_0 : i32, i32
  }
  func.func @transform_3(%arg0: i32) -> (i32, i32) {
    %c0_i32 = arith.constant 0 : i32
    %c0_i32_0 = arith.constant 0 : i32
    %c0_i32_1 = arith.constant 0 : i32
    return %c0_i32, %c0_i32_0 : i32, i32
  }
  func.func @transform_4(%arg0: i32) -> (i32, i32, i32) {
    %c0_i32 = arith.constant 0 : i32
    %c0_i32_0 = arith.constant 0 : i32
    %c0_i32_1 = arith.constant 0 : i32
    return %arg0, %c0_i32, %c0_i32_0 : i32, i32, i32
  }
}

module attributes {stable_mosaic.version = 11 : i64} {
  func.func @_conv_tap_kernel(%arg0: i32, %arg1: memref<1x1x110x16xf32, #tpu.memory_space<vmem>>, %arg2: memref<9x16x16xf32, #tpu.memory_space<vmem>>, %arg3: memref<1x16xf32, #tpu.memory_space<vmem>>, %arg4: memref<1x16xf32, #tpu.memory_space<vmem>>, %arg5: memref<1x80x16xf32, #tpu.memory_space<vmem>>) attributes {dimension_semantics = [#tpu.dimension_semantics<parallel>], iteration_bounds = array<i64: 2>, scalar_prefetch = 0 : i64, scratch_operands = 0 : i64, tpu.core_type = #tpu.core_type<tc>, window_params = [{transform_indices = @transform_0, window_bounds = array<i64: 1, 1, 110, 16>}, {pipeline_mode = #tpu.pipeline_mode<synchronous>, transform_indices = @transform_1, window_bounds = array<i64: 9, 16, 16>}, {pipeline_mode = #tpu.pipeline_mode<synchronous>, transform_indices = @transform_2, window_bounds = array<i64: 1, 16>}, {pipeline_mode = #tpu.pipeline_mode<synchronous>, transform_indices = @transform_3, window_bounds = array<i64: 1, 16>}, {transform_indices = @transform_4, window_bounds = array<i64: 1, 80, 16>}]} {
    %c0 = arith.constant 0 : index
    %c0_0 = arith.constant 0 : index
    %c0_1 = arith.constant 0 : index
    %c0_2 = arith.constant 0 : index
    %0 = vector.load %arg1[%c0, %c0_0, %c0_1, %c0_2] : memref<1x1x110x16xf32, #tpu.memory_space<vmem>>, vector<1x1x80x16xf32>
    %1 = vector.shape_cast %0 : vector<1x1x80x16xf32> to vector<80x16xf32>
    %c0_3 = arith.constant 0 : index
    %c0_4 = arith.constant 0 : index
    %c0_5 = arith.constant 0 : index
    %2 = vector.load %arg2[%c0_3, %c0_4, %c0_5] : memref<9x16x16xf32, #tpu.memory_space<vmem>>, vector<1x16x16xf32>
    %3 = vector.shape_cast %2 : vector<1x16x16xf32> to vector<16x16xf32>
    %cst = arith.constant dense<0.000000e+00> : vector<80x16xf32>
    %4 = tpu.matmul %1, %3, %cst {dimension_numbers = #tpu.dot_dimension_numbers<[1], [0], [0], [1], [0, 0, 1, 1], [], []>} : vector<80x16xf32>, vector<16x16xf32>, vector<80x16xf32> -> vector<80x16xf32>
    %c0_6 = arith.constant 0 : index
    %c0_7 = arith.constant 0 : index
    %c1 = arith.constant 1 : index
    %c0_8 = arith.constant 0 : index
    %5 = vector.load %arg1[%c0_6, %c0_7, %c1, %c0_8] : memref<1x1x110x16xf32, #tpu.memory_space<vmem>>, vector<1x1x80x16xf32>
    %6 = vector.shape_cast %5 : vector<1x1x80x16xf32> to vector<80x16xf32>
    %c1_9 = arith.constant 1 : index
    %c0_10 = arith.constant 0 : index
    %c0_11 = arith.constant 0 : index
    %7 = vector.load %arg2[%c1_9, %c0_10, %c0_11] : memref<9x16x16xf32, #tpu.memory_space<vmem>>, vector<1x16x16xf32>
    %8 = vector.shape_cast %7 : vector<1x16x16xf32> to vector<16x16xf32>
    %cst_12 = arith.constant dense<0.000000e+00> : vector<80x16xf32>
    %9 = tpu.matmul %6, %8, %cst_12 {dimension_numbers = #tpu.dot_dimension_numbers<[1], [0], [0], [1], [0, 0, 1, 1], [], []>} : vector<80x16xf32>, vector<16x16xf32>, vector<80x16xf32> -> vector<80x16xf32>
    %10 = arith.addf %4, %9 : vector<80x16xf32>
    %c0_13 = arith.constant 0 : index
    %c0_14 = arith.constant 0 : index
    %c2 = arith.constant 2 : index
    %c0_15 = arith.constant 0 : index
    %11 = vector.load %arg1[%c0_13, %c0_14, %c2, %c0_15] : memref<1x1x110x16xf32, #tpu.memory_space<vmem>>, vector<1x1x80x16xf32>
    %12 = vector.shape_cast %11 : vector<1x1x80x16xf32> to vector<80x16xf32>
    %c2_16 = arith.constant 2 : index
    %c0_17 = arith.constant 0 : index
    %c0_18 = arith.constant 0 : index
    %13 = vector.load %arg2[%c2_16, %c0_17, %c0_18] : memref<9x16x16xf32, #tpu.memory_space<vmem>>, vector<1x16x16xf32>
    %14 = vector.shape_cast %13 : vector<1x16x16xf32> to vector<16x16xf32>
    %cst_19 = arith.constant dense<0.000000e+00> : vector<80x16xf32>
    %15 = tpu.matmul %12, %14, %cst_19 {dimension_numbers = #tpu.dot_dimension_numbers<[1], [0], [0], [1], [0, 0, 1, 1], [], []>} : vector<80x16xf32>, vector<16x16xf32>, vector<80x16xf32> -> vector<80x16xf32>
    %16 = arith.addf %10, %15 : vector<80x16xf32>
    %c0_20 = arith.constant 0 : index
    %c0_21 = arith.constant 0 : index
    %c10 = arith.constant 10 : index
    %c0_22 = arith.constant 0 : index
    %17 = vector.load %arg1[%c0_20, %c0_21, %c10, %c0_22] : memref<1x1x110x16xf32, #tpu.memory_space<vmem>>, vector<1x1x80x16xf32>
    %18 = vector.shape_cast %17 : vector<1x1x80x16xf32> to vector<80x16xf32>
    %c3 = arith.constant 3 : index
    %c0_23 = arith.constant 0 : index
    %c0_24 = arith.constant 0 : index
    %19 = vector.load %arg2[%c3, %c0_23, %c0_24] : memref<9x16x16xf32, #tpu.memory_space<vmem>>, vector<1x16x16xf32>
    %20 = vector.shape_cast %19 : vector<1x16x16xf32> to vector<16x16xf32>
    %cst_25 = arith.constant dense<0.000000e+00> : vector<80x16xf32>
    %21 = tpu.matmul %18, %20, %cst_25 {dimension_numbers = #tpu.dot_dimension_numbers<[1], [0], [0], [1], [0, 0, 1, 1], [], []>} : vector<80x16xf32>, vector<16x16xf32>, vector<80x16xf32> -> vector<80x16xf32>
    %22 = arith.addf %16, %21 : vector<80x16xf32>
    %c0_26 = arith.constant 0 : index
    %c0_27 = arith.constant 0 : index
    %c11 = arith.constant 11 : index
    %c0_28 = arith.constant 0 : index
    %23 = vector.load %arg1[%c0_26, %c0_27, %c11, %c0_28] : memref<1x1x110x16xf32, #tpu.memory_space<vmem>>, vector<1x1x80x16xf32>
    %24 = vector.shape_cast %23 : vector<1x1x80x16xf32> to vector<80x16xf32>
    %c4 = arith.constant 4 : index
    %c0_29 = arith.constant 0 : index
    %c0_30 = arith.constant 0 : index
    %25 = vector.load %arg2[%c4, %c0_29, %c0_30] : memref<9x16x16xf32, #tpu.memory_space<vmem>>, vector<1x16x16xf32>
    %26 = vector.shape_cast %25 : vector<1x16x16xf32> to vector<16x16xf32>
    %cst_31 = arith.constant dense<0.000000e+00> : vector<80x16xf32>
    %27 = tpu.matmul %24, %26, %cst_31 {dimension_numbers = #tpu.dot_dimension_numbers<[1], [0], [0], [1], [0, 0, 1, 1], [], []>} : vector<80x16xf32>, vector<16x16xf32>, vector<80x16xf32> -> vector<80x16xf32>
    %28 = arith.addf %22, %27 : vector<80x16xf32>
    %c0_32 = arith.constant 0 : index
    %c0_33 = arith.constant 0 : index
    %c12 = arith.constant 12 : index
    %c0_34 = arith.constant 0 : index
    %29 = vector.load %arg1[%c0_32, %c0_33, %c12, %c0_34] : memref<1x1x110x16xf32, #tpu.memory_space<vmem>>, vector<1x1x80x16xf32>
    %30 = vector.shape_cast %29 : vector<1x1x80x16xf32> to vector<80x16xf32>
    %c5 = arith.constant 5 : index
    %c0_35 = arith.constant 0 : index
    %c0_36 = arith.constant 0 : index
    %31 = vector.load %arg2[%c5, %c0_35, %c0_36] : memref<9x16x16xf32, #tpu.memory_space<vmem>>, vector<1x16x16xf32>
    %32 = vector.shape_cast %31 : vector<1x16x16xf32> to vector<16x16xf32>
    %cst_37 = arith.constant dense<0.000000e+00> : vector<80x16xf32>
    %33 = tpu.matmul %30, %32, %cst_37 {dimension_numbers = #tpu.dot_dimension_numbers<[1], [0], [0], [1], [0, 0, 1, 1], [], []>} : vector<80x16xf32>, vector<16x16xf32>, vector<80x16xf32> -> vector<80x16xf32>
    %34 = arith.addf %28, %33 : vector<80x16xf32>
    %c0_38 = arith.constant 0 : index
    %c0_39 = arith.constant 0 : index
    %c20 = arith.constant 20 : index
    %c0_40 = arith.constant 0 : index
    %35 = vector.load %arg1[%c0_38, %c0_39, %c20, %c0_40] : memref<1x1x110x16xf32, #tpu.memory_space<vmem>>, vector<1x1x80x16xf32>
    %36 = vector.shape_cast %35 : vector<1x1x80x16xf32> to vector<80x16xf32>
    %c6 = arith.constant 6 : index
    %c0_41 = arith.constant 0 : index
    %c0_42 = arith.constant 0 : index
    %37 = vector.load %arg2[%c6, %c0_41, %c0_42] : memref<9x16x16xf32, #tpu.memory_space<vmem>>, vector<1x16x16xf32>
    %38 = vector.shape_cast %37 : vector<1x16x16xf32> to vector<16x16xf32>
    %cst_43 = arith.constant dense<0.000000e+00> : vector<80x16xf32>
    %39 = tpu.matmul %36, %38, %cst_43 {dimension_numbers = #tpu.dot_dimension_numbers<[1], [0], [0], [1], [0, 0, 1, 1], [], []>} : vector<80x16xf32>, vector<16x16xf32>, vector<80x16xf32> -> vector<80x16xf32>
    %40 = arith.addf %34, %39 : vector<80x16xf32>
    %c0_44 = arith.constant 0 : index
    %c0_45 = arith.constant 0 : index
    %c21 = arith.constant 21 : index
    %c0_46 = arith.constant 0 : index
    %41 = vector.load %arg1[%c0_44, %c0_45, %c21, %c0_46] : memref<1x1x110x16xf32, #tpu.memory_space<vmem>>, vector<1x1x80x16xf32>
    %42 = vector.shape_cast %41 : vector<1x1x80x16xf32> to vector<80x16xf32>
    %c7 = arith.constant 7 : index
    %c0_47 = arith.constant 0 : index
    %c0_48 = arith.constant 0 : index
    %43 = vector.load %arg2[%c7, %c0_47, %c0_48] : memref<9x16x16xf32, #tpu.memory_space<vmem>>, vector<1x16x16xf32>
    %44 = vector.shape_cast %43 : vector<1x16x16xf32> to vector<16x16xf32>
    %cst_49 = arith.constant dense<0.000000e+00> : vector<80x16xf32>
    %45 = tpu.matmul %42, %44, %cst_49 {dimension_numbers = #tpu.dot_dimension_numbers<[1], [0], [0], [1], [0, 0, 1, 1], [], []>} : vector<80x16xf32>, vector<16x16xf32>, vector<80x16xf32> -> vector<80x16xf32>
    %46 = arith.addf %40, %45 : vector<80x16xf32>
    %c0_50 = arith.constant 0 : index
    %c0_51 = arith.constant 0 : index
    %c22 = arith.constant 22 : index
    %c0_52 = arith.constant 0 : index
    %47 = vector.load %arg1[%c0_50, %c0_51, %c22, %c0_52] : memref<1x1x110x16xf32, #tpu.memory_space<vmem>>, vector<1x1x80x16xf32>
    %48 = vector.shape_cast %47 : vector<1x1x80x16xf32> to vector<80x16xf32>
    %c8 = arith.constant 8 : index
    %c0_53 = arith.constant 0 : index
    %c0_54 = arith.constant 0 : index
    %49 = vector.load %arg2[%c8, %c0_53, %c0_54] : memref<9x16x16xf32, #tpu.memory_space<vmem>>, vector<1x16x16xf32>
    %50 = vector.shape_cast %49 : vector<1x16x16xf32> to vector<16x16xf32>
    %cst_55 = arith.constant dense<0.000000e+00> : vector<80x16xf32>
    %51 = tpu.matmul %48, %50, %cst_55 {dimension_numbers = #tpu.dot_dimension_numbers<[1], [0], [0], [1], [0, 0, 1, 1], [], []>} : vector<80x16xf32>, vector<16x16xf32>, vector<80x16xf32> -> vector<80x16xf32>
    %52 = arith.addf %46, %51 : vector<80x16xf32>
    %c0_56 = arith.constant 0 : index
    %c0_57 = arith.constant 0 : index
    %c0_58 = arith.constant 0 : index
    %53 = vector.load %arg5[%c0_56, %c0_57, %c0_58] : memref<1x80x16xf32, #tpu.memory_space<vmem>>, vector<1x80x16xf32>
    %54 = vector.shape_cast %53 : vector<1x80x16xf32> to vector<80x16xf32>
    %55 = vector.shape_cast %52 : vector<80x16xf32> to vector<1x80x16xf32>
    tpu.vector_store %arg5[%c0_56, %c0_57, %c0_58], %55 {strides = array<i32>} : memref<1x80x16xf32, #tpu.memory_space<vmem>>, vector<1x80x16xf32>,
    return
  }
  func.func @transform_0(%arg0: i32) -> (i32, i32, i32, i32) {
    %c0_i32 = arith.constant 0 : i32
    %c0_i32_0 = arith.constant 0 : i32
    %c0_i32_1 = arith.constant 0 : i32
    %c0_i32_2 = arith.constant 0 : i32
    return %c0_i32, %arg0, %c0_i32_0, %c0_i32_1 : i32, i32, i32, i32
  }
  func.func @transform_1(%arg0: i32) -> (i32, i32, i32) {
    %c0_i32 = arith.constant 0 : i32
    %c0_i32_0 = arith.constant 0 : i32
    %c0_i32_1 = arith.constant 0 : i32
    %c0_i32_2 = arith.constant 0 : i32
    return %c0_i32, %c0_i32_0, %c0_i32_1 : i32, i32, i32
  }
  func.func @transform_2(%arg0: i32) -> (i32, i32) {
    %c0_i32 = arith.constant 0 : i32
    %c0_i32_0 = arith.constant 0 : i32
    %c0_i32_1 = arith.constant 0 : i32
    return %c0_i32, %c0_i32_0 : i32, i32
  }
  func.func @transform_3(%arg0: i32) -> (i32, i32) {
    %c0_i32 = arith.constant 0 : i32
    %c0_i32_0 = arith.constant 0 : i32
    %c0_i32_1 = arith.constant 0 : i32
    return %c0_i32, %c0_i32_0 : i32, i32
  }
  func.func @transform_4(%arg0: i32) -> (i32, i32, i32) {
    %c0_i32 = arith.constant 0 : i32
    %c0_i32_0 = arith.constant 0 : i32
    %c0_i32_1 = arith.constant 0 : i32
    return %arg0, %c0_i32, %c0_i32_0 : i32, i32, i32
  }
}

module attributes {stable_mosaic.version = 11 : i64} {
  func.func @_add_kernel(%arg0: i32, %arg1: memref<16x128xf32, #tpu.memory_space<vmem>>, %arg2: memref<16x128xf32, #tpu.memory_space<vmem>>, %arg3: memref<16x128xf32, #tpu.memory_space<vmem>>) attributes {dimension_semantics = [#tpu.dimension_semantics<parallel>], iteration_bounds = array<i64: 1>, scalar_prefetch = 0 : i64, scratch_operands = 0 : i64, tpu.core_type = #tpu.core_type<tc>, window_params = [{transform_indices = @transform_0, window_bounds = array<i64: 16, 128>}, {transform_indices = @transform_1, window_bounds = array<i64: 16, 128>}, {transform_indices = @transform_2, window_bounds = array<i64: 16, 128>}]} {
    %c0 = arith.constant 0 : index
    %c0_0 = arith.constant 0 : index
    %0 = vector.load %arg1[%c0, %c0_0] : memref<16x128xf32, #tpu.memory_space<vmem>>, vector<16x128xf32>
    %c0_1 = arith.constant 0 : index
    %c0_2 = arith.constant 0 : index
    %1 = vector.load %arg2[%c0_1, %c0_2] : memref<16x128xf32, #tpu.memory_space<vmem>>, vector<16x128xf32>
    %2 = arith.addf %0, %1 : vector<16x128xf32>
    %c0_3 = arith.constant 0 : index
    %c0_4 = arith.constant 0 : index
    %3 = vector.load %arg3[%c0_3, %c0_4] : memref<16x128xf32, #tpu.memory_space<vmem>>, vector<16x128xf32>
    tpu.vector_store %arg3[%c0_3, %c0_4], %2 {strides = array<i32>} : memref<16x128xf32, #tpu.memory_space<vmem>>, vector<16x128xf32>,
    return
  }
  func.func @transform_0(%arg0: i32) -> (i32, i32) {
    %c0_i32 = arith.constant 0 : i32
    %c0_i32_0 = arith.constant 0 : i32
    return %arg0, %c0_i32 : i32, i32
  }
  func.func @transform_1(%arg0: i32) -> (i32, i32) {
    %c0_i32 = arith.constant 0 : i32
    %c0_i32_0 = arith.constant 0 : i32
    return %arg0, %c0_i32 : i32, i32
  }
  func.func @transform_2(%arg0: i32) -> (i32, i32) {
    %c0_i32 = arith.constant 0 : i32
    %c0_i32_0 = arith.constant 0 : i32
    return %arg0, %c0_i32 : i32, i32
  }
}

module attributes {stable_mosaic.version = 11 : i64} {
  func.func @_conv_tap_kernel(%arg0: i32, %arg1: memref<1x1x64x16xf32, #tpu.memory_space<vmem>>, %arg2: memref<1x16x16xf32, #tpu.memory_space<vmem>>, %arg3: memref<1x16xf32, #tpu.memory_space<vmem>>, %arg4: memref<1x16xf32, #tpu.memory_space<vmem>>, %arg5: memref<1x64x16xf32, #tpu.memory_space<vmem>>) attributes {dimension_semantics = [#tpu.dimension_semantics<parallel>], iteration_bounds = array<i64: 2>, scalar_prefetch = 0 : i64, scratch_operands = 0 : i64, tpu.core_type = #tpu.core_type<tc>, window_params = [{transform_indices = @transform_0, window_bounds = array<i64: 1, 1, 64, 16>}, {pipeline_mode = #tpu.pipeline_mode<synchronous>, transform_indices = @transform_1, window_bounds = array<i64: 1, 16, 16>}, {pipeline_mode = #tpu.pipeline_mode<synchronous>, transform_indices = @transform_2, window_bounds = array<i64: 1, 16>}, {pipeline_mode = #tpu.pipeline_mode<synchronous>, transform_indices = @transform_3, window_bounds = array<i64: 1, 16>}, {transform_indices = @transform_4, window_bounds = array<i64: 1, 64, 16>}]} {
    %c0 = arith.constant 0 : index
    %c0_0 = arith.constant 0 : index
    %c0_1 = arith.constant 0 : index
    %c0_2 = arith.constant 0 : index
    %0 = vector.load %arg1[%c0, %c0_0, %c0_1, %c0_2] : memref<1x1x64x16xf32, #tpu.memory_space<vmem>>, vector<1x1x64x16xf32>
    %1 = vector.shape_cast %0 : vector<1x1x64x16xf32> to vector<64x16xf32>
    %c0_3 = arith.constant 0 : index
    %c0_4 = arith.constant 0 : index
    %c0_5 = arith.constant 0 : index
    %2 = vector.load %arg2[%c0_3, %c0_4, %c0_5] : memref<1x16x16xf32, #tpu.memory_space<vmem>>, vector<1x16x16xf32>
    %3 = vector.shape_cast %2 : vector<1x16x16xf32> to vector<16x16xf32>
    %cst = arith.constant dense<0.000000e+00> : vector<64x16xf32>
    %4 = tpu.matmul %1, %3, %cst {dimension_numbers = #tpu.dot_dimension_numbers<[1], [0], [0], [1], [0, 0, 1, 1], [], []>} : vector<64x16xf32>, vector<16x16xf32>, vector<64x16xf32> -> vector<64x16xf32>
    %c0_6 = arith.constant 0 : index
    %c0_7 = arith.constant 0 : index
    %5 = vector.load %arg3[%c0_6, %c0_7] : memref<1x16xf32, #tpu.memory_space<vmem>>, vector<1x16xf32>
    %6 = vector.broadcast %5 : vector<1x16xf32> to vector<64x16xf32>
    %7 = arith.mulf %4, %6 : vector<64x16xf32>
    %c0_8 = arith.constant 0 : index
    %c0_9 = arith.constant 0 : index
    %8 = vector.load %arg4[%c0_8, %c0_9] : memref<1x16xf32, #tpu.memory_space<vmem>>, vector<1x16xf32>
    %9 = vector.broadcast %8 : vector<1x16xf32> to vector<64x16xf32>
    %10 = arith.addf %7, %9 : vector<64x16xf32>
    %c0_10 = arith.constant 0 : index
    %c0_11 = arith.constant 0 : index
    %c0_12 = arith.constant 0 : index
    %11 = vector.load %arg5[%c0_10, %c0_11, %c0_12] : memref<1x64x16xf32, #tpu.memory_space<vmem>>, vector<1x64x16xf32>
    %12 = vector.shape_cast %11 : vector<1x64x16xf32> to vector<64x16xf32>
    %13 = vector.shape_cast %10 : vector<64x16xf32> to vector<1x64x16xf32>
    tpu.vector_store %arg5[%c0_10, %c0_11, %c0_12], %13 {strides = array<i32>} : memref<1x64x16xf32, #tpu.memory_space<vmem>>, vector<1x64x16xf32>,
    return
  }
  func.func @transform_0(%arg0: i32) -> (i32, i32, i32, i32) {
    %c0_i32 = arith.constant 0 : i32
    %c0_i32_0 = arith.constant 0 : i32
    %c0_i32_1 = arith.constant 0 : i32
    %c0_i32_2 = arith.constant 0 : i32
    return %c0_i32, %arg0, %c0_i32_0, %c0_i32_1 : i32, i32, i32, i32
  }
  func.func @transform_1(%arg0: i32) -> (i32, i32, i32) {
    %c0_i32 = arith.constant 0 : i32
    %c0_i32_0 = arith.constant 0 : i32
    %c0_i32_1 = arith.constant 0 : i32
    %c0_i32_2 = arith.constant 0 : i32
    return %c0_i32, %c0_i32_0, %c0_i32_1 : i32, i32, i32
  }
  func.func @transform_2(%arg0: i32) -> (i32, i32) {
    %c0_i32 = arith.constant 0 : i32
    %c0_i32_0 = arith.constant 0 : i32
    %c0_i32_1 = arith.constant 0 : i32
    return %c0_i32, %c0_i32_0 : i32, i32
  }
  func.func @transform_3(%arg0: i32) -> (i32, i32) {
    %c0_i32 = arith.constant 0 : i32
    %c0_i32_0 = arith.constant 0 : i32
    %c0_i32_1 = arith.constant 0 : i32
    return %c0_i32, %c0_i32_0 : i32, i32
  }
  func.func @transform_4(%arg0: i32) -> (i32, i32, i32) {
    %c0_i32 = arith.constant 0 : i32
    %c0_i32_0 = arith.constant 0 : i32
    %c0_i32_1 = arith.constant 0 : i32
    return %arg0, %c0_i32, %c0_i32_0 : i32, i32, i32
  }
}

module attributes {stable_mosaic.version = 11 : i64} {
  func.func @_conv_tap_kernel(%arg0: i32, %arg1: memref<4x1x30x16xf32, #tpu.memory_space<vmem>>, %arg2: memref<9x16x32xf32, #tpu.memory_space<vmem>>, %arg3: memref<1x32xf32, #tpu.memory_space<vmem>>, %arg4: memref<1x32xf32, #tpu.memory_space<vmem>>, %arg5: memref<1x20x32xf32, #tpu.memory_space<vmem>>) attributes {dimension_semantics = [#tpu.dimension_semantics<parallel>], iteration_bounds = array<i64: 2>, scalar_prefetch = 0 : i64, scratch_operands = 0 : i64, tpu.core_type = #tpu.core_type<tc>, window_params = [{transform_indices = @transform_0, window_bounds = array<i64: 4, 1, 30, 16>}, {pipeline_mode = #tpu.pipeline_mode<synchronous>, transform_indices = @transform_1, window_bounds = array<i64: 9, 16, 32>}, {pipeline_mode = #tpu.pipeline_mode<synchronous>, transform_indices = @transform_2, window_bounds = array<i64: 1, 32>}, {pipeline_mode = #tpu.pipeline_mode<synchronous>, transform_indices = @transform_3, window_bounds = array<i64: 1, 32>}, {transform_indices = @transform_4, window_bounds = array<i64: 1, 20, 32>}]} {
    %c0 = arith.constant 0 : index
    %c0_0 = arith.constant 0 : index
    %c0_1 = arith.constant 0 : index
    %c0_2 = arith.constant 0 : index
    %0 = vector.load %arg1[%c0, %c0_0, %c0_1, %c0_2] : memref<4x1x30x16xf32, #tpu.memory_space<vmem>>, vector<1x1x20x16xf32>
    %1 = vector.shape_cast %0 : vector<1x1x20x16xf32> to vector<20x16xf32>
    %c0_3 = arith.constant 0 : index
    %c0_4 = arith.constant 0 : index
    %c0_5 = arith.constant 0 : index
    %2 = vector.load %arg2[%c0_3, %c0_4, %c0_5] : memref<9x16x32xf32, #tpu.memory_space<vmem>>, vector<1x16x32xf32>
    %3 = vector.shape_cast %2 : vector<1x16x32xf32> to vector<16x32xf32>
    %cst = arith.constant dense<0.000000e+00> : vector<20x32xf32>
    %4 = tpu.matmul %1, %3, %cst {dimension_numbers = #tpu.dot_dimension_numbers<[1], [0], [0], [1], [0, 0, 1, 1], [], []>} : vector<20x16xf32>, vector<16x32xf32>, vector<20x32xf32> -> vector<20x32xf32>
    %c1 = arith.constant 1 : index
    %c0_6 = arith.constant 0 : index
    %c0_7 = arith.constant 0 : index
    %c0_8 = arith.constant 0 : index
    %5 = vector.load %arg1[%c1, %c0_6, %c0_7, %c0_8] : memref<4x1x30x16xf32, #tpu.memory_space<vmem>>, vector<1x1x20x16xf32>
    %6 = vector.shape_cast %5 : vector<1x1x20x16xf32> to vector<20x16xf32>
    %c1_9 = arith.constant 1 : index
    %c0_10 = arith.constant 0 : index
    %c0_11 = arith.constant 0 : index
    %7 = vector.load %arg2[%c1_9, %c0_10, %c0_11] : memref<9x16x32xf32, #tpu.memory_space<vmem>>, vector<1x16x32xf32>
    %8 = vector.shape_cast %7 : vector<1x16x32xf32> to vector<16x32xf32>
    %cst_12 = arith.constant dense<0.000000e+00> : vector<20x32xf32>
    %9 = tpu.matmul %6, %8, %cst_12 {dimension_numbers = #tpu.dot_dimension_numbers<[1], [0], [0], [1], [0, 0, 1, 1], [], []>} : vector<20x16xf32>, vector<16x32xf32>, vector<20x32xf32> -> vector<20x32xf32>
    %10 = arith.addf %4, %9 : vector<20x32xf32>
    %c0_13 = arith.constant 0 : index
    %c0_14 = arith.constant 0 : index
    %c1_15 = arith.constant 1 : index
    %c0_16 = arith.constant 0 : index
    %11 = vector.load %arg1[%c0_13, %c0_14, %c1_15, %c0_16] : memref<4x1x30x16xf32, #tpu.memory_space<vmem>>, vector<1x1x20x16xf32>
    %12 = vector.shape_cast %11 : vector<1x1x20x16xf32> to vector<20x16xf32>
    %c2 = arith.constant 2 : index
    %c0_17 = arith.constant 0 : index
    %c0_18 = arith.constant 0 : index
    %13 = vector.load %arg2[%c2, %c0_17, %c0_18] : memref<9x16x32xf32, #tpu.memory_space<vmem>>, vector<1x16x32xf32>
    %14 = vector.shape_cast %13 : vector<1x16x32xf32> to vector<16x32xf32>
    %cst_19 = arith.constant dense<0.000000e+00> : vector<20x32xf32>
    %15 = tpu.matmul %12, %14, %cst_19 {dimension_numbers = #tpu.dot_dimension_numbers<[1], [0], [0], [1], [0, 0, 1, 1], [], []>} : vector<20x16xf32>, vector<16x32xf32>, vector<20x32xf32> -> vector<20x32xf32>
    %16 = arith.addf %10, %15 : vector<20x32xf32>
    %c2_20 = arith.constant 2 : index
    %c0_21 = arith.constant 0 : index
    %c0_22 = arith.constant 0 : index
    %c0_23 = arith.constant 0 : index
    %17 = vector.load %arg1[%c2_20, %c0_21, %c0_22, %c0_23] : memref<4x1x30x16xf32, #tpu.memory_space<vmem>>, vector<1x1x20x16xf32>
    %18 = vector.shape_cast %17 : vector<1x1x20x16xf32> to vector<20x16xf32>
    %c3 = arith.constant 3 : index
    %c0_24 = arith.constant 0 : index
    %c0_25 = arith.constant 0 : index
    %19 = vector.load %arg2[%c3, %c0_24, %c0_25] : memref<9x16x32xf32, #tpu.memory_space<vmem>>, vector<1x16x32xf32>
    %20 = vector.shape_cast %19 : vector<1x16x32xf32> to vector<16x32xf32>
    %cst_26 = arith.constant dense<0.000000e+00> : vector<20x32xf32>
    %21 = tpu.matmul %18, %20, %cst_26 {dimension_numbers = #tpu.dot_dimension_numbers<[1], [0], [0], [1], [0, 0, 1, 1], [], []>} : vector<20x16xf32>, vector<16x32xf32>, vector<20x32xf32> -> vector<20x32xf32>
    %22 = arith.addf %16, %21 : vector<20x32xf32>
    %c3_27 = arith.constant 3 : index
    %c0_28 = arith.constant 0 : index
    %c0_29 = arith.constant 0 : index
    %c0_30 = arith.constant 0 : index
    %23 = vector.load %arg1[%c3_27, %c0_28, %c0_29, %c0_30] : memref<4x1x30x16xf32, #tpu.memory_space<vmem>>, vector<1x1x20x16xf32>
    %24 = vector.shape_cast %23 : vector<1x1x20x16xf32> to vector<20x16xf32>
    %c4 = arith.constant 4 : index
    %c0_31 = arith.constant 0 : index
    %c0_32 = arith.constant 0 : index
    %25 = vector.load %arg2[%c4, %c0_31, %c0_32] : memref<9x16x32xf32, #tpu.memory_space<vmem>>, vector<1x16x32xf32>
    %26 = vector.shape_cast %25 : vector<1x16x32xf32> to vector<16x32xf32>
    %cst_33 = arith.constant dense<0.000000e+00> : vector<20x32xf32>
    %27 = tpu.matmul %24, %26, %cst_33 {dimension_numbers = #tpu.dot_dimension_numbers<[1], [0], [0], [1], [0, 0, 1, 1], [], []>} : vector<20x16xf32>, vector<16x32xf32>, vector<20x32xf32> -> vector<20x32xf32>
    %28 = arith.addf %22, %27 : vector<20x32xf32>
    %c2_34 = arith.constant 2 : index
    %c0_35 = arith.constant 0 : index
    %c1_36 = arith.constant 1 : index
    %c0_37 = arith.constant 0 : index
    %29 = vector.load %arg1[%c2_34, %c0_35, %c1_36, %c0_37] : memref<4x1x30x16xf32, #tpu.memory_space<vmem>>, vector<1x1x20x16xf32>
    %30 = vector.shape_cast %29 : vector<1x1x20x16xf32> to vector<20x16xf32>
    %c5 = arith.constant 5 : index
    %c0_38 = arith.constant 0 : index
    %c0_39 = arith.constant 0 : index
    %31 = vector.load %arg2[%c5, %c0_38, %c0_39] : memref<9x16x32xf32, #tpu.memory_space<vmem>>, vector<1x16x32xf32>
    %32 = vector.shape_cast %31 : vector<1x16x32xf32> to vector<16x32xf32>
    %cst_40 = arith.constant dense<0.000000e+00> : vector<20x32xf32>
    %33 = tpu.matmul %30, %32, %cst_40 {dimension_numbers = #tpu.dot_dimension_numbers<[1], [0], [0], [1], [0, 0, 1, 1], [], []>} : vector<20x16xf32>, vector<16x32xf32>, vector<20x32xf32> -> vector<20x32xf32>
    %34 = arith.addf %28, %33 : vector<20x32xf32>
    %c0_41 = arith.constant 0 : index
    %c0_42 = arith.constant 0 : index
    %c5_43 = arith.constant 5 : index
    %c0_44 = arith.constant 0 : index
    %35 = vector.load %arg1[%c0_41, %c0_42, %c5_43, %c0_44] : memref<4x1x30x16xf32, #tpu.memory_space<vmem>>, vector<1x1x20x16xf32>
    %36 = vector.shape_cast %35 : vector<1x1x20x16xf32> to vector<20x16xf32>
    %c6 = arith.constant 6 : index
    %c0_45 = arith.constant 0 : index
    %c0_46 = arith.constant 0 : index
    %37 = vector.load %arg2[%c6, %c0_45, %c0_46] : memref<9x16x32xf32, #tpu.memory_space<vmem>>, vector<1x16x32xf32>
    %38 = vector.shape_cast %37 : vector<1x16x32xf32> to vector<16x32xf32>
    %cst_47 = arith.constant dense<0.000000e+00> : vector<20x32xf32>
    %39 = tpu.matmul %36, %38, %cst_47 {dimension_numbers = #tpu.dot_dimension_numbers<[1], [0], [0], [1], [0, 0, 1, 1], [], []>} : vector<20x16xf32>, vector<16x32xf32>, vector<20x32xf32> -> vector<20x32xf32>
    %40 = arith.addf %34, %39 : vector<20x32xf32>
    %c1_48 = arith.constant 1 : index
    %c0_49 = arith.constant 0 : index
    %c5_50 = arith.constant 5 : index
    %c0_51 = arith.constant 0 : index
    %41 = vector.load %arg1[%c1_48, %c0_49, %c5_50, %c0_51] : memref<4x1x30x16xf32, #tpu.memory_space<vmem>>, vector<1x1x20x16xf32>
    %42 = vector.shape_cast %41 : vector<1x1x20x16xf32> to vector<20x16xf32>
    %c7 = arith.constant 7 : index
    %c0_52 = arith.constant 0 : index
    %c0_53 = arith.constant 0 : index
    %43 = vector.load %arg2[%c7, %c0_52, %c0_53] : memref<9x16x32xf32, #tpu.memory_space<vmem>>, vector<1x16x32xf32>
    %44 = vector.shape_cast %43 : vector<1x16x32xf32> to vector<16x32xf32>
    %cst_54 = arith.constant dense<0.000000e+00> : vector<20x32xf32>
    %45 = tpu.matmul %42, %44, %cst_54 {dimension_numbers = #tpu.dot_dimension_numbers<[1], [0], [0], [1], [0, 0, 1, 1], [], []>} : vector<20x16xf32>, vector<16x32xf32>, vector<20x32xf32> -> vector<20x32xf32>
    %46 = arith.addf %40, %45 : vector<20x32xf32>
    %c0_55 = arith.constant 0 : index
    %c0_56 = arith.constant 0 : index
    %c6_57 = arith.constant 6 : index
    %c0_58 = arith.constant 0 : index
    %47 = vector.load %arg1[%c0_55, %c0_56, %c6_57, %c0_58] : memref<4x1x30x16xf32, #tpu.memory_space<vmem>>, vector<1x1x20x16xf32>
    %48 = vector.shape_cast %47 : vector<1x1x20x16xf32> to vector<20x16xf32>
    %c8 = arith.constant 8 : index
    %c0_59 = arith.constant 0 : index
    %c0_60 = arith.constant 0 : index
    %49 = vector.load %arg2[%c8, %c0_59, %c0_60] : memref<9x16x32xf32, #tpu.memory_space<vmem>>, vector<1x16x32xf32>
    %50 = vector.shape_cast %49 : vector<1x16x32xf32> to vector<16x32xf32>
    %cst_61 = arith.constant dense<0.000000e+00> : vector<20x32xf32>
    %51 = tpu.matmul %48, %50, %cst_61 {dimension_numbers = #tpu.dot_dimension_numbers<[1], [0], [0], [1], [0, 0, 1, 1], [], []>} : vector<20x16xf32>, vector<16x32xf32>, vector<20x32xf32> -> vector<20x32xf32>
    %52 = arith.addf %46, %51 : vector<20x32xf32>
    %c0_62 = arith.constant 0 : index
    %c0_63 = arith.constant 0 : index
    %53 = vector.load %arg3[%c0_62, %c0_63] : memref<1x32xf32, #tpu.memory_space<vmem>>, vector<1x32xf32>
    %54 = vector.broadcast %53 : vector<1x32xf32> to vector<20x32xf32>
    %55 = arith.mulf %52, %54 : vector<20x32xf32>
    %c0_64 = arith.constant 0 : index
    %c0_65 = arith.constant 0 : index
    %56 = vector.load %arg4[%c0_64, %c0_65] : memref<1x32xf32, #tpu.memory_space<vmem>>, vector<1x32xf32>
    %57 = vector.broadcast %56 : vector<1x32xf32> to vector<20x32xf32>
    %58 = arith.addf %55, %57 : vector<20x32xf32>
    %cst_66 = arith.constant 0.000000e+00 : f32
    %59 = vector.broadcast %cst_66 : f32 to vector<20x32xf32>
    %60 = arith.maximumf %58, %59 : vector<20x32xf32>
    %c0_67 = arith.constant 0 : index
    %c0_68 = arith.constant 0 : index
    %c0_69 = arith.constant 0 : index
    %61 = vector.load %arg5[%c0_67, %c0_68, %c0_69] : memref<1x20x32xf32, #tpu.memory_space<vmem>>, vector<1x20x32xf32>
    %62 = vector.shape_cast %61 : vector<1x20x32xf32> to vector<20x32xf32>
    %63 = vector.shape_cast %60 : vector<20x32xf32> to vector<1x20x32xf32>
    tpu.vector_store %arg5[%c0_67, %c0_68, %c0_69], %63 {strides = array<i32>} : memref<1x20x32xf32, #tpu.memory_space<vmem>>, vector<1x20x32xf32>,
    return
  }
  func.func @transform_0(%arg0: i32) -> (i32, i32, i32, i32) {
    %c0_i32 = arith.constant 0 : i32
    %c0_i32_0 = arith.constant 0 : i32
    %c0_i32_1 = arith.constant 0 : i32
    %c0_i32_2 = arith.constant 0 : i32
    return %c0_i32, %arg0, %c0_i32_0, %c0_i32_1 : i32, i32, i32, i32
  }
  func.func @transform_1(%arg0: i32) -> (i32, i32, i32) {
    %c0_i32 = arith.constant 0 : i32
    %c0_i32_0 = arith.constant 0 : i32
    %c0_i32_1 = arith.constant 0 : i32
    %c0_i32_2 = arith.constant 0 : i32
    return %c0_i32, %c0_i32_0, %c0_i32_1 : i32, i32, i32
  }
  func.func @transform_2(%arg0: i32) -> (i32, i32) {
    %c0_i32 = arith.constant 0 : i32
    %c0_i32_0 = arith.constant 0 : i32
    %c0_i32_1 = arith.constant 0 : i32
    return %c0_i32, %c0_i32_0 : i32, i32
  }
  func.func @transform_3(%arg0: i32) -> (i32, i32) {
    %c0_i32 = arith.constant 0 : i32
    %c0_i32_0 = arith.constant 0 : i32
    %c0_i32_1 = arith.constant 0 : i32
    return %c0_i32, %c0_i32_0 : i32, i32
  }
  func.func @transform_4(%arg0: i32) -> (i32, i32, i32) {
    %c0_i32 = arith.constant 0 : i32
    %c0_i32_0 = arith.constant 0 : i32
    %c0_i32_1 = arith.constant 0 : i32
    return %arg0, %c0_i32, %c0_i32_0 : i32, i32, i32
  }
}

module attributes {stable_mosaic.version = 11 : i64} {
  func.func @_conv_tap_kernel(%arg0: i32, %arg1: memref<1x1x42x32xf32, #tpu.memory_space<vmem>>, %arg2: memref<9x32x32xf32, #tpu.memory_space<vmem>>, %arg3: memref<1x32xf32, #tpu.memory_space<vmem>>, %arg4: memref<1x32xf32, #tpu.memory_space<vmem>>, %arg5: memref<1x24x32xf32, #tpu.memory_space<vmem>>) attributes {dimension_semantics = [#tpu.dimension_semantics<parallel>], iteration_bounds = array<i64: 2>, scalar_prefetch = 0 : i64, scratch_operands = 0 : i64, tpu.core_type = #tpu.core_type<tc>, window_params = [{transform_indices = @transform_0, window_bounds = array<i64: 1, 1, 42, 32>}, {pipeline_mode = #tpu.pipeline_mode<synchronous>, transform_indices = @transform_1, window_bounds = array<i64: 9, 32, 32>}, {pipeline_mode = #tpu.pipeline_mode<synchronous>, transform_indices = @transform_2, window_bounds = array<i64: 1, 32>}, {pipeline_mode = #tpu.pipeline_mode<synchronous>, transform_indices = @transform_3, window_bounds = array<i64: 1, 32>}, {transform_indices = @transform_4, window_bounds = array<i64: 1, 24, 32>}]} {
    %c0 = arith.constant 0 : index
    %c0_0 = arith.constant 0 : index
    %c0_1 = arith.constant 0 : index
    %c0_2 = arith.constant 0 : index
    %0 = vector.load %arg1[%c0, %c0_0, %c0_1, %c0_2] : memref<1x1x42x32xf32, #tpu.memory_space<vmem>>, vector<1x1x24x32xf32>
    %1 = vector.shape_cast %0 : vector<1x1x24x32xf32> to vector<24x32xf32>
    %c0_3 = arith.constant 0 : index
    %c0_4 = arith.constant 0 : index
    %c0_5 = arith.constant 0 : index
    %2 = vector.load %arg2[%c0_3, %c0_4, %c0_5] : memref<9x32x32xf32, #tpu.memory_space<vmem>>, vector<1x32x32xf32>
    %3 = vector.shape_cast %2 : vector<1x32x32xf32> to vector<32x32xf32>
    %cst = arith.constant dense<0.000000e+00> : vector<24x32xf32>
    %4 = tpu.matmul %1, %3, %cst {dimension_numbers = #tpu.dot_dimension_numbers<[1], [0], [0], [1], [0, 0, 1, 1], [], []>} : vector<24x32xf32>, vector<32x32xf32>, vector<24x32xf32> -> vector<24x32xf32>
    %c0_6 = arith.constant 0 : index
    %c0_7 = arith.constant 0 : index
    %c1 = arith.constant 1 : index
    %c0_8 = arith.constant 0 : index
    %5 = vector.load %arg1[%c0_6, %c0_7, %c1, %c0_8] : memref<1x1x42x32xf32, #tpu.memory_space<vmem>>, vector<1x1x24x32xf32>
    %6 = vector.shape_cast %5 : vector<1x1x24x32xf32> to vector<24x32xf32>
    %c1_9 = arith.constant 1 : index
    %c0_10 = arith.constant 0 : index
    %c0_11 = arith.constant 0 : index
    %7 = vector.load %arg2[%c1_9, %c0_10, %c0_11] : memref<9x32x32xf32, #tpu.memory_space<vmem>>, vector<1x32x32xf32>
    %8 = vector.shape_cast %7 : vector<1x32x32xf32> to vector<32x32xf32>
    %cst_12 = arith.constant dense<0.000000e+00> : vector<24x32xf32>
    %9 = tpu.matmul %6, %8, %cst_12 {dimension_numbers = #tpu.dot_dimension_numbers<[1], [0], [0], [1], [0, 0, 1, 1], [], []>} : vector<24x32xf32>, vector<32x32xf32>, vector<24x32xf32> -> vector<24x32xf32>
    %10 = arith.addf %4, %9 : vector<24x32xf32>
    %c0_13 = arith.constant 0 : index
    %c0_14 = arith.constant 0 : index
    %c2 = arith.constant 2 : index
    %c0_15 = arith.constant 0 : index
    %11 = vector.load %arg1[%c0_13, %c0_14, %c2, %c0_15] : memref<1x1x42x32xf32, #tpu.memory_space<vmem>>, vector<1x1x24x32xf32>
    %12 = vector.shape_cast %11 : vector<1x1x24x32xf32> to vector<24x32xf32>
    %c2_16 = arith.constant 2 : index
    %c0_17 = arith.constant 0 : index
    %c0_18 = arith.constant 0 : index
    %13 = vector.load %arg2[%c2_16, %c0_17, %c0_18] : memref<9x32x32xf32, #tpu.memory_space<vmem>>, vector<1x32x32xf32>
    %14 = vector.shape_cast %13 : vector<1x32x32xf32> to vector<32x32xf32>
    %cst_19 = arith.constant dense<0.000000e+00> : vector<24x32xf32>
    %15 = tpu.matmul %12, %14, %cst_19 {dimension_numbers = #tpu.dot_dimension_numbers<[1], [0], [0], [1], [0, 0, 1, 1], [], []>} : vector<24x32xf32>, vector<32x32xf32>, vector<24x32xf32> -> vector<24x32xf32>
    %16 = arith.addf %10, %15 : vector<24x32xf32>
    %c0_20 = arith.constant 0 : index
    %c0_21 = arith.constant 0 : index
    %c6 = arith.constant 6 : index
    %c0_22 = arith.constant 0 : index
    %17 = vector.load %arg1[%c0_20, %c0_21, %c6, %c0_22] : memref<1x1x42x32xf32, #tpu.memory_space<vmem>>, vector<1x1x24x32xf32>
    %18 = vector.shape_cast %17 : vector<1x1x24x32xf32> to vector<24x32xf32>
    %c3 = arith.constant 3 : index
    %c0_23 = arith.constant 0 : index
    %c0_24 = arith.constant 0 : index
    %19 = vector.load %arg2[%c3, %c0_23, %c0_24] : memref<9x32x32xf32, #tpu.memory_space<vmem>>, vector<1x32x32xf32>
    %20 = vector.shape_cast %19 : vector<1x32x32xf32> to vector<32x32xf32>
    %cst_25 = arith.constant dense<0.000000e+00> : vector<24x32xf32>
    %21 = tpu.matmul %18, %20, %cst_25 {dimension_numbers = #tpu.dot_dimension_numbers<[1], [0], [0], [1], [0, 0, 1, 1], [], []>} : vector<24x32xf32>, vector<32x32xf32>, vector<24x32xf32> -> vector<24x32xf32>
    %22 = arith.addf %16, %21 : vector<24x32xf32>
    %c0_26 = arith.constant 0 : index
    %c0_27 = arith.constant 0 : index
    %c7 = arith.constant 7 : index
    %c0_28 = arith.constant 0 : index
    %23 = vector.load %arg1[%c0_26, %c0_27, %c7, %c0_28] : memref<1x1x42x32xf32, #tpu.memory_space<vmem>>, vector<1x1x24x32xf32>
    %24 = vector.shape_cast %23 : vector<1x1x24x32xf32> to vector<24x32xf32>
    %c4 = arith.constant 4 : index
    %c0_29 = arith.constant 0 : index
    %c0_30 = arith.constant 0 : index
    %25 = vector.load %arg2[%c4, %c0_29, %c0_30] : memref<9x32x32xf32, #tpu.memory_space<vmem>>, vector<1x32x32xf32>
    %26 = vector.shape_cast %25 : vector<1x32x32xf32> to vector<32x32xf32>
    %cst_31 = arith.constant dense<0.000000e+00> : vector<24x32xf32>
    %27 = tpu.matmul %24, %26, %cst_31 {dimension_numbers = #tpu.dot_dimension_numbers<[1], [0], [0], [1], [0, 0, 1, 1], [], []>} : vector<24x32xf32>, vector<32x32xf32>, vector<24x32xf32> -> vector<24x32xf32>
    %28 = arith.addf %22, %27 : vector<24x32xf32>
    %c0_32 = arith.constant 0 : index
    %c0_33 = arith.constant 0 : index
    %c8 = arith.constant 8 : index
    %c0_34 = arith.constant 0 : index
    %29 = vector.load %arg1[%c0_32, %c0_33, %c8, %c0_34] : memref<1x1x42x32xf32, #tpu.memory_space<vmem>>, vector<1x1x24x32xf32>
    %30 = vector.shape_cast %29 : vector<1x1x24x32xf32> to vector<24x32xf32>
    %c5 = arith.constant 5 : index
    %c0_35 = arith.constant 0 : index
    %c0_36 = arith.constant 0 : index
    %31 = vector.load %arg2[%c5, %c0_35, %c0_36] : memref<9x32x32xf32, #tpu.memory_space<vmem>>, vector<1x32x32xf32>
    %32 = vector.shape_cast %31 : vector<1x32x32xf32> to vector<32x32xf32>
    %cst_37 = arith.constant dense<0.000000e+00> : vector<24x32xf32>
    %33 = tpu.matmul %30, %32, %cst_37 {dimension_numbers = #tpu.dot_dimension_numbers<[1], [0], [0], [1], [0, 0, 1, 1], [], []>} : vector<24x32xf32>, vector<32x32xf32>, vector<24x32xf32> -> vector<24x32xf32>
    %34 = arith.addf %28, %33 : vector<24x32xf32>
    %c0_38 = arith.constant 0 : index
    %c0_39 = arith.constant 0 : index
    %c12 = arith.constant 12 : index
    %c0_40 = arith.constant 0 : index
    %35 = vector.load %arg1[%c0_38, %c0_39, %c12, %c0_40] : memref<1x1x42x32xf32, #tpu.memory_space<vmem>>, vector<1x1x24x32xf32>
    %36 = vector.shape_cast %35 : vector<1x1x24x32xf32> to vector<24x32xf32>
    %c6_41 = arith.constant 6 : index
    %c0_42 = arith.constant 0 : index
    %c0_43 = arith.constant 0 : index
    %37 = vector.load %arg2[%c6_41, %c0_42, %c0_43] : memref<9x32x32xf32, #tpu.memory_space<vmem>>, vector<1x32x32xf32>
    %38 = vector.shape_cast %37 : vector<1x32x32xf32> to vector<32x32xf32>
    %cst_44 = arith.constant dense<0.000000e+00> : vector<24x32xf32>
    %39 = tpu.matmul %36, %38, %cst_44 {dimension_numbers = #tpu.dot_dimension_numbers<[1], [0], [0], [1], [0, 0, 1, 1], [], []>} : vector<24x32xf32>, vector<32x32xf32>, vector<24x32xf32> -> vector<24x32xf32>
    %40 = arith.addf %34, %39 : vector<24x32xf32>
    %c0_45 = arith.constant 0 : index
    %c0_46 = arith.constant 0 : index
    %c13 = arith.constant 13 : index
    %c0_47 = arith.constant 0 : index
    %41 = vector.load %arg1[%c0_45, %c0_46, %c13, %c0_47] : memref<1x1x42x32xf32, #tpu.memory_space<vmem>>, vector<1x1x24x32xf32>
    %42 = vector.shape_cast %41 : vector<1x1x24x32xf32> to vector<24x32xf32>
    %c7_48 = arith.constant 7 : index
    %c0_49 = arith.constant 0 : index
    %c0_50 = arith.constant 0 : index
    %43 = vector.load %arg2[%c7_48, %c0_49, %c0_50] : memref<9x32x32xf32, #tpu.memory_space<vmem>>, vector<1x32x32xf32>
    %44 = vector.shape_cast %43 : vector<1x32x32xf32> to vector<32x32xf32>
    %cst_51 = arith.constant dense<0.000000e+00> : vector<24x32xf32>
    %45 = tpu.matmul %42, %44, %cst_51 {dimension_numbers = #tpu.dot_dimension_numbers<[1], [0], [0], [1], [0, 0, 1, 1], [], []>} : vector<24x32xf32>, vector<32x32xf32>, vector<24x32xf32> -> vector<24x32xf32>
    %46 = arith.addf %40, %45 : vector<24x32xf32>
    %c0_52 = arith.constant 0 : index
    %c0_53 = arith.constant 0 : index
    %c14 = arith.constant 14 : index
    %c0_54 = arith.constant 0 : index
    %47 = vector.load %arg1[%c0_52, %c0_53, %c14, %c0_54] : memref<1x1x42x32xf32, #tpu.memory_space<vmem>>, vector<1x1x24x32xf32>
    %48 = vector.shape_cast %47 : vector<1x1x24x32xf32> to vector<24x32xf32>
    %c8_55 = arith.constant 8 : index
    %c0_56 = arith.constant 0 : index
    %c0_57 = arith.constant 0 : index
    %49 = vector.load %arg2[%c8_55, %c0_56, %c0_57] : memref<9x32x32xf32, #tpu.memory_space<vmem>>, vector<1x32x32xf32>
    %50 = vector.shape_cast %49 : vector<1x32x32xf32> to vector<32x32xf32>
    %cst_58 = arith.constant dense<0.000000e+00> : vector<24x32xf32>
    %51 = tpu.matmul %48, %50, %cst_58 {dimension_numbers = #tpu.dot_dimension_numbers<[1], [0], [0], [1], [0, 0, 1, 1], [], []>} : vector<24x32xf32>, vector<32x32xf32>, vector<24x32xf32> -> vector<24x32xf32>
    %52 = arith.addf %46, %51 : vector<24x32xf32>
    %c0_59 = arith.constant 0 : index
    %c0_60 = arith.constant 0 : index
    %c0_61 = arith.constant 0 : index
    %53 = vector.load %arg5[%c0_59, %c0_60, %c0_61] : memref<1x24x32xf32, #tpu.memory_space<vmem>>, vector<1x24x32xf32>
    %54 = vector.shape_cast %53 : vector<1x24x32xf32> to vector<24x32xf32>
    %55 = vector.shape_cast %52 : vector<24x32xf32> to vector<1x24x32xf32>
    tpu.vector_store %arg5[%c0_59, %c0_60, %c0_61], %55 {strides = array<i32>} : memref<1x24x32xf32, #tpu.memory_space<vmem>>, vector<1x24x32xf32>,
    return
  }
  func.func @transform_0(%arg0: i32) -> (i32, i32, i32, i32) {
    %c0_i32 = arith.constant 0 : i32
    %c0_i32_0 = arith.constant 0 : i32
    %c0_i32_1 = arith.constant 0 : i32
    %c0_i32_2 = arith.constant 0 : i32
    return %c0_i32, %arg0, %c0_i32_0, %c0_i32_1 : i32, i32, i32, i32
  }
  func.func @transform_1(%arg0: i32) -> (i32, i32, i32) {
    %c0_i32 = arith.constant 0 : i32
    %c0_i32_0 = arith.constant 0 : i32
    %c0_i32_1 = arith.constant 0 : i32
    %c0_i32_2 = arith.constant 0 : i32
    return %c0_i32, %c0_i32_0, %c0_i32_1 : i32, i32, i32
  }
  func.func @transform_2(%arg0: i32) -> (i32, i32) {
    %c0_i32 = arith.constant 0 : i32
    %c0_i32_0 = arith.constant 0 : i32
    %c0_i32_1 = arith.constant 0 : i32
    return %c0_i32, %c0_i32_0 : i32, i32
  }
  func.func @transform_3(%arg0: i32) -> (i32, i32) {
    %c0_i32 = arith.constant 0 : i32
    %c0_i32_0 = arith.constant 0 : i32
    %c0_i32_1 = arith.constant 0 : i32
    return %c0_i32, %c0_i32_0 : i32, i32
  }
  func.func @transform_4(%arg0: i32) -> (i32, i32, i32) {
    %c0_i32 = arith.constant 0 : i32
    %c0_i32_0 = arith.constant 0 : i32
    %c0_i32_1 = arith.constant 0 : i32
    return %arg0, %c0_i32, %c0_i32_0 : i32, i32, i32
  }
}

module attributes {stable_mosaic.version = 11 : i64} {
  func.func @_conv_tap_kernel(%arg0: i32, %arg1: memref<1x1x16x16xf32, #tpu.memory_space<vmem>>, %arg2: memref<1x16x32xf32, #tpu.memory_space<vmem>>, %arg3: memref<1x32xf32, #tpu.memory_space<vmem>>, %arg4: memref<1x32xf32, #tpu.memory_space<vmem>>, %arg5: memref<1x16x32xf32, #tpu.memory_space<vmem>>) attributes {dimension_semantics = [#tpu.dimension_semantics<parallel>], iteration_bounds = array<i64: 2>, scalar_prefetch = 0 : i64, scratch_operands = 0 : i64, tpu.core_type = #tpu.core_type<tc>, window_params = [{transform_indices = @transform_0, window_bounds = array<i64: 1, 1, 16, 16>}, {pipeline_mode = #tpu.pipeline_mode<synchronous>, transform_indices = @transform_1, window_bounds = array<i64: 1, 16, 32>}, {pipeline_mode = #tpu.pipeline_mode<synchronous>, transform_indices = @transform_2, window_bounds = array<i64: 1, 32>}, {pipeline_mode = #tpu.pipeline_mode<synchronous>, transform_indices = @transform_3, window_bounds = array<i64: 1, 32>}, {transform_indices = @transform_4, window_bounds = array<i64: 1, 16, 32>}]} {
    %c0 = arith.constant 0 : index
    %c0_0 = arith.constant 0 : index
    %c0_1 = arith.constant 0 : index
    %c0_2 = arith.constant 0 : index
    %0 = vector.load %arg1[%c0, %c0_0, %c0_1, %c0_2] : memref<1x1x16x16xf32, #tpu.memory_space<vmem>>, vector<1x1x16x16xf32>
    %1 = vector.shape_cast %0 : vector<1x1x16x16xf32> to vector<16x16xf32>
    %c0_3 = arith.constant 0 : index
    %c0_4 = arith.constant 0 : index
    %c0_5 = arith.constant 0 : index
    %2 = vector.load %arg2[%c0_3, %c0_4, %c0_5] : memref<1x16x32xf32, #tpu.memory_space<vmem>>, vector<1x16x32xf32>
    %3 = vector.shape_cast %2 : vector<1x16x32xf32> to vector<16x32xf32>
    %cst = arith.constant dense<0.000000e+00> : vector<16x32xf32>
    %4 = tpu.matmul %1, %3, %cst {dimension_numbers = #tpu.dot_dimension_numbers<[1], [0], [0], [1], [0, 0, 1, 1], [], []>} : vector<16x16xf32>, vector<16x32xf32>, vector<16x32xf32> -> vector<16x32xf32>
    %c0_6 = arith.constant 0 : index
    %c0_7 = arith.constant 0 : index
    %5 = vector.load %arg3[%c0_6, %c0_7] : memref<1x32xf32, #tpu.memory_space<vmem>>, vector<1x32xf32>
    %6 = vector.broadcast %5 : vector<1x32xf32> to vector<16x32xf32>
    %7 = arith.mulf %4, %6 : vector<16x32xf32>
    %c0_8 = arith.constant 0 : index
    %c0_9 = arith.constant 0 : index
    %8 = vector.load %arg4[%c0_8, %c0_9] : memref<1x32xf32, #tpu.memory_space<vmem>>, vector<1x32xf32>
    %9 = vector.broadcast %8 : vector<1x32xf32> to vector<16x32xf32>
    %10 = arith.addf %7, %9 : vector<16x32xf32>
    %c0_10 = arith.constant 0 : index
    %c0_11 = arith.constant 0 : index
    %c0_12 = arith.constant 0 : index
    %11 = vector.load %arg5[%c0_10, %c0_11, %c0_12] : memref<1x16x32xf32, #tpu.memory_space<vmem>>, vector<1x16x32xf32>
    %12 = vector.shape_cast %11 : vector<1x16x32xf32> to vector<16x32xf32>
    %13 = vector.shape_cast %10 : vector<16x32xf32> to vector<1x16x32xf32>
    tpu.vector_store %arg5[%c0_10, %c0_11, %c0_12], %13 {strides = array<i32>} : memref<1x16x32xf32, #tpu.memory_space<vmem>>, vector<1x16x32xf32>,
    return
  }
  func.func @transform_0(%arg0: i32) -> (i32, i32, i32, i32) {
    %c0_i32 = arith.constant 0 : i32
    %c0_i32_0 = arith.constant 0 : i32
    %c0_i32_1 = arith.constant 0 : i32
    %c0_i32_2 = arith.constant 0 : i32
    return %c0_i32, %arg0, %c0_i32_0, %c0_i32_1 : i32, i32, i32, i32
  }
  func.func @transform_1(%arg0: i32) -> (i32, i32, i32) {
    %c0_i32 = arith.constant 0 : i32
    %c0_i32_0 = arith.constant 0 : i32
    %c0_i32_1 = arith.constant 0 : i32
    %c0_i32_2 = arith.constant 0 : i32
    return %c0_i32, %c0_i32_0, %c0_i32_1 : i32, i32, i32
  }
  func.func @transform_2(%arg0: i32) -> (i32, i32) {
    %c0_i32 = arith.constant 0 : i32
    %c0_i32_0 = arith.constant 0 : i32
    %c0_i32_1 = arith.constant 0 : i32
    return %c0_i32, %c0_i32_0 : i32, i32
  }
  func.func @transform_3(%arg0: i32) -> (i32, i32) {
    %c0_i32 = arith.constant 0 : i32
    %c0_i32_0 = arith.constant 0 : i32
    %c0_i32_1 = arith.constant 0 : i32
    return %c0_i32, %c0_i32_0 : i32, i32
  }
  func.func @transform_4(%arg0: i32) -> (i32, i32, i32) {
    %c0_i32 = arith.constant 0 : i32
    %c0_i32_0 = arith.constant 0 : i32
    %c0_i32_1 = arith.constant 0 : i32
    return %arg0, %c0_i32, %c0_i32_0 : i32, i32, i32
  }
}

module attributes {stable_mosaic.version = 11 : i64} {
  func.func @_add_kernel(%arg0: i32, %arg1: memref<8x128xf32, #tpu.memory_space<vmem>>, %arg2: memref<8x128xf32, #tpu.memory_space<vmem>>, %arg3: memref<8x128xf32, #tpu.memory_space<vmem>>) attributes {dimension_semantics = [#tpu.dimension_semantics<parallel>], iteration_bounds = array<i64: 1>, scalar_prefetch = 0 : i64, scratch_operands = 0 : i64, tpu.core_type = #tpu.core_type<tc>, window_params = [{transform_indices = @transform_0, window_bounds = array<i64: 8, 128>}, {transform_indices = @transform_1, window_bounds = array<i64: 8, 128>}, {transform_indices = @transform_2, window_bounds = array<i64: 8, 128>}]} {
    %c0 = arith.constant 0 : index
    %c0_0 = arith.constant 0 : index
    %0 = vector.load %arg1[%c0, %c0_0] : memref<8x128xf32, #tpu.memory_space<vmem>>, vector<8x128xf32>
    %c0_1 = arith.constant 0 : index
    %c0_2 = arith.constant 0 : index
    %1 = vector.load %arg2[%c0_1, %c0_2] : memref<8x128xf32, #tpu.memory_space<vmem>>, vector<8x128xf32>
    %2 = arith.addf %0, %1 : vector<8x128xf32>
    %c0_3 = arith.constant 0 : index
    %c0_4 = arith.constant 0 : index
    %3 = vector.load %arg3[%c0_3, %c0_4] : memref<8x128xf32, #tpu.memory_space<vmem>>, vector<8x128xf32>
    tpu.vector_store %arg3[%c0_3, %c0_4], %2 {strides = array<i32>} : memref<8x128xf32, #tpu.memory_space<vmem>>, vector<8x128xf32>,
    return
  }
  func.func @transform_0(%arg0: i32) -> (i32, i32) {
    %c0_i32 = arith.constant 0 : i32
    %c0_i32_0 = arith.constant 0 : i32
    return %arg0, %c0_i32 : i32, i32
  }
  func.func @transform_1(%arg0: i32) -> (i32, i32) {
    %c0_i32 = arith.constant 0 : i32
    %c0_i32_0 = arith.constant 0 : i32
    return %arg0, %c0_i32 : i32, i32
  }
  func.func @transform_2(%arg0: i32) -> (i32, i32) {
    %c0_i32 = arith.constant 0 : i32
    %c0_i32_0 = arith.constant 0 : i32
    return %arg0, %c0_i32 : i32, i32
  }
}

module attributes {stable_mosaic.version = 11 : i64} {
  func.func @_affine_act_kernel(%arg0: i32, %arg1: memref<8x128xf32, #tpu.memory_space<vmem>>, %arg2: memref<1x128xf32, #tpu.memory_space<vmem>>, %arg3: memref<1x128xf32, #tpu.memory_space<vmem>>, %arg4: memref<8x128xf32, #tpu.memory_space<vmem>>) attributes {dimension_semantics = [#tpu.dimension_semantics<parallel>], iteration_bounds = array<i64: 1>, scalar_prefetch = 0 : i64, scratch_operands = 0 : i64, tpu.core_type = #tpu.core_type<tc>, window_params = [{transform_indices = @transform_0, window_bounds = array<i64: 8, 128>}, {pipeline_mode = #tpu.pipeline_mode<synchronous>, transform_indices = @transform_1, window_bounds = array<i64: 1, 128>}, {pipeline_mode = #tpu.pipeline_mode<synchronous>, transform_indices = @transform_2, window_bounds = array<i64: 1, 128>}, {transform_indices = @transform_3, window_bounds = array<i64: 8, 128>}]} {
    %c0 = arith.constant 0 : index
    %c0_0 = arith.constant 0 : index
    %0 = vector.load %arg1[%c0, %c0_0] : memref<8x128xf32, #tpu.memory_space<vmem>>, vector<8x128xf32>
    %c0_1 = arith.constant 0 : index
    %c0_2 = arith.constant 0 : index
    %1 = vector.load %arg2[%c0_1, %c0_2] : memref<1x128xf32, #tpu.memory_space<vmem>>, vector<1x128xf32>
    %2 = vector.broadcast %1 : vector<1x128xf32> to vector<8x128xf32>
    %3 = arith.mulf %0, %2 : vector<8x128xf32>
    %c0_3 = arith.constant 0 : index
    %c0_4 = arith.constant 0 : index
    %4 = vector.load %arg3[%c0_3, %c0_4] : memref<1x128xf32, #tpu.memory_space<vmem>>, vector<1x128xf32>
    %5 = vector.broadcast %4 : vector<1x128xf32> to vector<8x128xf32>
    %6 = arith.addf %3, %5 : vector<8x128xf32>
    %cst = arith.constant 0.000000e+00 : f32
    %7 = vector.broadcast %cst : f32 to vector<8x128xf32>
    %8 = arith.maximumf %6, %7 : vector<8x128xf32>
    %c0_5 = arith.constant 0 : index
    %c0_6 = arith.constant 0 : index
    %9 = vector.load %arg4[%c0_5, %c0_6] : memref<8x128xf32, #tpu.memory_space<vmem>>, vector<8x128xf32>
    tpu.vector_store %arg4[%c0_5, %c0_6], %8 {strides = array<i32>} : memref<8x128xf32, #tpu.memory_space<vmem>>, vector<8x128xf32>,
    return
  }
  func.func @transform_0(%arg0: i32) -> (i32, i32) {
    %c0_i32 = arith.constant 0 : i32
    %c0_i32_0 = arith.constant 0 : i32
    return %arg0, %c0_i32 : i32, i32
  }
  func.func @transform_1(%arg0: i32) -> (i32, i32) {
    %c0_i32 = arith.constant 0 : i32
    %c0_i32_0 = arith.constant 0 : i32
    %c0_i32_1 = arith.constant 0 : i32
    return %c0_i32, %c0_i32_0 : i32, i32
  }
  func.func @transform_2(%arg0: i32) -> (i32, i32) {
    %c0_i32 = arith.constant 0 : i32
    %c0_i32_0 = arith.constant 0 : i32
    %c0_i32_1 = arith.constant 0 : i32
    return %c0_i32, %c0_i32_0 : i32, i32
  }
  func.func @transform_3(%arg0: i32) -> (i32, i32) {
    %c0_i32 = arith.constant 0 : i32
    %c0_i32_0 = arith.constant 0 : i32
    return %arg0, %c0_i32 : i32, i32
  }
}

</mosaic_0001>

<bundles_post_ra>
// kernel: tile.33
= control target key start
LH: loop header
LB: loop body
LE: loop exit
PB: predicated region body
PF: predicated region fallthrough
CT: control target
= control target key end

     0   :  { %s22_s0 = inlined_call_operand.vmem [shape: f32[16], index: 0, kind: input, shape index: {}]   ;;  %s23_s1 = inlined_call_operand.vmem [shape: f32[8,16], index: 1, kind: output, shape index: {}]  }
   0x1   :  { %v4_v0 = vld [vmem:[%s22_s0] ss:$0 sm:$0xff] }
   0x2   :  { %5 = vst [vmem:[%s23_s1] sm:$0xff] %v4_v0 }

// kernel: tile.34
= control target key start
LH: loop header
LB: loop body
LE: loop exit
PB: predicated region body
PF: predicated region fallthrough
CT: control target
= control target key end

     0   :  { %s67_s10 = smov 112   ;;  %s68_s11 = smov 80   ;;  %vm3_vm0 = vcmask 130048   ;;  %vm9_vm1 = vcmask 1048448   ;;  %vm15_vm2 = vcmask 917248   ;;  %vm21_vm3 = vcmask 786048   ;;  %s111_s0 = inlined_call_operand.vmem [shape: f32[8,16], index: 0, kind: input, shape index: {}]   ;;  %s112_s1 = inlined_call_operand.vmem [shape: f32[1,128], index: 1, kind: output, shape index: {}]  }
   0x1   :  { %v53_v0 = vld [vmem:[%s111_s0 + $0x7] sm:$0x1]   ;;  %v55_v1 = vld [vmem:[%s111_s0 + $0x5] sm:$0x1]   ;;  %v54_v2 = vld [vmem:[%s111_s0 + $0x6] sm:$0x1]  }
   0x2   :  { %7 = vrot.lane.b32.xlu0 %v53_v0, %s67_s10  ;;  %19 = vrot.lane.b32.xlu1 %v55_v1, %s68_s11  ;;  %v56_v3 = vld [vmem:[%s111_s0 + $0x4] sm:$0x1]   ;;  %v2_v4 = vld [vmem:[%s111_s0] sm:$0x1]   ;;  %s69_s18 = smov 96   ;;  %s70_s19 = smov 64  }
   0x3   :  { %4 = vst.msk [vmem:[#allocation0] sm:$0x1] %vm3_vm0, %v2_v4   ;;  %v57_v5 = vld [vmem:[%s111_s0 + $0x3] sm:$0x1]   ;;  %v58_v6 = vld [vmem:[%s111_s0 + $0x2] sm:$0x1]  }
   0x4   :  { %s71_s24 = smov 48   ;;  %s72_s25 = smov 32   ;;  %v59_v7 = vld [vmem:[%s111_s0 + $0x1] sm:$0x1]   ;;  %vm27_vm4 = vcmask 654848   ;;  %vm33_vm5 = vcmask 523648  }
   0x5   :  { %s73_s0 = smov 16   ;;  %vm39_vm6 = vcmask 392448   ;;  %vm45_vm7 = vcmask 261248  }
   0x6   :  { %13 = vrot.lane.b32.xlu0 %v54_v2, %s69_s18  ;;  %25 = vrot.lane.b32.xlu1 %v56_v3, %s70_s19 }
   0xa   :  { %31 = vrot.lane.b32.xlu0 %v57_v5, %s71_s24  ;;  %37 = vrot.lane.b32.xlu1 %v58_v6, %s72_s25 }
   0xe   :  { %43 = vrot.lane.b32.xlu0 %v59_v7, %s73_s0 }
  0x74   :  { %v8_v8 = vpop.permute.xlu0 %7   ;;  %v20_v9 = vpop.permute.xlu1 %19  }
  0x75   :  { %10 = vst.msk [vmem:[#allocation0] sm:$0x1] %vm9_vm1, %v8_v8  }
  0x78   :  { %v14_v10 = vpop.permute.xlu0 %13   ;;  %v26_v11 = vpop.permute.xlu1 %25  }
  0x79   :  { %16 = vst.msk [vmem:[#allocation0] sm:$0x1] %vm15_vm2, %v14_v10  }
  0x7a   :  { %22 = vst.msk [vmem:[#allocation0] sm:$0x1] %vm21_vm3, %v20_v9  }
  0x7b   :  { %28 = vst.msk [vmem:[#allocation0] sm:$0x1] %vm27_vm4, %v26_v11  }
  0x7c   :  { %v32_v12 = vpop.permute.xlu0 %31   ;;  %v38_v13 = vpop.permute.xlu1 %37  }
  0x7d   :  { %34 = vst.msk [vmem:[#allocation0] sm:$0x1] %vm33_vm5, %v32_v12  }
  0x7e   :  { %40 = vst.msk [vmem:[#allocation0] sm:$0x1] %vm39_vm6, %v38_v13  }
  0x80   :  { %v44_v14 = vpop.permute.xlu0 %43  }
  0x81   :  { %46 = vst.msk [vmem:[#allocation0] sm:$0x1] %vm45_vm7, %v44_v14  }
  0x88   :  { %v50_v15 = vld [vmem:[#allocation0] sm:$0x1] }
  0x89   :  { %52 = vst [vmem:[%s112_s1] sm:$0x1] %v50_v15 }

// kernel: resnet_v2_forward.14
= control target key start
LH: loop header
LB: loop body
LE: loop exit
PB: predicated region body
PF: predicated region fallthrough
CT: control target
= control target key end

     0   :  { %s502_s6 = smov 0   ;;  %s504_s7 = smov 0   ;;  %s676_s0 = inlined_call_operand.vmem [shape: f32[4,2,64,16], index: 0, kind: input, shape index: {}]   ;;  %s677_s1 = inlined_call_operand.vmem [shape: f32[2,64,16], index: 1, kind: output, shape index: {}]  }
   0x1   :  { %s506_s8 = smov 0  }
   0x2 LB: > { %s405_s9 = sadd.s32 4294967295, %s490_s8   ;;  %s519_s10 = sadd.s32 1, %s490_s8   ;;  %s490_s8 = sphi %s506_s8, %s680_s8   ;;  %s486_s7 = sphi %s504_s7, %s679_s7   ;;  %s482_s6 = sphi %s502_s6, %s678_s6  }
   0x3   : > { %s15_s11 = ssub.s32 %s490_s8, %s519_s10  ;;  %s18_s12 = sadd.s32 1, %s486_s7 }
   0x4   : > { %p16_p0 = scmp.eq.s32.totalorder %s15_s11, 0  ;;  %p25_p1 = scmp.ne.s32.totalorder %s486_s7, %s482_s6 }
   0x5   : > { %p26_p2 = scmp.eq.s32.totalorder %s490_s8, 0  ;;  %p408_p4 = scmp.ge.s32.totalorder %s490_s8, 2 }
   0x6   : > { %s528_s13 = scalar_select %p16_p0, %s486_s7, %s18_s12  }
   0x7   : > { %p27_p3 = por %p26_p2, %p25_p1  ;;  %77 = sbr.rel (%p408_p4) target bundleno = 34 (0x22), region = 16 }
   0xe   : > { %80 = sbr.rel (!%p27_p3) target bundleno = 34 (0x22), region = 20  ;;  %s82_s14 = sand.u32 (%p27_p3), 1, %s486_s7  }
   0xf   : > { %s442_s15 = sshll.u32 (%p27_p3), %s490_s8, 6  ;;  %s409_s16 = sshll.u32 (%p27_p3), %s82_s14, 8 }
  0x10   : > { %s536_s19 = scalar_lea.vmem (%p27_p3), %s676_s0, %s442_s15  ;;  %s541_s20 = scalar_lea.vmem (%p27_p3), [#allocation2], %s409_s16 }
  0x11   : > { %v177_v0 = vld [vmem:[%s536_s19] sm:$0xff] (%p27_p3)  ;;  %v179_v1 = vld [vmem:[%s536_s19 + $0x8] sm:$0xff] (%p27_p3)  ;;  %v181_v2 = vld [vmem:[%s536_s19 + $0x10] sm:$0xff] (%p27_p3) }
  0x12   : > { %178 = vst [vmem:[%s541_s20] sm:$0xff] (%p27_p3), %v177_v0  ;;  %180 = vst [vmem:[%s541_s20 + $0x8] sm:$0xff] (%p27_p3), %v179_v1  ;;  %v183_v3 = vld [vmem:[%s536_s19 + $0x18] sm:$0xff] (%p27_p3)  ;;  %v185_v4 = vld [vmem:[%s536_s19 + $0x20] sm:$0xff] (%p27_p3) }
  0x13   : > { %182 = vst [vmem:[%s541_s20 + $0x10] sm:$0xff] (%p27_p3), %v181_v2  ;;  %v187_v5 = vld [vmem:[%s536_s19 + $0x28] sm:$0xff] (%p27_p3)  ;;  %184 = vst [vmem:[%s541_s20 + $0x18] sm:$0xff] (%p27_p3), %v183_v3  ;;  %v189_v6 = vld [vmem:[%s536_s19 + $0x30] sm:$0xff] (%p27_p3) }
  0x14   : > { %186 = vst [vmem:[%s541_s20 + $0x20] sm:$0xff] (%p27_p3), %v185_v4  ;;  %188 = vst [vmem:[%s541_s20 + $0x28] sm:$0xff] (%p27_p3), %v187_v5  ;;  %v191_v7 = vld [vmem:[%s536_s19 + $0x38] sm:$0xff] (%p27_p3)  ;;  %v193_v8 = vld [vmem:[%s536_s19 + $0x80] sm:$0xff] (%p27_p3) }
  0x15   : > { %190 = vst [vmem:[%s541_s20 + $0x30] sm:$0xff] %v189_v6  ;;  %192 = vst [vmem:[%s541_s20 + $0x38] sm:$0xff] %v191_v7  ;;  %v195_v9 = vld [vmem:[%s536_s19 + $0x88] sm:$0xff]  ;;  %v197_v10 = vld [vmem:[%s536_s19 + $0x90] sm:$0xff] }
  0x16   : > { %194 = vst [vmem:[%s541_s20 + $0x40] sm:$0xff] %v193_v8  ;;  %v199_v11 = vld [vmem:[%s536_s19 + $0x98] sm:$0xff]  ;;  %196 = vst [vmem:[%s541_s20 + $0x48] sm:$0xff] %v195_v9  ;;  %v201_v12 = vld [vmem:[%s536_s19 + $0xa0] sm:$0xff] }
  0x17   : > { %198 = vst [vmem:[%s541_s20 + $0x50] sm:$0xff] %v197_v10  ;;  %200 = vst [vmem:[%s541_s20 + $0x58] sm:$0xff] %v199_v11  ;;  %v203_v13 = vld [vmem:[%s536_s19 + $0xa8] sm:$0xff]  ;;  %v205_v14 = vld [vmem:[%s536_s19 + $0xb0] sm:$0xff] }
  0x18   : > { %202 = vst [vmem:[%s541_s20 + $0x60] sm:$0xff] %v201_v12  ;;  %204 = vst [vmem:[%s541_s20 + $0x68] sm:$0xff] %v203_v13  ;;  %v207_v15 = vld [vmem:[%s536_s19 + $0xb8] sm:$0xff]  ;;  %v209_v16 = vld [vmem:[%s536_s19 + $0x100] sm:$0xff] }
  0x19   : > { %206 = vst [vmem:[%s541_s20 + $0x70] sm:$0xff] %v205_v14  ;;  %v211_v17 = vld [vmem:[%s536_s19 + $0x108] sm:$0xff]  ;;  %208 = vst [vmem:[%s541_s20 + $0x78] sm:$0xff] %v207_v15  ;;  %v213_v18 = vld [vmem:[%s536_s19 + $0x110] sm:$0xff] }
  0x1a   : > { %210 = vst [vmem:[%s541_s20 + $0x80] sm:$0xff] %v209_v16  ;;  %212 = vst [vmem:[%s541_s20 + $0x88] sm:$0xff] %v211_v17  ;;  %v215_v19 = vld [vmem:[%s536_s19 + $0x118] sm:$0xff]  ;;  %v217_v20 = vld [vmem:[%s536_s19 + $0x120] sm:$0xff] }
  0x1b   : > { %214 = vst [vmem:[%s541_s20 + $0x90] sm:$0xff] %v213_v18  ;;  %216 = vst [vmem:[%s541_s20 + $0x98] sm:$0xff] %v215_v19  ;;  %v219_v21 = vld [vmem:[%s536_s19 + $0x128] sm:$0xff]  ;;  %v221_v22 = vld [vmem:[%s536_s19 + $0x130] sm:$0xff] }
  0x1c   : > { %218 = vst [vmem:[%s541_s20 + $0xa0] sm:$0xff] %v217_v20  ;;  %v223_v23 = vld [vmem:[%s536_s19 + $0x138] sm:$0xff]  ;;  %220 = vst [vmem:[%s541_s20 + $0xa8] sm:$0xff] %v219_v21  ;;  %v225_v24 = vld [vmem:[%s536_s19 + $0x180] sm:$0xff] }
  0x1d   : > { %222 = vst [vmem:[%s541_s20 + $0xb0] sm:$0xff] %v221_v22  ;;  %224 = vst [vmem:[%s541_s20 + $0xb8] sm:$0xff] %v223_v23  ;;  %v227_v25 = vld [vmem:[%s536_s19 + $0x188] sm:$0xff]  ;;  %v229_v26 = vld [vmem:[%s536_s19 + $0x190] sm:$0xff] }
  0x1e   : > { %226 = vst [vmem:[%s541_s20 + $0xc0] sm:$0xff] %v225_v24  ;;  %228 = vst [vmem:[%s541_s20 + $0xc8] sm:$0xff] %v227_v25  ;;  %v231_v27 = vld [vmem:[%s536_s19 + $0x198] sm:$0xff]  ;;  %v233_v28 = vld [vmem:[%s536_s19 + $0x1a0] sm:$0xff] }
  0x1f   : > { %230 = vst [vmem:[%s541_s20 + $0xd0] sm:$0xff] %v229_v26  ;;  %v235_v29 = vld [vmem:[%s536_s19 + $0x1a8] sm:$0xff]  ;;  %232 = vst [vmem:[%s541_s20 + $0xd8] sm:$0xff] %v231_v27  ;;  %v237_v30 = vld [vmem:[%s536_s19 + $0x1b0] sm:$0xff] }
  0x20   : > { %234 = vst [vmem:[%s541_s20 + $0xe0] sm:$0xff] %v233_v28  ;;  %236 = vst [vmem:[%s541_s20 + $0xe8] sm:$0xff] %v235_v29  ;;  %v239_v31 = vld [vmem:[%s536_s19 + $0x1b8] sm:$0xff] }
  0x21   : > { %238 = vst [vmem:[%s541_s20 + $0xf0] sm:$0xff] %v237_v30  ;;  %240 = vst [vmem:[%s541_s20 + $0xf8] sm:$0xff] %v239_v31 }
  0x22 PF: > { %p412_p5 = scmp.ge.s32.totalorder %s490_s8, 1  ;;  %p245_p6 = scmp.lt.s32.totalorder %s490_s8, 3 }
  0x24   : > { %p246_p7 = pnand %p412_p5, %p245_p6 }
  0x25   : > { %s252_s21 = sand.u32 (!%p246_p7), 1, %s482_s6   ;;  %p271_p8 = scmp.lt.s32.totalorder (!%p246_p7), %s405_s9, 1  ;;  %vm335_vm0 = vcmask (!%p246_p7), 130048  }
  0x26   : > { %249 = sbr.rel (%p246_p7) target bundleno = 58 (0x3a), region = 58  ;;  %s413_s22 = sshll.u32 (!%p246_p7), %s252_s21, 8 }
  0x27   : > { %s611_s23 = scalar_lea.vmem (!%p246_p7), [#allocation2], %s413_s22 }
  0x28   : > { %v276_v32 = vld [vmem:[%s611_s23] sm:$0xff] (!%p246_p7)  ;;  %v277_v36 = vld [vmem:[%s611_s23 + $0x8] sm:$0xff] (!%p246_p7)  ;;  %v278_v41 = vld [vmem:[%s611_s23 + $0x10] sm:$0xff] (!%p246_p7) }
  0x29   : > { %v416_v33 = vld [vmem:[%s611_s23 + $0x40] sm:$0xff] (!%p246_p7)  ;;  %v417_v37 = vld [vmem:[%s611_s23 + $0x48] sm:$0xff] (!%p246_p7)  ;;  %v418_v44 = vld [vmem:[%s611_s23 + $0x50] sm:$0xff] (!%p246_p7) }
  0x2a   : > { %v424_v34 = vld [vmem:[%s611_s23 + $0x80] sm:$0xff] (!%p246_p7)  ;;  %v293_v35 = vmax.f32 (!%p246_p7), %v276_v32, %v416_v33  ;;  %v294_v39 = vmax.f32 (!%p246_p7), %v277_v36, %v417_v37  ;;  %v425_v40 = vld [vmem:[%s611_s23 + $0x88] sm:$0xff] (!%p246_p7)  ;;  %v426_v45 = vld [vmem:[%s611_s23 + $0x90] sm:$0xff] (!%p246_p7)  ;;  %v295_v47 = vmax.f32 (!%p246_p7), %v278_v41, %v418_v44 }
  0x2b   : > { %v432_v38 = vld [vmem:[%s611_s23 + $0xc0] sm:$0xff] (!%p246_p7)  ;;  %v433_v43 = vld [vmem:[%s611_s23 + $0xc8] sm:$0xff] (!%p246_p7)  ;;  %v279_v48 = vld [vmem:[%s611_s23 + $0x18] sm:$0xff] (!%p246_p7) }
  0x2c   : > { %v310_v42 = vmax.f32 (!%p246_p7), %v293_v35, %v424_v34  ;;  %v311_v46 = vmax.f32 (!%p246_p7), %v294_v39, %v425_v40  ;;  %v419_v49 = vld [vmem:[%s611_s23 + $0x58] sm:$0xff] (!%p246_p7)  ;;  %v434_v52 = vld [vmem:[%s611_s23 + $0xd0] sm:$0xff] (!%p246_p7)  ;;  %v280_v54 = vld [vmem:[%s611_s23 + $0x20] sm:$0xff] (!%p246_p7)  ;;  %v312_v57 = vmax.f32 (!%p246_p7), %v295_v47, %v426_v45 }
  0x2d   : > { %s682_s9 = smov (!%p271_p8, %s405_s9), 1  ;;  %v427_v50 = vld [vmem:[%s611_s23 + $0x98] sm:$0xff]  ;;  %v296_v53 = vmax.f32 %v279_v48, %v419_v49  ;;  %v420_v55 = vld [vmem:[%s611_s23 + $0x60] sm:$0xff]  ;;  %v281_v61 = vld [vmem:[%s611_s23 + $0x28] sm:$0xff] }
  0x2e   : > { %s443_s24 = sshll.u32 %s682_s9, 6  ;;  %v327_v51 = vmax.f32 %v310_v42, %v432_v38  ;;  %v328_v56 = vmax.f32 %v311_v46, %v433_v43  ;;  %v435_v58 = vld [vmem:[%s611_s23 + $0xd8] sm:$0xff]  ;;  %v297_v59 = vmax.f32 %v280_v54, %v420_v55  ;;  %v428_v60 = vld [vmem:[%s611_s23 + $0xa0] sm:$0xff]  ;;  %v421_v0 = vld [vmem:[%s611_s23 + $0x68] sm:$0xff]  ;;  %v329_v2 = vmax.f32 %v312_v57, %v434_v52 }
  0x2f   : > { %s627_s27 = scalar_lea.vmem %s677_s1, %s443_s24  ;;  %v313_v62 = vmax.f32 %v296_v53, %v427_v50  ;;  %v436_v63 = vld [vmem:[%s611_s23 + $0xe0] sm:$0xff]  ;;  %v429_v1 = vld [vmem:[%s611_s23 + $0xa8] sm:$0xff]  ;;  %v298_v4 = vmax.f32 %v281_v61, %v421_v0  ;;  %v282_v5 = vld [vmem:[%s611_s23 + $0x30] sm:$0xff] }
  0x30   : > { %336 = vst.msk [vmem:[%s627_s27] sm:$0xff] %vm335_vm0, %v327_v51  ;;  %337 = vst.msk [vmem:[%s627_s27 + $0x8] sm:$0xff] %vm335_vm0, %v328_v56  ;;  %v314_v3 = vmax.f32 %v297_v59, %v428_v60  ;;  %v422_v6 = vld [vmem:[%s611_s23 + $0x70] sm:$0xff]  ;;  %v437_v9 = vld [vmem:[%s611_s23 + $0xe8] sm:$0xff] }
  0x31   : > { %v430_v7 = vld [vmem:[%s611_s23 + $0xb0] sm:$0xff]  ;;  %v330_v8 = vmax.f32 %v313_v62, %v435_v58  ;;  %v299_v10 = vmax.f32 %v282_v5, %v422_v6  ;;  %v283_v11 = vld [vmem:[%s611_s23 + $0x38] sm:$0xff]  ;;  %338 = vst.msk [vmem:[%s627_s27 + $0x10] sm:$0xff] %vm335_vm0, %v329_v2  ;;  %v315_v14 = vmax.f32 %v298_v4, %v429_v1 }
  0x32   : > { %v423_v12 = vld [vmem:[%s611_s23 + $0x78] sm:$0xff]  ;;  %v331_v13 = vmax.f32 %v314_v3, %v436_v63  ;;  %v438_v15 = vld [vmem:[%s611_s23 + $0xf0] sm:$0xff] }
  0x33   : > { %v300_v16 = vmax.f32 %v283_v11, %v423_v12  ;;  %v431_v17 = vld [vmem:[%s611_s23 + $0xb8] sm:$0xff]  ;;  %339 = vst.msk [vmem:[%s627_s27 + $0x18] sm:$0xff] %vm335_vm0, %v330_v8  ;;  %v316_v18 = vmax.f32 %v299_v10, %v430_v7  ;;  %v332_v20 = vmax.f32 %v315_v14, %v437_v9 }
  0x34   : > { %v439_v19 = vld [vmem:[%s611_s23 + $0xf8] sm:$0xff]  ;;  %340 = vst.msk [vmem:[%s627_s27 + $0x20] sm:$0xff] %vm335_vm0, %v331_v13 }
  0x35   : > { %v317_v21 = vmax.f32 %v300_v16, %v431_v17  ;;  %v333_v22 = vmax.f32 %v316_v18, %v438_v15  ;;  %341 = vst.msk [vmem:[%s627_s27 + $0x28] sm:$0xff] %vm335_vm0, %v332_v20 }
  0x37   : > { %v334_v23 = vmax.f32 %v317_v21, %v439_v19  ;;  %342 = vst.msk [vmem:[%s627_s27 + $0x30] sm:$0xff] %vm335_vm0, %v333_v22 }
  0x39   : > { %343 = vst.msk [vmem:[%s627_s27 + $0x38] sm:$0xff] %vm335_vm0, %v334_v23 }
  0x3a PF: > { %p8_p9 = scmp.ge.s32.totalorder %s519_s10, 4   ;;  %s678_s6 = smov %s486_s7 }
  0x3b   : > { %s679_s7 = smov %s528_s13  ;;  %s680_s8 = smov %s519_s10 }
  0x3c   :  { %10 = sbr.rel (!%p8_p9) target bundleno = 2 (0x2), region = 100 }

// kernel: resnet_v2_forward.15
= control target key start
LH: loop header
LB: loop body
LE: loop exit
PB: predicated region body
PF: predicated region fallthrough
CT: control target
= control target key end

     0   :  { %s82_s0 = inlined_call_operand.vmem [shape: f32[16,128], index: 0, kind: input, shape index: {}]   ;;  %s83_s1 = inlined_call_operand.vmem [shape: f32[1,128], index: 1, kind: input, shape index: {}]   ;;  %s84_s2 = inlined_call_operand.vmem [shape: f32[1,128], index: 2, kind: input, shape index: {}]   ;;  %s85_s3 = inlined_call_operand.vmem [shape: f32[16,128], index: 3, kind: output, shape index: {}]  }
   0x1   :  { %v14_v0 = vld [vmem:[%s82_s0] sm:$0xff]  ;;  %v15_v4 = vld [vmem:[%s82_s0 + $0x8] sm:$0xff] }
   0x2   :  { %v42_v1 = vld [vmem:[%s83_s1] ss:$0 sm:$0xff] }
   0x3   :  { %v43_v2 = vld [vmem:[%s84_s2] ss:$0 sm:$0xff]  ;;  %v23_v3 = vmul.f32 %v42_v1, %v14_v0  ;;  %v24_v5 = vmul.f32 %v42_v1, %v15_v4 }
   0x5   :  { %v32_v6 = vadd.f32 %v43_v2, %v23_v3  ;;  %v33_v7 = vadd.f32 %v43_v2, %v24_v5 }
   0x7   :  { %v34_v8 = vmax.f32 %v32_v6, 0.0  ;;  %v35_v9 = vmax.f32 %v33_v7, 0.0 }
   0x9   :  { %36 = vst [vmem:[%s85_s3] sm:$0xff] %v34_v8  ;;  %37 = vst [vmem:[%s85_s3 + $0x8] sm:$0xff] %v35_v9 }

// kernel: resnet_v2_forward.13
= control target key start
LH: loop header
LB: loop body
LE: loop exit
PB: predicated region body
PF: predicated region fallthrough
CT: control target
= control target key end

     0   :  { %s5609_s15 = smov 0   ;;  %s6631_s0 = inlined_call_operand.vmem [shape: f32[1,2,342,4], index: 0, kind: input, shape index: {}]   ;;  %s6632_s1 = inlined_call_operand.vmem [shape: f32[9,4,16], index: 1, kind: input, shape index: {}]   ;;  %s6633_s2 = inlined_call_operand.vmem [shape: f32[1,16], index: 2, kind: input, shape index: {}]   ;;  %s6634_s3 = inlined_call_operand.vmem [shape: f32[1,16], index: 3, kind: input, shape index: {}]   ;;  %s6635_s4 = inlined_call_operand.vmem [shape: f32[2,288,16], index: 4, kind: output, shape index: {}]  }
   0x1 LB: > { %s4089_s16 = sadd.s32 4294967295, %s5582_s15   ;;  %p4093_p0 = scmp.ge.s32.totalorder %s5582_s15, 1  ;;  %s5582_s15 = sphi %s5609_s15, %s14_s15  }
   0x2   : > { %p162_p1 = scmp.lt.s32.totalorder %s5582_s15, 3 }
   0x4   : > { %p163_p2 = pnand %p4093_p0, %p162_p1 }
   0x5   : > { %v4096_v0 = vld [vmem:[%s6632_s1 + $0x4] sm:$0xf] (!%p163_p2)  ;;  %vm382_vm0 = vcmask (!%p163_p2), 1043456   ;;  %v5623_v1 = vld [vmem:[%s6632_s1 + $0x10] sm:$0xf] (!%p163_p2)  ;;  %p188_p3 = scmp.lt.s32.totalorder (!%p163_p2), %s4089_s16, 1 }
   0x6   : > { %166 = sbr.rel (%p163_p2) target bundleno = 555 (0x22b), region = 36  ;;  %4772 = vmatprep.subr.msk.mxu1 (!%p163_p2), %vm382_vm0, %v4096_v0  ;;  %4996 = vmatprep.subr.msk.mxu0 (!%p163_p2), %vm382_vm0, %v5623_v1  ;;  %v234_v2 = vld [vmem:[%s6632_s1] sm:$0xf] (!%p163_p2)  ;;  %v4285_v3 = vld [vmem:[%s6632_s1 + $0x14] sm:$0xf] (!%p163_p2)  ;;  %vm273_vm1 = vcmask (!%p163_p2), 31744  }
   0x7   : > { %4773 = vmatpush3.msk.msra.mxu1 (!%p163_p2), %vm382_vm0, %v4096_v0  ;;  %4997 = vmatpush3.msk.msra.mxu0 (!%p163_p2), %vm382_vm0, %v5623_v1  ;;  %v5660_v10 = vld [vmem:[%s6632_s1 + $0x18] sm:$0xf] (!%p163_p2)  ;;  %v5665_v11 = vld [vmem:[%s6632_s1 + $0x8] sm:$0xf] (!%p163_p2)  ;;  %v5748_v48 = vld [vmem:[%s6632_s1 + $0x1c] sm:$0xf] (!%p163_p2) }
   0x8   : > { %4828 = vmatprep.subr.msk.mxu1 (!%p163_p2), %vm382_vm0, %v234_v2  ;;  %5052 = vmatprep.subr.msk.mxu0 (!%p163_p2), %vm382_vm0, %v4285_v3  ;;  %vm3997_vm2 = vcmask (!%p163_p2), 130048  }
   0xd   : > { %s6637_s16 = smov (!%p188_p3, %s4089_s16), 1 }
   0xe   : > { %s5566_s23 = smul.u32 344, %s6637_s16 }
   0xf   : > { %s5567_s11 = smul.u32 288, %s6637_s16 }
  0x10   : > { %s5645_s26 = scalar_lea.vmem %s6631_s0, %s5566_s23 }
  0x11   : > { %v235_v4 = vld [vmem:[%s5645_s26 + $0x1] sm:$0xff]  ;;  %v1847_v5 = vld [vmem:[%s5645_s26 + $0x13] sm:$0xff]  ;;  %v236_v6 = vld [vmem:[%s5645_s26 + $0x9] sm:$0xff]  ;;  %s6554_s14 = scalar_lea.vmem %s6635_s4, %s5567_s11 }
  0x12   : > { %4774 = vmatprep.mubr.msk.f32.mxu1 %vm273_vm1, %v235_v4  ;;  %4998 = vmatprep.mubr.msk.f32.mxu0 %vm273_vm1, %v1847_v5  ;;  %v1848_v7 = vld [vmem:[%s5645_s26 + $0x1b] sm:$0xff]  ;;  %v237_v8 = vld [vmem:[%s5645_s26 + $0x11] sm:$0xff]  ;;  %v1849_v9 = vld [vmem:[%s5645_s26 + $0x23] sm:$0xff] }
  0x13   : > { %4775 = vmatmul.mubr.msk.f32.vlgmr.msra.gmra.mrb[0].mxu1 %vm273_vm1, %v236_v6  ;;  %4999 = vmatmul.mubr.msk.f32.vlgmr.msra.gmra.mrb[0].mxu0 %vm273_vm1, %v1848_v7  ;;  %v238_v12 = vld [vmem:[%s5645_s26 + $0x19] sm:$0xff]  ;;  %v1850_v13 = vld [vmem:[%s5645_s26 + $0x2b] sm:$0xff]  ;;  %v239_v14 = vld [vmem:[%s5645_s26 + $0x21] sm:$0xff] }
  0x14   : > { %4829 = vmatpush3.msk.msra.mxu1 %vm382_vm0, %v234_v2  ;;  %5053 = vmatpush3.msk.msra.mxu0 %vm382_vm0, %v4285_v3  ;;  %v1851_v15 = vld [vmem:[%s5645_s26 + $0x33] sm:$0xff]  ;;  %v240_v16 = vld [vmem:[%s5645_s26 + $0x29] sm:$0xff]  ;;  %v1852_v17 = vld [vmem:[%s5645_s26 + $0x3b] sm:$0xff] }
  0x15   : > { %4777 = vmatprep.mubr.msk.f32.mxu1 %vm273_vm1, %v237_v8  ;;  %5001 = vmatprep.mubr.msk.f32.mxu0 %vm273_vm1, %v1849_v9  ;;  %v241_v18 = vld [vmem:[%s5645_s26 + $0x31] sm:$0xff]  ;;  %v1853_v19 = vld [vmem:[%s5645_s26 + $0x43] sm:$0xff]  ;;  %v242_v20 = vld [vmem:[%s5645_s26 + $0x39] sm:$0xff] }
  0x16   : > { %5108 = vmatprep.subr.msk.mxu0 %vm382_vm0, %v5660_v10  ;;  %4884 = vmatprep.subr.msk.mxu1 %vm382_vm0, %v5665_v11  ;;  %v1854_v21 = vld [vmem:[%s5645_s26 + $0x4b] sm:$0xff]  ;;  %v243_v22 = vld [vmem:[%s5645_s26 + $0x41] sm:$0xff]  ;;  %v1855_v23 = vld [vmem:[%s5645_s26 + $0x53] sm:$0xff] }
  0x17   : > { %4778 = vmatmul.mubr.msk.f32.gmra.mrb[2].mxu1 %vm273_vm1, %v238_v12  ;;  %5002 = vmatmul.mubr.msk.f32.gmra.mrb[2].mxu0 %vm273_vm1, %v1850_v13  ;;  %v244_v24 = vld [vmem:[%s5645_s26 + $0x49] sm:$0xff]  ;;  %v1856_v25 = vld [vmem:[%s5645_s26 + $0x5b] sm:$0xff]  ;;  %v245_v26 = vld [vmem:[%s5645_s26 + $0x51] sm:$0xff] }
  0x18   : > { %4780 = vmatprep.mubr.msk.f32.mxu1 %vm273_vm1, %v239_v14  ;;  %5004 = vmatprep.mubr.msk.f32.mxu0 %vm273_vm1, %v1851_v15  ;;  %v1857_v27 = vld [vmem:[%s5645_s26 + $0x63] sm:$0xff]  ;;  %v246_v28 = vld [vmem:[%s5645_s26 + $0x59] sm:$0xff]  ;;  %v1858_v29 = vld [vmem:[%s5645_s26 + $0x6b] sm:$0xff] }
  0x19   : > { %v247_v30 = vld [vmem:[%s5645_s26 + $0x61] sm:$0xff]  ;;  %v1859_v31 = vld [vmem:[%s5645_s26 + $0x73] sm:$0xff]  ;;  %v248_v32 = vld [vmem:[%s5645_s26 + $0x69] sm:$0xff] }
  0x1a   : > { %v1860_v33 = vld [vmem:[%s5645_s26 + $0x7b] sm:$0xff]  ;;  %v249_v34 = vld [vmem:[%s5645_s26 + $0x71] sm:$0xff]  ;;  %v1861_v35 = vld [vmem:[%s5645_s26 + $0x83] sm:$0xff] }
  0x1b   : > { %4781 = vmatmul.mubr.msk.f32.gmra.mrb[4].mxu1 %vm273_vm1, %v240_v16  ;;  %5005 = vmatmul.mubr.msk.f32.gmra.mrb[4].mxu0 %vm273_vm1, %v1852_v17  ;;  %v250_v36 = vld [vmem:[%s5645_s26 + $0x79] sm:$0xff]  ;;  %v1862_v37 = vld [vmem:[%s5645_s26 + $0x8b] sm:$0xff]  ;;  %v251_v38 = vld [vmem:[%s5645_s26 + $0x81] sm:$0xff] }
  0x1c   : > { %4783 = vmatprep.mubr.msk.f32.mxu1 %vm273_vm1, %v241_v18  ;;  %5007 = vmatprep.mubr.msk.f32.mxu0 %vm273_vm1, %v1853_v19  ;;  %v1863_v39 = vld [vmem:[%s5645_s26 + $0x93] sm:$0xff]  ;;  %v252_v40 = vld [vmem:[%s5645_s26 + $0x89] sm:$0xff]  ;;  %v1864_v41 = vld [vmem:[%s5645_s26 + $0x9b] sm:$0xff] }
  0x1d   : > { %v253_v42 = vld [vmem:[%s5645_s26 + $0x91] sm:$0xff]  ;;  %v254_v44 = vld [vmem:[%s5645_s26 + $0x99] sm:$0xff]  ;;  %v255_v46 = vld [vmem:[%s5645_s26 + $0xa1] sm:$0xff] }
  0x1e   : > { %v2277_v43 = vld [vmem:[%s5645_s26 + $0x14] sm:$0xff]  ;;  %v2278_v45 = vld [vmem:[%s5645_s26 + $0x1c] sm:$0xff]  ;;  %v5743_v47 = vld [vmem:[%s5645_s26 + $0x24] sm:$0xff] }
  0x1f   : > { %4784 = vmatmul.mubr.msk.f32.gmra.mrb[6].mxu1 %vm273_vm1, %v242_v20  ;;  %5008 = vmatmul.mubr.msk.f32.gmra.mrb[6].mxu0 %vm273_vm1, %v1854_v21  ;;  %v256_v49 = vld [vmem:[%s5645_s26 + $0xa9] sm:$0xff]  ;;  %v257_v51 = vld [vmem:[%s5645_s26 + $0xb1] sm:$0xff]  ;;  %v258_v53 = vld [vmem:[%s5645_s26 + $0xb9] sm:$0xff] }
  0x20   : > { %4786 = vmatprep.mubr.msk.f32.mxu1 %vm273_vm1, %v243_v22  ;;  %5010 = vmatprep.mubr.msk.f32.mxu0 %vm273_vm1, %v1855_v23  ;;  %v5757_v50 = vld [vmem:[%s5645_s26 + $0x2c] sm:$0xff]  ;;  %v5763_v52 = vld [vmem:[%s5645_s26 + $0x34] sm:$0xff]  ;;  %v5775_v54 = vld [vmem:[%s5645_s26 + $0x3c] sm:$0xff] }
  0x21   : > { %v259_v55 = vld [vmem:[%s5645_s26 + $0xc1] sm:$0xff]  ;;  %v260_v57 = vld [vmem:[%s5645_s26 + $0xc9] sm:$0xff]  ;;  %v261_v59 = vld [vmem:[%s5645_s26 + $0xd1] sm:$0xff] }
  0x22   : > { %v5779_v56 = vld [vmem:[%s5645_s26 + $0x44] sm:$0xff]  ;;  %v5789_v58 = vld [vmem:[%s5645_s26 + $0x4c] sm:$0xff]  ;;  %v5793_v60 = vld [vmem:[%s5645_s26 + $0x54] sm:$0xff] }
  0x23   : > { %4787 = vmatmul.mubr.msk.f32.gmra.mrb[8].mxu1 %vm273_vm1, %v244_v24  ;;  %5011 = vmatmul.mubr.msk.f32.gmra.mrb[8].mxu0 %vm273_vm1, %v1856_v25  ;;  %v262_v61 = vld [vmem:[%s5645_s26 + $0xd9] sm:$0xff]  ;;  %v263_v63 = vld [vmem:[%s5645_s26 + $0xe1] sm:$0xff]  ;;  %v264_v2 = vld [vmem:[%s5645_s26 + $0xe9] sm:$0xff] }
  0x24   : > { %4789 = vmatprep.mubr.msk.f32.mxu1 %vm273_vm1, %v245_v26  ;;  %5013 = vmatprep.mubr.msk.f32.mxu0 %vm273_vm1, %v1857_v27  ;;  %v5803_v62 = vld [vmem:[%s5645_s26 + $0x5c] sm:$0xff]  ;;  %v5807_v0 = vld [vmem:[%s5645_s26 + $0x64] sm:$0xff]  ;;  %v5817_v3 = vld [vmem:[%s5645_s26 + $0x6c] sm:$0xff] }
  0x25   : > { %v265_v4 = vld [vmem:[%s5645_s26 + $0xf1] sm:$0xff]  ;;  %v266_v6 = vld [vmem:[%s5645_s26 + $0xf9] sm:$0xff]  ;;  %v267_v8 = vld [vmem:[%s5645_s26 + $0x101] sm:$0xff] }
  0x26   : > { %v5821_v5 = vld [vmem:[%s5645_s26 + $0x74] sm:$0xff]  ;;  %v5831_v7 = vld [vmem:[%s5645_s26 + $0x7c] sm:$0xff]  ;;  %v5835_v9 = vld [vmem:[%s5645_s26 + $0x84] sm:$0xff] }
  0x27   : > { %4790 = vmatmul.mubr.msk.f32.gmra.mrb[10].mxu1 %vm273_vm1, %v246_v28  ;;  %5014 = vmatmul.mubr.msk.f32.gmra.mrb[10].mxu0 %vm273_vm1, %v1858_v29  ;;  %v5845_v12 = vld [vmem:[%s5645_s26 + $0x8c] sm:$0xff]  ;;  %v5849_v14 = vld [vmem:[%s5645_s26 + $0x94] sm:$0xff]  ;;  %v5859_v16 = vld [vmem:[%s5645_s26 + $0x9c] sm:$0xff] }
  0x28   : > { %4792 = vmatprep.mubr.msk.f32.mxu1 %vm273_vm1, %v247_v30  ;;  %5016 = vmatprep.mubr.msk.f32.mxu0 %vm273_vm1, %v1859_v31  ;;  %v269_v13 = vld [vmem:[%s5645_s26 + $0x111] sm:$0xff]  ;;  %v270_v15 = vld [vmem:[%s5645_s26 + $0x119] sm:$0xff]  ;;  %v5863_v18 = vld [vmem:[%s5645_s26 + $0xa4] sm:$0xff] }
  0x29   : > { %v198_v17 = vld [vmem:[%s5645_s26] sm:$0xff]  ;;  %v199_v19 = vld [vmem:[%s5645_s26 + $0x8] sm:$0xff]  ;;  %v200_v21 = vld [vmem:[%s5645_s26 + $0x10] sm:$0xff] }
  0x2a   : > { %v5873_v20 = vld [vmem:[%s5645_s26 + $0xac] sm:$0xff]  ;;  %v5877_v22 = vld [vmem:[%s5645_s26 + $0xb4] sm:$0xff]  ;;  %v5892_v25 = vld [vmem:[%s5645_s26 + $0xbc] sm:$0xff] }
  0x2b   : > { %4793 = vmatmul.mubr.msk.f32.gmra.mrb[12].mxu1 %vm273_vm1, %v248_v32  ;;  %5017 = vmatmul.mubr.msk.f32.gmra.mrb[12].mxu0 %vm273_vm1, %v1860_v33  ;;  %v5882_v23 = vld [vmem:[%s6632_s1 + $0xc] sm:$0xf]  ;;  %v201_v24 = vld [vmem:[%s5645_s26 + $0x18] sm:$0xff]  ;;  %v202_v26 = vld [vmem:[%s5645_s26 + $0x20] sm:$0xff] }
  0x2c   : > { %4795 = vmatprep.mubr.msk.f32.mxu1 %vm273_vm1, %v249_v34  ;;  %5019 = vmatprep.mubr.msk.f32.mxu0 %vm273_vm1, %v1861_v35  ;;  %v5898_v27 = vld [vmem:[%s5645_s26 + $0xc4] sm:$0xff]  ;;  %v5910_v28 = vld [vmem:[%s5645_s26 + $0xcc] sm:$0xff]  ;;  %v5914_v30 = vld [vmem:[%s5645_s26 + $0xd4] sm:$0xff] }
  0x2d   : > { %v204_v29 = vld [vmem:[%s5645_s26 + $0x30] sm:$0xff]  ;;  %v205_v31 = vld [vmem:[%s5645_s26 + $0x38] sm:$0xff]  ;;  %v206_v33 = vld [vmem:[%s5645_s26 + $0x40] sm:$0xff] }
  0x2e   : > { %v5924_v32 = vld [vmem:[%s5645_s26 + $0xdc] sm:$0xff]  ;;  %v5928_v34 = vld [vmem:[%s5645_s26 + $0xe4] sm:$0xff] }
  0x2f   : > { %4796 = vmatmul.mubr.msk.f32.gmra.mrb[14].mxu1 %vm273_vm1, %v250_v36  ;;  %5020 = vmatmul.mubr.msk.f32.gmra.mrb[14].mxu0 %vm273_vm1, %v1862_v37  ;;  %v207_v35 = vld [vmem:[%s5645_s26 + $0x48] sm:$0xff]  ;;  %v208_v37 = vld [vmem:[%s5645_s26 + $0x50] sm:$0xff] }
  0x30   : > { %4798 = vmatprep.mubr.msk.f32.mxu1 %vm273_vm1, %v251_v38  ;;  %5022 = vmatprep.mubr.msk.f32.mxu0 %vm273_vm1, %v1863_v39  ;;  %v5938_v36 = vld [vmem:[%s5645_s26 + $0xec] sm:$0xff]  ;;  %v5942_v38 = vld [vmem:[%s5645_s26 + $0xf4] sm:$0xff] }
  0x31   : > { %v209_v39 = vld [vmem:[%s5645_s26 + $0x58] sm:$0xff] }
  0x33   : > { %4799 = vmatmul.mubr.msk.f32.gmra.mrb[16].mxu1 %vm273_vm1, %v252_v40  ;;  %5023 = vmatmul.mubr.msk.f32.gmra.mrb[16].mxu0 %vm273_vm1, %v1864_v41  ;;  %v5952_v40 = vld [vmem:[%s5645_s26 + $0xfc] sm:$0xff] }
  0x34   : > { %4801 = vmatprep.mubr.msk.f32.mxu1 %vm273_vm1, %v253_v42  ;;  %5054 = vmatprep.mubr.msk.f32.mxu0 %vm273_vm1, %v2277_v43  ;;  %v210_v41 = vld [vmem:[%s5645_s26 + $0x60] sm:$0xff]  ;;  %v211_v43 = vld [vmem:[%s5645_s26 + $0x68] sm:$0xff] }
  0x35   : > { %v5956_v42 = vld [vmem:[%s5645_s26 + $0x104] sm:$0xff] }
  0x37   : > { %4802 = vmatmul.mubr.msk.f32.gmra.mrb[18].mxu1 %vm273_vm1, %v254_v44  ;;  %5055 = vmatmul.mubr.msk.f32.vlgmr.msra.gmra.mrb[0].mxu0 %vm273_vm1, %v2278_v45  ;;  %v5966_v44 = vld [vmem:[%s5645_s26 + $0x10c] sm:$0xff] }
  0x38   : > { %5109 = vmatpush3.msk.msra.mxu0 %vm382_vm0, %v5660_v10  ;;  %4804 = vmatprep.mubr.msk.f32.mxu1 %vm273_vm1, %v255_v46  ;;  %v268_v10 = vld [vmem:[%s5645_s26 + $0x109] sm:$0xff]  ;;  %v5970_v46 = vld [vmem:[%s5645_s26 + $0x114] sm:$0xff] }
  0x39   : > { %5057 = vmatprep.mubr.msk.f32.mxu0 %vm273_vm1, %v5743_v47  ;;  %5164 = vmatprep.subr.msk.mxu0 %vm382_vm0, %v5748_v48  ;;  %v212_v45 = vld [vmem:[%s5645_s26 + $0x70] sm:$0xff] }
  0x3b   : > { %4805 = vmatmul.mubr.msk.f32.gmra.mrb[20].mxu1 %vm273_vm1, %v256_v49  ;;  %5058 = vmatmul.mubr.msk.f32.gmra.mrb[2].mxu0 %vm273_vm1, %v5757_v50  ;;  %v213_v49 = vld [vmem:[%s5645_s26 + $0x78] sm:$0xff] }
  0x3c   : > { %4807 = vmatprep.mubr.msk.f32.mxu1 %vm273_vm1, %v257_v51  ;;  %5060 = vmatprep.mubr.msk.f32.mxu0 %vm273_vm1, %v5763_v52  ;;  %v5980_v51 = vld [vmem:[%s5645_s26 + $0x11c] sm:$0xff] }
  0x3f   : > { %4808 = vmatmul.mubr.msk.f32.gmra.mrb[22].mxu1 %vm273_vm1, %v258_v53  ;;  %5061 = vmatmul.mubr.msk.f32.gmra.mrb[4].mxu0 %vm273_vm1, %v5775_v54  ;;  %v214_v53 = vld [vmem:[%s5645_s26 + $0x80] sm:$0xff] }
  0x40   : > { %4810 = vmatprep.mubr.msk.f32.mxu1 %vm273_vm1, %v259_v55  ;;  %5063 = vmatprep.mubr.msk.f32.mxu0 %vm273_vm1, %v5779_v56  ;;  %v5984_v55 = vld [vmem:[%s5645_s26 + $0x124] sm:$0xff] }
  0x43   : > { %4811 = vmatmul.mubr.msk.f32.gmra.mrb[24].mxu1 %vm273_vm1, %v260_v57  ;;  %5064 = vmatmul.mubr.msk.f32.gmra.mrb[6].mxu0 %vm273_vm1, %v5789_v58  ;;  %v215_v57 = vld [vmem:[%s5645_s26 + $0x88] sm:$0xff] }
  0x44   : > { %4813 = vmatprep.mubr.msk.f32.mxu1 %vm273_vm1, %v261_v59  ;;  %5066 = vmatprep.mubr.msk.f32.mxu0 %vm273_vm1, %v5793_v60  ;;  %v5994_v59 = vld [vmem:[%s5645_s26 + $0x12c] sm:$0xff] }
  0x47   : > { %4814 = vmatmul.mubr.msk.f32.gmra.mrb[26].mxu1 %vm273_vm1, %v262_v61  ;;  %5067 = vmatmul.mubr.msk.f32.gmra.mrb[8].mxu0 %vm273_vm1, %v5803_v62  ;;  %v216_v61 = vld [vmem:[%s5645_s26 + $0x90] sm:$0xff] }
  0x48   : > { %4816 = vmatprep.mubr.msk.f32.mxu1 %vm273_vm1, %v263_v63  ;;  %5069 = vmatprep.mubr.msk.f32.mxu0 %vm273_vm1, %v5807_v0  ;;  %v217_v63 = vld [vmem:[%s5645_s26 + $0x98] sm:$0xff] }
  0x4b   : > { %4817 = vmatmul.mubr.msk.f32.gmra.mrb[28].mxu1 %vm273_vm1, %v264_v2  ;;  %5070 = vmatmul.mubr.msk.f32.gmra.mrb[10].mxu0 %vm273_vm1, %v5817_v3  ;;  %v218_v2 = vld [vmem:[%s5645_s26 + $0xa0] sm:$0xff] }
  0x4c   : > { %4819 = vmatprep.mubr.msk.f32.mxu1 %vm273_vm1, %v265_v4  ;;  %5072 = vmatprep.mubr.msk.f32.mxu0 %vm273_vm1, %v5821_v5  ;;  %v6008_v4 = vld [vmem:[%s6632_s1 + $0x20] sm:$0xf] }
  0x4f   : > { %4820 = vmatmul.mubr.msk.f32.gmra.mrb[30].mxu1 %vm273_vm1, %v266_v6  ;;  %5073 = vmatmul.mubr.msk.f32.gmra.mrb[12].mxu0 %vm273_vm1, %v5831_v7  ;;  %v220_v6 = vld [vmem:[%s5645_s26 + $0xb0] sm:$0xff] }
  0x50   : > { %4822 = vmatprep.mubr.msk.f32.mxu1 %vm273_vm1, %v267_v8  ;;  %5075 = vmatprep.mubr.msk.f32.mxu0 %vm273_vm1, %v5835_v9  ;;  %v233_v8 = vld [vmem:[%s5645_s26 + $0x118] sm:$0xff] }
  0x53   : > { %4823 = vmatmul.mubr.msk.f32.gmra.mrb[32].mxu1 %vm273_vm1, %v268_v10  ;;  %5076 = vmatmul.mubr.msk.f32.gmra.mrb[14].mxu0 %vm273_vm1, %v5845_v12  ;;  %v988_v10 = vld [vmem:[%s5645_s26 + $0xa] sm:$0xff] }
  0x54   : > { %4825 = vmatprep.mubr.msk.f32.mxu1 %vm273_vm1, %v269_v13  ;;  %5078 = vmatprep.mubr.msk.f32.mxu0 %vm273_vm1, %v5849_v14  ;;  %v6096_v13 = vld [vmem:[%s5645_s26 + $0x1a] sm:$0xff] }
  0x57   : > { %4826 = vmatmul.mubr.msk.f32.gmra.mrb[34].mxu1 %vm273_vm1, %v270_v15  ;;  %5079 = vmatmul.mubr.msk.f32.gmra.mrb[16].mxu0 %vm273_vm1, %v5859_v16  ;;  %v6114_v15 = vld [vmem:[%s5645_s26 + $0x2a] sm:$0xff] }
  0x58   : > { %4830 = vmatprep.mubr.msk.f32.mxu1 %vm273_vm1, %v198_v17  ;;  %5081 = vmatprep.mubr.msk.f32.mxu0 %vm273_vm1, %v5863_v18  ;;  %v6128_v17 = vld [vmem:[%s5645_s26 + $0x3a] sm:$0xff] }
  0x5b   : > { %4831 = vmatmul.mubr.msk.f32.vlgmr.msra.gmra.mrb[0].mxu1 %vm273_vm1, %v199_v19  ;;  %5082 = vmatmul.mubr.msk.f32.gmra.mrb[18].mxu0 %vm273_vm1, %v5873_v20  ;;  %v6142_v19 = vld [vmem:[%s5645_s26 + $0x4a] sm:$0xff] }
  0x5c   : > { %4885 = vmatpush3.msk.msra.mxu1 %vm382_vm0, %v5665_v11  ;;  %4833 = vmatprep.mubr.msk.f32.mxu1 %vm273_vm1, %v200_v21  ;;  %v203_v11 = vld [vmem:[%s5645_s26 + $0x28] sm:$0xff]  ;;  %v6156_v21 = vld [vmem:[%s5645_s26 + $0x5a] sm:$0xff] }
  0x5d   : > { %5084 = vmatprep.mubr.msk.f32.mxu0 %vm273_vm1, %v5877_v22  ;;  %4940 = vmatprep.subr.msk.mxu1 %vm382_vm0, %v5882_v23 }
  0x5f   : > { %4834 = vmatmul.mubr.msk.f32.gmra.mrb[2].mxu1 %vm273_vm1, %v201_v24  ;;  %5085 = vmatmul.mubr.msk.f32.gmra.mrb[20].mxu0 %vm273_vm1, %v5892_v25  ;;  %v6173_v24 = vld [vmem:[%s5645_s26 + $0x72] sm:$0xff] }
  0x60   : > { %4836 = vmatprep.mubr.msk.f32.mxu1 %vm273_vm1, %v202_v26  ;;  %5087 = vmatprep.mubr.msk.f32.mxu0 %vm273_vm1, %v5898_v27  ;;  %v6187_v26 = vld [vmem:[%s5645_s26 + $0x82] sm:$0xff] }
  0x63   : > { %4837 = vmatmul.mubr.msk.f32.gmra.mrb[4].mxu1 %vm273_vm1, %v203_v11  ;;  %5088 = vmatmul.mubr.msk.f32.gmra.mrb[22].mxu0 %vm273_vm1, %v5910_v28  ;;  %v6198_v11 = vld [vmem:[%s5645_s26 + $0x8a] sm:$0xff] }
  0x64   : > { %4839 = vmatprep.mubr.msk.f32.mxu1 %vm273_vm1, %v204_v29  ;;  %5090 = vmatprep.mubr.msk.f32.mxu0 %vm273_vm1, %v5914_v30  ;;  %v6202_v29 = vld [vmem:[%s5645_s26 + $0x92] sm:$0xff] }
  0x67   : > { %4840 = vmatmul.mubr.msk.f32.gmra.mrb[6].mxu1 %vm273_vm1, %v205_v31  ;;  %5091 = vmatmul.mubr.msk.f32.gmra.mrb[24].mxu0 %vm273_vm1, %v5924_v32  ;;  %v6212_v31 = vld [vmem:[%s5645_s26 + $0x9a] sm:$0xff] }
  0x68   : > { %4842 = vmatprep.mubr.msk.f32.mxu1 %vm273_vm1, %v206_v33  ;;  %5093 = vmatprep.mubr.msk.f32.mxu0 %vm273_vm1, %v5928_v34  ;;  %v6216_v33 = vld [vmem:[%s5645_s26 + $0xa2] sm:$0xff] }
  0x6b   : > { %4843 = vmatmul.mubr.msk.f32.gmra.mrb[8].mxu1 %vm273_vm1, %v207_v35  ;;  %5094 = vmatmul.mubr.msk.f32.gmra.mrb[26].mxu0 %vm273_vm1, %v5938_v36  ;;  %v6227_v35 = vld [vmem:[%s5645_s26 + $0xaa] sm:$0xff] }
  0x6c   : > { %4845 = vmatprep.mubr.msk.f32.mxu1 %vm273_vm1, %v208_v37  ;;  %5096 = vmatprep.mubr.msk.f32.mxu0 %vm273_vm1, %v5942_v38  ;;  %v6232_v37 = vld [vmem:[%s5645_s26 + $0xb2] sm:$0xff] }
  0x6f   : > { %4846 = vmatmul.mubr.msk.f32.gmra.mrb[10].mxu1 %vm273_vm1, %v209_v39  ;;  %5097 = vmatmul.mubr.msk.f32.gmra.mrb[28].mxu0 %vm273_vm1, %v5952_v40  ;;  %v6242_v39 = vld [vmem:[%s5645_s26 + $0xba] sm:$0xff] }
  0x70   : > { %4848 = vmatprep.mubr.msk.f32.mxu1 %vm273_vm1, %v210_v41  ;;  %5099 = vmatprep.mubr.msk.f32.mxu0 %vm273_vm1, %v5956_v42  ;;  %v6246_v41 = vld [vmem:[%s5645_s26 + $0xc2] sm:$0xff] }
  0x73   : > { %4849 = vmatmul.mubr.msk.f32.gmra.mrb[12].mxu1 %vm273_vm1, %v211_v43  ;;  %5100 = vmatmul.mubr.msk.f32.gmra.mrb[30].mxu0 %vm273_vm1, %v5966_v44  ;;  %v6256_v43 = vld [vmem:[%s5645_s26 + $0xca] sm:$0xff] }
  0x74   : > { %4851 = vmatprep.mubr.msk.f32.mxu1 %vm273_vm1, %v212_v45  ;;  %5102 = vmatprep.mubr.msk.f32.mxu0 %vm273_vm1, %v5970_v46  ;;  %v6260_v45 = vld [vmem:[%s5645_s26 + $0xd2] sm:$0xff] }
  0x77   : > { %4852 = vmatmul.mubr.msk.f32.gmra.mrb[14].mxu1 %vm273_vm1, %v213_v49  ;;  %5103 = vmatmul.mubr.msk.f32.gmra.mrb[32].mxu0 %vm273_vm1, %v5980_v51  ;;  %v6270_v49 = vld [vmem:[%s5645_s26 + $0xda] sm:$0xff] }
  0x78   : > { %4854 = vmatprep.mubr.msk.f32.mxu1 %vm273_vm1, %v214_v53  ;;  %5105 = vmatprep.mubr.msk.f32.mxu0 %vm273_vm1, %v5984_v55  ;;  %v6274_v53 = vld [vmem:[%s5645_s26 + $0xe2] sm:$0xff] }
  0x7b   : > { %4855 = vmatmul.mubr.msk.f32.gmra.mrb[16].mxu1 %vm273_vm1, %v215_v57  ;;  %5106 = vmatmul.mubr.msk.f32.gmra.mrb[34].mxu0 %vm273_vm1, %v5994_v59  ;;  %v6284_v57 = vld [vmem:[%s5645_s26 + $0xea] sm:$0xff] }
  0x7c   : > { %4857 = vmatprep.mubr.msk.f32.mxu1 %vm273_vm1, %v216_v61  ;;  %5110 = vmatprep.mubr.msk.f32.mxu0 %vm273_vm1, %v5743_v47  ;;  %v219_v47 = vld [vmem:[%s5645_s26 + $0xa8] sm:$0xff]  ;;  %v6288_v61 = vld [vmem:[%s5645_s26 + $0xf2] sm:$0xff] }
  0x7f   : > { %4858 = vmatmul.mubr.msk.f32.gmra.mrb[18].mxu1 %vm273_vm1, %v217_v63  ;;  %5111 = vmatmul.mubr.msk.f32.vlgmr.msra.gmra.mrb[0].mxu0 %vm273_vm1, %v5757_v50  ;;  %v222_v50 = vld [vmem:[%s5645_s26 + $0xc0] sm:$0xff] }
  0x80   : > { %5165 = vmatpush3.msk.msra.mxu0 %vm382_vm0, %v5748_v48  ;;  %4860 = vmatprep.mubr.msk.f32.mxu1 %vm273_vm1, %v218_v2  ;;  %v221_v48 = vld [vmem:[%s5645_s26 + $0xb8] sm:$0xff]  ;;  %v3149_v63 = vld [vmem:[%s5645_s26 + $0x85] sm:$0xff] }
  0x81   : > { %5113 = vmatprep.mubr.msk.f32.mxu0 %vm273_vm1, %v5763_v52  ;;  %5220 = vmatprep.subr.msk.mxu0 %vm382_vm0, %v6008_v4  ;;  %v223_v52 = vld [vmem:[%s5645_s26 + $0xc8] sm:$0xff]  ;;  %v6298_v2 = vld [vmem:[%s5645_s26 + $0xfa] sm:$0xff] }
  0x83   : > { %4861 = vmatmul.mubr.msk.f32.gmra.mrb[20].mxu1 %vm273_vm1, %v219_v47  ;;  %5114 = vmatmul.mubr.msk.f32.gmra.mrb[2].mxu0 %vm273_vm1, %v5775_v54  ;;  %v224_v54 = vld [vmem:[%s5645_s26 + $0xd0] sm:$0xff]  ;;  %v6302_v47 = vld [vmem:[%s5645_s26 + $0x102] sm:$0xff] }
  0x84   : > { %4863 = vmatprep.mubr.msk.f32.mxu1 %vm273_vm1, %v220_v6  ;;  %5116 = vmatprep.mubr.msk.f32.mxu0 %vm273_vm1, %v5779_v56  ;;  %v225_v56 = vld [vmem:[%s5645_s26 + $0xd8] sm:$0xff] }
  0x85   : > { %v3151_v6 = vld [vmem:[%s5645_s26 + $0x95] sm:$0xff] }
  0x87   : > { %4864 = vmatmul.mubr.msk.f32.gmra.mrb[22].mxu1 %vm273_vm1, %v221_v48  ;;  %5117 = vmatmul.mubr.msk.f32.gmra.mrb[4].mxu0 %vm273_vm1, %v5789_v58  ;;  %v226_v58 = vld [vmem:[%s5645_s26 + $0xe0] sm:$0xff]  ;;  %v6312_v48 = vld [vmem:[%s5645_s26 + $0x10a] sm:$0xff] }
  0x88   : > { %4866 = vmatprep.mubr.msk.f32.mxu1 %vm273_vm1, %v222_v50  ;;  %5119 = vmatprep.mubr.msk.f32.mxu0 %vm273_vm1, %v5793_v60  ;;  %v227_v60 = vld [vmem:[%s5645_s26 + $0xe8] sm:$0xff]  ;;  %v3152_v50 = vld [vmem:[%s5645_s26 + $0x9d] sm:$0xff] }
  0x8b   : > { %4867 = vmatmul.mubr.msk.f32.gmra.mrb[24].mxu1 %vm273_vm1, %v223_v52  ;;  %5120 = vmatmul.mubr.msk.f32.gmra.mrb[6].mxu0 %vm273_vm1, %v5803_v62  ;;  %v228_v62 = vld [vmem:[%s5645_s26 + $0xf0] sm:$0xff] }
  0x8c   : > { %4869 = vmatprep.mubr.msk.f32.mxu1 %vm273_vm1, %v224_v54  ;;  %5122 = vmatprep.mubr.msk.f32.mxu0 %vm273_vm1, %v5807_v0  ;;  %v229_v0 = vld [vmem:[%s5645_s26 + $0xf8] sm:$0xff]  ;;  %v3153_v54 = vld [vmem:[%s5645_s26 + $0xa5] sm:$0xff] }
  0x8d   : > { %v6316_v52 = vld [vmem:[%s5645_s26 + $0x112] sm:$0xff] }
  0x8f   : > { %4870 = vmatmul.mubr.msk.f32.gmra.mrb[26].mxu1 %vm273_vm1, %v225_v56  ;;  %5123 = vmatmul.mubr.msk.f32.gmra.mrb[8].mxu0 %vm273_vm1, %v5817_v3  ;;  %v230_v3 = vld [vmem:[%s5645_s26 + $0x100] sm:$0xff] }
  0x90   : > { %4872 = vmatprep.mubr.msk.f32.mxu1 %vm273_vm1, %v226_v58  ;;  %5125 = vmatprep.mubr.msk.f32.mxu0 %vm273_vm1, %v5821_v5  ;;  %v231_v5 = vld [vmem:[%s5645_s26 + $0x108] sm:$0xff]  ;;  %v6326_v56 = vld [vmem:[%s5645_s26 + $0x11a] sm:$0xff] }
  0x91   : > { %v3154_v58 = vld [vmem:[%s5645_s26 + $0xad] sm:$0xff] }
  0x93   : > { %4873 = vmatmul.mubr.msk.f32.gmra.mrb[28].mxu1 %vm273_vm1, %v227_v60  ;;  %5126 = vmatmul.mubr.msk.f32.gmra.mrb[10].mxu0 %vm273_vm1, %v5831_v7  ;;  %v232_v7 = vld [vmem:[%s5645_s26 + $0x110] sm:$0xff] }
  0x94   : > { %4875 = vmatprep.mubr.msk.f32.mxu1 %vm273_vm1, %v228_v62  ;;  %5128 = vmatprep.mubr.msk.f32.mxu0 %vm273_vm1, %v5835_v9  ;;  %v987_v9 = vld [vmem:[%s5645_s26 + $0x2] sm:$0xff]  ;;  %v3155_v60 = vld [vmem:[%s5645_s26 + $0xb5] sm:$0xff] }
  0x95   : > { %v3156_v62 = vld [vmem:[%s5645_s26 + $0xbd] sm:$0xff] }
  0x97   : > { %4876 = vmatmul.mubr.msk.f32.gmra.mrb[30].mxu1 %vm273_vm1, %v229_v0  ;;  %5129 = vmatmul.mubr.msk.f32.gmra.mrb[12].mxu0 %vm273_vm1, %v5845_v12  ;;  %v6086_v12 = vld [vmem:[%s5645_s26 + $0x12] sm:$0xff]  ;;  %v3157_v0 = vld [vmem:[%s5645_s26 + $0xc5] sm:$0xff] }
  0x98   : > { %4878 = vmatprep.mubr.msk.f32.mxu1 %vm273_vm1, %v230_v3  ;;  %5131 = vmatprep.mubr.msk.f32.mxu0 %vm273_vm1, %v5849_v14  ;;  %v6101_v14 = vld [vmem:[%s5645_s26 + $0x22] sm:$0xff]  ;;  %v3158_v3 = vld [vmem:[%s5645_s26 + $0xcd] sm:$0xff] }
  0x9b   : > { %4879 = vmatmul.mubr.msk.f32.gmra.mrb[32].mxu1 %vm273_vm1, %v231_v5  ;;  %5132 = vmatmul.mubr.msk.f32.gmra.mrb[14].mxu0 %vm273_vm1, %v5859_v16  ;;  %v6117_v16 = vld [vmem:[%s5645_s26 + $0x32] sm:$0xff] }
  0x9c   : > { %4881 = vmatprep.mubr.msk.f32.mxu1 %vm273_vm1, %v232_v7  ;;  %5134 = vmatprep.mubr.msk.f32.mxu0 %vm273_vm1, %v5863_v18  ;;  %v6131_v18 = vld [vmem:[%s5645_s26 + $0x42] sm:$0xff]  ;;  %v3159_v5 = vld [vmem:[%s5645_s26 + $0xd5] sm:$0xff] }
  0x9d   : > { %v3161_v7 = vld [vmem:[%s5645_s26 + $0xe5] sm:$0xff] }
  0x9f   : > { %4882 = vmatmul.mubr.msk.f32.gmra.mrb[34].mxu1 %vm273_vm1, %v233_v8  ;;  %5135 = vmatmul.mubr.msk.f32.gmra.mrb[16].mxu0 %vm273_vm1, %v5873_v20  ;;  %v6145_v20 = vld [vmem:[%s5645_s26 + $0x52] sm:$0xff] }
  0xa0   : > { %4886 = vmatprep.mubr.msk.f32.mxu1 %vm273_vm1, %v987_v9  ;;  %5137 = vmatprep.mubr.msk.f32.mxu0 %vm273_vm1, %v5877_v22  ;;  %v6159_v22 = vld [vmem:[%s5645_s26 + $0x62] sm:$0xff]  ;;  %v3162_v8 = vld [vmem:[%s5645_s26 + $0xed] sm:$0xff]  ;;  %v3163_v9 = vld [vmem:[%s5645_s26 + $0xf5] sm:$0xff] }
  0xa3   : > { %4887 = vmatmul.mubr.msk.f32.vlgmr.msra.gmra.mrb[0].mxu1 %vm273_vm1, %v988_v10  ;;  %5138 = vmatmul.mubr.msk.f32.gmra.mrb[18].mxu0 %vm273_vm1, %v5892_v25  ;;  %v6184_v25 = vld [vmem:[%s5645_s26 + $0x7a] sm:$0xff] }
  0xa4   : > { %4941 = vmatpush3.msk.msra.mxu1 %vm382_vm0, %v5882_v23  ;;  %4889 = vmatprep.mubr.msk.f32.mxu1 %vm273_vm1, %v6086_v12  ;;  %v6170_v23 = vld [vmem:[%s5645_s26 + $0x6a] sm:$0xff]  ;;  %v3164_v10 = vld [vmem:[%s5645_s26 + $0xfd] sm:$0xff] }
  0xa5   : > { %5140 = vmatprep.mubr.msk.f32.mxu0 %vm273_vm1, %v5898_v27  ;;  %5276 = vmatprep.subr.msk.mxu1 %vm382_vm0, %v5623_v1  ;;  %v2741_v27 = vld [vmem:[%s5645_s26 + $0x134] sm:$0xff] }
  0xa7   : > { %4890 = vmatmul.mubr.msk.f32.gmra.mrb[2].mxu1 %vm273_vm1, %v6096_v13  ;;  %5141 = vmatmul.mubr.msk.f32.gmra.mrb[20].mxu0 %vm273_vm1, %v5910_v28  ;;  %v2742_v28 = vld [vmem:[%s5645_s26 + $0x13c] sm:$0xff] }
  0xa8   : > { %4892 = vmatprep.mubr.msk.f32.mxu1 %vm273_vm1, %v6101_v14  ;;  %5143 = vmatprep.mubr.msk.f32.mxu0 %vm273_vm1, %v5914_v30  ;;  %v3137_v30 = vld [vmem:[%s5645_s26 + $0x25] sm:$0xff] }
  0xab   : > { %4893 = vmatmul.mubr.msk.f32.gmra.mrb[4].mxu1 %vm273_vm1, %v6114_v15  ;;  %5144 = vmatmul.mubr.msk.f32.gmra.mrb[22].mxu0 %vm273_vm1, %v5924_v32  ;;  %v3138_v32 = vld [vmem:[%s5645_s26 + $0x2d] sm:$0xff] }
  0xac   : > { %4895 = vmatprep.mubr.msk.f32.mxu1 %vm273_vm1, %v6117_v16  ;;  %5146 = vmatprep.mubr.msk.f32.mxu0 %vm273_vm1, %v5928_v34  ;;  %v3139_v34 = vld [vmem:[%s5645_s26 + $0x35] sm:$0xff] }
  0xaf   : > { %4896 = vmatmul.mubr.msk.f32.gmra.mrb[6].mxu1 %vm273_vm1, %v6128_v17  ;;  %5147 = vmatmul.mubr.msk.f32.gmra.mrb[24].mxu0 %vm273_vm1, %v5938_v36  ;;  %v3140_v36 = vld [vmem:[%s5645_s26 + $0x3d] sm:$0xff] }
  0xb0   : > { %4898 = vmatprep.mubr.msk.f32.mxu1 %vm273_vm1, %v6131_v18  ;;  %5149 = vmatprep.mubr.msk.f32.mxu0 %vm273_vm1, %v5942_v38  ;;  %v3141_v38 = vld [vmem:[%s5645_s26 + $0x45] sm:$0xff] }
  0xb3   : > { %4899 = vmatmul.mubr.msk.f32.gmra.mrb[8].mxu1 %vm273_vm1, %v6142_v19  ;;  %5150 = vmatmul.mubr.msk.f32.gmra.mrb[26].mxu0 %vm273_vm1, %v5952_v40  ;;  %v3142_v40 = vld [vmem:[%s5645_s26 + $0x4d] sm:$0xff] }
  0xb4   : > { %4901 = vmatprep.mubr.msk.f32.mxu1 %vm273_vm1, %v6145_v20  ;;  %5152 = vmatprep.mubr.msk.f32.mxu0 %vm273_vm1, %v5956_v42  ;;  %v3143_v42 = vld [vmem:[%s5645_s26 + $0x55] sm:$0xff] }
  0xb7   : > { %4902 = vmatmul.mubr.msk.f32.gmra.mrb[10].mxu1 %vm273_vm1, %v6156_v21  ;;  %5153 = vmatmul.mubr.msk.f32.gmra.mrb[28].mxu0 %vm273_vm1, %v5966_v44  ;;  %v3144_v44 = vld [vmem:[%s5645_s26 + $0x5d] sm:$0xff] }
  0xb8   : > { %4904 = vmatprep.mubr.msk.f32.mxu1 %vm273_vm1, %v6159_v22  ;;  %5155 = vmatprep.mubr.msk.f32.mxu0 %vm273_vm1, %v5970_v46  ;;  %v3145_v46 = vld [vmem:[%s5645_s26 + $0x65] sm:$0xff] }
  0xbb   : > { %4905 = vmatmul.mubr.msk.f32.gmra.mrb[12].mxu1 %vm273_vm1, %v6170_v23  ;;  %5156 = vmatmul.mubr.msk.f32.gmra.mrb[30].mxu0 %vm273_vm1, %v5980_v51  ;;  %v3146_v51 = vld [vmem:[%s5645_s26 + $0x6d] sm:$0xff] }
  0xbc   : > { %4907 = vmatprep.mubr.msk.f32.mxu1 %vm273_vm1, %v6173_v24  ;;  %5158 = vmatprep.mubr.msk.f32.mxu0 %vm273_vm1, %v5984_v55  ;;  %v3147_v55 = vld [vmem:[%s5645_s26 + $0x75] sm:$0xff] }
  0xbf   : > { %4908 = vmatmul.mubr.msk.f32.gmra.mrb[14].mxu1 %vm273_vm1, %v6184_v25  ;;  %5159 = vmatmul.mubr.msk.f32.gmra.mrb[32].mxu0 %vm273_vm1, %v5994_v59  ;;  %v3148_v59 = vld [vmem:[%s5645_s26 + $0x7d] sm:$0xff] }
  0xc0   : > { %4910 = vmatprep.mubr.msk.f32.mxu1 %vm273_vm1, %v6187_v26  ;;  %5161 = vmatprep.mubr.msk.f32.mxu0 %vm273_vm1, %v2741_v27  ;;  %v3574_v27 = vld [vmem:[%s5645_s26 + $0x5e] sm:$0xff] }
  0xc3   : > { %4911 = vmatmul.mubr.msk.f32.gmra.mrb[16].mxu1 %vm273_vm1, %v6198_v11  ;;  %5162 = vmatmul.mubr.msk.f32.gmra.mrb[34].mxu0 %vm273_vm1, %v2742_v28  ;;  %v3576_v28 = vld [vmem:[%s5645_s26 + $0x6e] sm:$0xff] }
  0xc4   : > { %4913 = vmatprep.mubr.msk.f32.mxu1 %vm273_vm1, %v6202_v29  ;;  %5166 = vmatprep.mubr.msk.f32.mxu0 %vm273_vm1, %v3137_v30  ;;  %v3578_v30 = vld [vmem:[%s5645_s26 + $0x7e] sm:$0xff] }
  0xc7   : > { %4914 = vmatmul.mubr.msk.f32.gmra.mrb[18].mxu1 %vm273_vm1, %v6212_v31  ;;  %5167 = vmatmul.mubr.msk.f32.vlgmr.msra.gmra.mrb[0].mxu0 %vm273_vm1, %v3138_v32  ;;  %v3580_v32 = vld [vmem:[%s5645_s26 + $0x8e] sm:$0xff] }
  0xc8   : > { %5221 = vmatpush3.msk.msra.mxu0 %vm382_vm0, %v6008_v4  ;;  %4916 = vmatprep.mubr.msk.f32.mxu1 %vm273_vm1, %v6216_v33  ;;  %v3150_v4 = vld [vmem:[%s5645_s26 + $0x8d] sm:$0xff] }
  0xc9   : > { %5169 = vmatprep.mubr.msk.f32.mxu0 %vm273_vm1, %v3139_v34  ;;  %v3582_v34 = vld [vmem:[%s5645_s26 + $0x9e] sm:$0xff] }
  0xcb   : > { %4917 = vmatmul.mubr.msk.f32.gmra.mrb[20].mxu1 %vm273_vm1, %v6227_v35  ;;  %5170 = vmatmul.mubr.msk.f32.gmra.mrb[2].mxu0 %vm273_vm1, %v3140_v36  ;;  %v3583_v36 = vld [vmem:[%s5645_s26 + $0xa6] sm:$0xff] }
  0xcc   : > { %4919 = vmatprep.mubr.msk.f32.mxu1 %vm273_vm1, %v6232_v37  ;;  %5172 = vmatprep.mubr.msk.f32.mxu0 %vm273_vm1, %v3141_v38  ;;  %v3584_v38 = vld [vmem:[%s5645_s26 + $0xae] sm:$0xff] }
  0xcf   : > { %4920 = vmatmul.mubr.msk.f32.gmra.mrb[22].mxu1 %vm273_vm1, %v6242_v39  ;;  %5173 = vmatmul.mubr.msk.f32.gmra.mrb[4].mxu0 %vm273_vm1, %v3142_v40  ;;  %v3585_v40 = vld [vmem:[%s5645_s26 + $0xb6] sm:$0xff] }
  0xd0   : > { %4922 = vmatprep.mubr.msk.f32.mxu1 %vm273_vm1, %v6246_v41  ;;  %5175 = vmatprep.mubr.msk.f32.mxu0 %vm273_vm1, %v3143_v42  ;;  %v3586_v42 = vld [vmem:[%s5645_s26 + $0xbe] sm:$0xff] }
  0xd3   : > { %4923 = vmatmul.mubr.msk.f32.gmra.mrb[24].mxu1 %vm273_vm1, %v6256_v43  ;;  %5176 = vmatmul.mubr.msk.f32.gmra.mrb[6].mxu0 %vm273_vm1, %v3144_v44  ;;  %v3587_v44 = vld [vmem:[%s5645_s26 + $0xc6] sm:$0xff] }
  0xd4   : > { %4925 = vmatprep.mubr.msk.f32.mxu1 %vm273_vm1, %v6260_v45  ;;  %5178 = vmatprep.mubr.msk.f32.mxu0 %vm273_vm1, %v3145_v46  ;;  %v3588_v46 = vld [vmem:[%s5645_s26 + $0xce] sm:$0xff] }
  0xd7   : > { %4926 = vmatmul.mubr.msk.f32.gmra.mrb[26].mxu1 %vm273_vm1, %v6270_v49  ;;  %5179 = vmatmul.mubr.msk.f32.gmra.mrb[8].mxu0 %vm273_vm1, %v3146_v51  ;;  %v3589_v51 = vld [vmem:[%s5645_s26 + $0xd6] sm:$0xff] }
  0xd8   : > { %4928 = vmatprep.mubr.msk.f32.mxu1 %vm273_vm1, %v6274_v53  ;;  %5181 = vmatprep.mubr.msk.f32.mxu0 %vm273_vm1, %v3147_v55  ;;  %v3590_v55 = vld [vmem:[%s5645_s26 + $0xde] sm:$0xff] }
  0xdb   : > { %4929 = vmatmul.mubr.msk.f32.gmra.mrb[28].mxu1 %vm273_vm1, %v6284_v57  ;;  %5182 = vmatmul.mubr.msk.f32.gmra.mrb[10].mxu0 %vm273_vm1, %v3148_v59  ;;  %v3591_v59 = vld [vmem:[%s5645_s26 + $0xe6] sm:$0xff] }
  0xdc   : > { %4931 = vmatprep.mubr.msk.f32.mxu1 %vm273_vm1, %v6288_v61  ;;  %5184 = vmatprep.mubr.msk.f32.mxu0 %vm273_vm1, %v3149_v63  ;;  %v3592_v63 = vld [vmem:[%s5645_s26 + $0xee] sm:$0xff] }
  0xdf   : > { %4932 = vmatmul.mubr.msk.f32.gmra.mrb[30].mxu1 %vm273_vm1, %v6298_v2  ;;  %5185 = vmatmul.mubr.msk.f32.gmra.mrb[12].mxu0 %vm273_vm1, %v3150_v4  ;;  %v3593_v4 = vld [vmem:[%s5645_s26 + $0xf6] sm:$0xff] }
  0xe0   : > { %4934 = vmatprep.mubr.msk.f32.mxu1 %vm273_vm1, %v6302_v47  ;;  %5187 = vmatprep.mubr.msk.f32.mxu0 %vm273_vm1, %v3151_v6  ;;  %v3594_v6 = vld [vmem:[%s5645_s26 + $0xfe] sm:$0xff] }
  0xe3   : > { %4935 = vmatmul.mubr.msk.f32.gmra.mrb[32].mxu1 %vm273_vm1, %v6312_v48  ;;  %5188 = vmatmul.mubr.msk.f32.gmra.mrb[14].mxu0 %vm273_vm1, %v3152_v50  ;;  %v3595_v50 = vld [vmem:[%s5645_s26 + $0x106] sm:$0xff] }
  0xe4   : > { %4937 = vmatprep.mubr.msk.f32.mxu1 %vm273_vm1, %v6316_v52  ;;  %5190 = vmatprep.mubr.msk.f32.mxu0 %vm273_vm1, %v3153_v54  ;;  %v3596_v54 = vld [vmem:[%s5645_s26 + $0x10e] sm:$0xff] }
  0xe7   : > { %4938 = vmatmul.mubr.msk.f32.gmra.mrb[34].mxu1 %vm273_vm1, %v6326_v56  ;;  %5191 = vmatmul.mubr.msk.f32.gmra.mrb[16].mxu0 %vm273_vm1, %v3154_v58  ;;  %v3597_v58 = vld [vmem:[%s5645_s26 + $0x116] sm:$0xff] }
  0xe8   : > { %4942 = vmatprep.mubr.msk.f32.mxu1 %vm273_vm1, %v6086_v12  ;;  %5193 = vmatprep.mubr.msk.f32.mxu0 %vm273_vm1, %v3155_v60  ;;  %v3165_v12 = vld [vmem:[%s5645_s26 + $0x105] sm:$0xff] }
  0xe9   : > { %v1878_v60 = vld [vmem:[%s5645_s26 + $0x10b] sm:$0xff] }
  0xeb   : > { %4943 = vmatmul.mubr.msk.f32.vlgmr.msra.gmra.mrb[0].mxu1 %vm273_vm1, %v6096_v13  ;;  %5194 = vmatmul.mubr.msk.f32.gmra.mrb[18].mxu0 %vm273_vm1, %v3156_v62  ;;  %v3166_v13 = vld [vmem:[%s5645_s26 + $0x10d] sm:$0xff]  ;;  %v3598_v62 = vld [vmem:[%s5645_s26 + $0x11e] sm:$0xff] }
  0xec   : > { %5277 = vmatpush3.msk.msra.mxu1 %vm382_vm0, %v5623_v1  ;;  %4945 = vmatprep.mubr.msk.f32.mxu1 %vm273_vm1, %v6101_v14  ;;  %v3160_v1 = vld [vmem:[%s5645_s26 + $0xdd] sm:$0xff]  ;;  %v3167_v14 = vld [vmem:[%s5645_s26 + $0x115] sm:$0xff] }
  0xed   : > { %5196 = vmatprep.mubr.msk.f32.mxu0 %vm273_vm1, %v3157_v0  ;;  %v1879_v0 = vld [vmem:[%s5645_s26 + $0x113] sm:$0xff] }
  0xef   : > { %4946 = vmatmul.mubr.msk.f32.gmra.mrb[2].mxu1 %vm273_vm1, %v6114_v15  ;;  %5197 = vmatmul.mubr.msk.f32.gmra.mrb[20].mxu0 %vm273_vm1, %v3158_v3  ;;  %v3168_v15 = vld [vmem:[%s5645_s26 + $0x11d] sm:$0xff]  ;;  %v3599_v3 = vld [vmem:[%s5645_s26 + $0x126] sm:$0xff] }
  0xf0   : > { %4948 = vmatprep.mubr.msk.f32.mxu1 %vm273_vm1, %v6117_v16  ;;  %5199 = vmatprep.mubr.msk.f32.mxu0 %vm273_vm1, %v3159_v5  ;;  %v3169_v16 = vld [vmem:[%s5645_s26 + $0x125] sm:$0xff]  ;;  %v1880_v5 = vld [vmem:[%s5645_s26 + $0x11b] sm:$0xff] }
  0xf3   : > { %4949 = vmatmul.mubr.msk.f32.gmra.mrb[4].mxu1 %vm273_vm1, %v6128_v17  ;;  %5200 = vmatmul.mubr.msk.f32.gmra.mrb[22].mxu0 %vm273_vm1, %v3160_v1  ;;  %v3170_v17 = vld [vmem:[%s5645_s26 + $0x12d] sm:$0xff] }
  0xf4   : > { %4951 = vmatprep.mubr.msk.f32.mxu1 %vm273_vm1, %v6131_v18  ;;  %5202 = vmatprep.mubr.msk.f32.mxu0 %vm273_vm1, %v3161_v7  ;;  %v3171_v18 = vld [vmem:[%s5645_s26 + $0x135] sm:$0xff]  ;;  %v1881_v7 = vld [vmem:[%s5645_s26 + $0x123] sm:$0xff] }
  0xf5   : > { %v3600_v1 = vld [vmem:[%s5645_s26 + $0x12e] sm:$0xff] }
  0xf7   : > { %4952 = vmatmul.mubr.msk.f32.gmra.mrb[6].mxu1 %vm273_vm1, %v6142_v19  ;;  %5203 = vmatmul.mubr.msk.f32.gmra.mrb[24].mxu0 %vm273_vm1, %v3162_v8  ;;  %v3172_v19 = vld [vmem:[%s5645_s26 + $0x13d] sm:$0xff] }
  0xf8   : > { %4954 = vmatprep.mubr.msk.f32.mxu1 %vm273_vm1, %v6145_v20  ;;  %5205 = vmatprep.mubr.msk.f32.mxu0 %vm273_vm1, %v3163_v9  ;;  %v3567_v20 = vld [vmem:[%s5645_s26 + $0x26] sm:$0xff]  ;;  %v3601_v8 = vld [vmem:[%s5645_s26 + $0x136] sm:$0xff] }
  0xf9   : > { %v1882_v9 = vld [vmem:[%s5645_s26 + $0x12b] sm:$0xff] }
  0xfb   : > { %4955 = vmatmul.mubr.msk.f32.gmra.mrb[8].mxu1 %vm273_vm1, %v6156_v21  ;;  %5206 = vmatmul.mubr.msk.f32.gmra.mrb[26].mxu0 %vm273_vm1, %v3164_v10  ;;  %v3568_v21 = vld [vmem:[%s5645_s26 + $0x2e] sm:$0xff]  ;;  %v3602_v10 = vld [vmem:[%s5645_s26 + $0x13e] sm:$0xff] }
  0xfc   : > { %4957 = vmatprep.mubr.msk.f32.mxu1 %vm273_vm1, %v6159_v22  ;;  %5208 = vmatprep.mubr.msk.f32.mxu0 %vm273_vm1, %v3165_v12  ;;  %v3569_v22 = vld [vmem:[%s5645_s26 + $0x36] sm:$0xff] }
  0xff   : > { %4958 = vmatmul.mubr.msk.f32.gmra.mrb[10].mxu1 %vm273_vm1, %v6170_v23  ;;  %5209 = vmatmul.mubr.msk.f32.gmra.mrb[28].mxu0 %vm273_vm1, %v3166_v13  ;;  %v3570_v23 = vld [vmem:[%s5645_s26 + $0x3e] sm:$0xff] }
 0x100   : > { %4960 = vmatprep.mubr.msk.f32.mxu1 %vm273_vm1, %v6173_v24  ;;  %5211 = vmatprep.mubr.msk.f32.mxu0 %vm273_vm1, %v3167_v14  ;;  %v3571_v24 = vld [vmem:[%s5645_s26 + $0x46] sm:$0xff] }
 0x103   : > { %4961 = vmatmul.mubr.msk.f32.gmra.mrb[12].mxu1 %vm273_vm1, %v6184_v25  ;;  %5212 = vmatmul.mubr.msk.f32.gmra.mrb[30].mxu0 %vm273_vm1, %v3168_v15  ;;  %v3572_v25 = vld [vmem:[%s5645_s26 + $0x4e] sm:$0xff] }
 0x104   : > { %4963 = vmatprep.mubr.msk.f32.mxu1 %vm273_vm1, %v6187_v26  ;;  %5214 = vmatprep.mubr.msk.f32.mxu0 %vm273_vm1, %v3169_v16  ;;  %v3573_v26 = vld [vmem:[%s5645_s26 + $0x56] sm:$0xff] }
 0x107   : > { %4964 = vmatmul.mubr.msk.f32.gmra.mrb[14].mxu1 %vm273_vm1, %v6198_v11  ;;  %5215 = vmatmul.mubr.msk.f32.gmra.mrb[32].mxu0 %vm273_vm1, %v3170_v17  ;;  %v3575_v11 = vld [vmem:[%s5645_s26 + $0x66] sm:$0xff] }
 0x108   : > { %4966 = vmatprep.mubr.msk.f32.mxu1 %vm273_vm1, %v6202_v29  ;;  %5217 = vmatprep.mubr.msk.f32.mxu0 %vm273_vm1, %v3171_v18  ;;  %v3577_v29 = vld [vmem:[%s5645_s26 + $0x76] sm:$0xff] }
 0x10b   : > { %4967 = vmatmul.mubr.msk.f32.gmra.mrb[16].mxu1 %vm273_vm1, %v6212_v31  ;;  %5218 = vmatmul.mubr.msk.f32.gmra.mrb[34].mxu0 %vm273_vm1, %v3172_v19  ;;  %v3579_v31 = vld [vmem:[%s5645_s26 + $0x86] sm:$0xff] }
 0x10c   : > { %4969 = vmatprep.mubr.msk.f32.mxu1 %vm273_vm1, %v6216_v33  ;;  %5222 = vmatprep.mubr.msk.f32.mxu0 %vm273_vm1, %v3567_v20  ;;  %v3581_v33 = vld [vmem:[%s5645_s26 + $0x96] sm:$0xff] }
 0x10f   : > { %4970 = vmatmul.mubr.msk.f32.gmra.mrb[18].mxu1 %vm273_vm1, %v6227_v35  ;;  %5223 = vmatmul.mubr.msk.f32.vlgmr.msra.gmra.mrb[0].mxu0 %vm273_vm1, %v3568_v21  ;;  %v1451_v35 = vld [vmem:[%s5645_s26 + $0x122] sm:$0xff] }
 0x110   : > { %4972 = vmatprep.mubr.msk.f32.mxu1 %vm273_vm1, %v6232_v37  ;;  %5225 = vmatprep.mubr.msk.f32.mxu0 %vm273_vm1, %v3569_v22  ;;  %v1452_v37 = vld [vmem:[%s5645_s26 + $0x12a] sm:$0xff] }
 0x113   : > { %4973 = vmatmul.mubr.msk.f32.gmra.mrb[20].mxu1 %vm273_vm1, %v6242_v39  ;;  %5226 = vmatmul.mubr.msk.f32.gmra.mrb[2].mxu0 %vm273_vm1, %v3570_v23  ;;  %v1865_v39 = vld [vmem:[%s5645_s26 + $0xa3] sm:$0xff] }
 0x114   : > { %4975 = vmatprep.mubr.msk.f32.mxu1 %vm273_vm1, %v6246_v41  ;;  %5228 = vmatprep.mubr.msk.f32.mxu0 %vm273_vm1, %v3571_v24  ;;  %v1866_v41 = vld [vmem:[%s5645_s26 + $0xab] sm:$0xff] }
 0x117   : > { %4976 = vmatmul.mubr.msk.f32.gmra.mrb[22].mxu1 %vm273_vm1, %v6256_v43  ;;  %5229 = vmatmul.mubr.msk.f32.gmra.mrb[4].mxu0 %vm273_vm1, %v3572_v25  ;;  %v1867_v43 = vld [vmem:[%s5645_s26 + $0xb3] sm:$0xff] }
 0x118   : > { %4978 = vmatprep.mubr.msk.f32.mxu1 %vm273_vm1, %v6260_v45  ;;  %5231 = vmatprep.mubr.msk.f32.mxu0 %vm273_vm1, %v3573_v26  ;;  %v1868_v45 = vld [vmem:[%s5645_s26 + $0xbb] sm:$0xff] }
 0x11b   : > { %4979 = vmatmul.mubr.msk.f32.gmra.mrb[24].mxu1 %vm273_vm1, %v6270_v49  ;;  %5232 = vmatmul.mubr.msk.f32.gmra.mrb[6].mxu0 %vm273_vm1, %v3574_v27  ;;  %v1869_v49 = vld [vmem:[%s5645_s26 + $0xc3] sm:$0xff] }
 0x11c   : > { %4981 = vmatprep.mubr.msk.f32.mxu1 %vm273_vm1, %v6274_v53  ;;  %5234 = vmatprep.mubr.msk.f32.mxu0 %vm273_vm1, %v3575_v11  ;;  %v1870_v53 = vld [vmem:[%s5645_s26 + $0xcb] sm:$0xff] }
 0x11f   : > { %4982 = vmatmul.mubr.msk.f32.gmra.mrb[26].mxu1 %vm273_vm1, %v6284_v57  ;;  %5235 = vmatmul.mubr.msk.f32.gmra.mrb[8].mxu0 %vm273_vm1, %v3576_v28  ;;  %v1871_v57 = vld [vmem:[%s5645_s26 + $0xd3] sm:$0xff] }
 0x120   : > { %4984 = vmatprep.mubr.msk.f32.mxu1 %vm273_vm1, %v6288_v61  ;;  %5237 = vmatprep.mubr.msk.f32.mxu0 %vm273_vm1, %v3577_v29  ;;  %v1872_v61 = vld [vmem:[%s5645_s26 + $0xdb] sm:$0xff] }
 0x123   : > { %4985 = vmatmul.mubr.msk.f32.gmra.mrb[28].mxu1 %vm273_vm1, %v6298_v2  ;;  %5238 = vmatmul.mubr.msk.f32.gmra.mrb[10].mxu0 %vm273_vm1, %v3578_v30  ;;  %v1873_v2 = vld [vmem:[%s5645_s26 + $0xe3] sm:$0xff] }
 0x124   : > { %4987 = vmatprep.mubr.msk.f32.mxu1 %vm273_vm1, %v6302_v47  ;;  %5240 = vmatprep.mubr.msk.f32.mxu0 %vm273_vm1, %v3579_v31  ;;  %v1874_v47 = vld [vmem:[%s5645_s26 + $0xeb] sm:$0xff] }
 0x127   : > { %4988 = vmatmul.mubr.msk.f32.gmra.mrb[30].mxu1 %vm273_vm1, %v6312_v48  ;;  %5241 = vmatmul.mubr.msk.f32.gmra.mrb[12].mxu0 %vm273_vm1, %v3580_v32  ;;  %v1875_v48 = vld [vmem:[%s5645_s26 + $0xf3] sm:$0xff] }
 0x128   : > { %4990 = vmatprep.mubr.msk.f32.mxu1 %vm273_vm1, %v6316_v52  ;;  %5243 = vmatprep.mubr.msk.f32.mxu0 %vm273_vm1, %v3581_v33  ;;  %v1876_v52 = vld [vmem:[%s5645_s26 + $0xfb] sm:$0xff] }
 0x12b   : > { %4991 = vmatmul.mubr.msk.f32.gmra.mrb[32].mxu1 %vm273_vm1, %v6326_v56  ;;  %5244 = vmatmul.mubr.msk.f32.gmra.mrb[14].mxu0 %vm273_vm1, %v3582_v34  ;;  %v1877_v56 = vld [vmem:[%s5645_s26 + $0x103] sm:$0xff] }
 0x12c   : > { %4993 = vmatprep.mubr.msk.f32.mxu1 %vm273_vm1, %v1451_v35  ;;  %5246 = vmatprep.mubr.msk.f32.mxu0 %vm273_vm1, %v3583_v36 }
 0x12f   : > { %4994 = vmatmul.mubr.msk.f32.gmra.mrb[34].mxu1 %vm273_vm1, %v1452_v37  ;;  %5247 = vmatmul.mubr.msk.f32.gmra.mrb[16].mxu0 %vm273_vm1, %v3584_v38 }
 0x130   : > { %5025 = vmatprep.mubr.msk.f32.mxu1 %vm273_vm1, %v1865_v39  ;;  %5249 = vmatprep.mubr.msk.f32.mxu0 %vm273_vm1, %v3585_v40 }
 0x133   : > { %5026 = vmatmul.mubr.msk.f32.vlgmr.msra.gmra.mrb[18].mxu1 %vm273_vm1, %v1866_v41  ;;  %5250 = vmatmul.mubr.msk.f32.gmra.mrb[18].mxu0 %vm273_vm1, %v3586_v42 }
 0x134   : > { %5028 = vmatprep.mubr.msk.f32.mxu1 %vm273_vm1, %v1867_v43  ;;  %5252 = vmatprep.mubr.msk.f32.mxu0 %vm273_vm1, %v3587_v44 }
 0x137   : > { %5029 = vmatmul.mubr.msk.f32.gmra.mrb[20].mxu1 %vm273_vm1, %v1868_v45  ;;  %5253 = vmatmul.mubr.msk.f32.gmra.mrb[20].mxu0 %vm273_vm1, %v3588_v46 }
 0x138   : > { %5031 = vmatprep.mubr.msk.f32.mxu1 %vm273_vm1, %v1869_v49  ;;  %5255 = vmatprep.mubr.msk.f32.mxu0 %vm273_vm1, %v3589_v51 }
 0x13b   : > { %5032 = vmatmul.mubr.msk.f32.gmra.mrb[22].mxu1 %vm273_vm1, %v1870_v53  ;;  %5256 = vmatmul.mubr.msk.f32.gmra.mrb[22].mxu0 %vm273_vm1, %v3590_v55 }
 0x13c   : > { %5034 = vmatprep.mubr.msk.f32.mxu1 %vm273_vm1, %v1871_v57  ;;  %5258 = vmatprep.mubr.msk.f32.mxu0 %vm273_vm1, %v3591_v59 }
 0x13f   : > { %5035 = vmatmul.mubr.msk.f32.gmra.mrb[24].mxu1 %vm273_vm1, %v1872_v61  ;;  %5259 = vmatmul.mubr.msk.f32.gmra.mrb[24].mxu0 %vm273_vm1, %v3592_v63 }
 0x140   : > { %5037 = vmatprep.mubr.msk.f32.mxu1 %vm273_vm1, %v1873_v2  ;;  %5261 = vmatprep.mubr.msk.f32.mxu0 %vm273_vm1, %v3593_v4 }
 0x143   : > { %5038 = vmatmul.mubr.msk.f32.gmra.mrb[26].mxu1 %vm273_vm1, %v1874_v47  ;;  %5262 = vmatmul.mubr.msk.f32.gmra.mrb[26].mxu0 %vm273_vm1, %v3594_v6 }
 0x144   : > { %5040 = vmatprep.mubr.msk.f32.mxu1 %vm273_vm1, %v1875_v48  ;;  %5264 = vmatprep.mubr.msk.f32.mxu0 %vm273_vm1, %v3595_v50 }
 0x147   : > { %5041 = vmatmul.mubr.msk.f32.gmra.mrb[28].mxu1 %vm273_vm1, %v1876_v52  ;;  %5265 = vmatmul.mubr.msk.f32.gmra.mrb[28].mxu0 %vm273_vm1, %v3596_v54 }
 0x148   : > { %5043 = vmatprep.mubr.msk.f32.mxu1 %vm273_vm1, %v1877_v56  ;;  %5267 = vmatprep.mubr.msk.f32.mxu0 %vm273_vm1, %v3597_v58 }
 0x14b   : > { %5044 = vmatmul.mubr.msk.f32.gmra.mrb[30].mxu1 %vm273_vm1, %v1878_v60  ;;  %5268 = vmatmul.mubr.msk.f32.gmra.mrb[30].mxu0 %vm273_vm1, %v3598_v62 }
 0x14c   : > { %5046 = vmatprep.mubr.msk.f32.mxu1 %vm273_vm1, %v1879_v0  ;;  %5270 = vmatprep.mubr.msk.f32.mxu0 %vm273_vm1, %v3599_v3 }
 0x14f   : > { %5047 = vmatmul.mubr.msk.f32.gmra.mrb[32].mxu1 %vm273_vm1, %v1880_v5  ;;  %5271 = vmatmul.mubr.msk.f32.gmra.mrb[32].mxu0 %vm273_vm1, %v3600_v1 }
 0x150   : > { %5049 = vmatprep.mubr.msk.f32.mxu1 %vm273_vm1, %v1881_v7  ;;  %5273 = vmatprep.mubr.msk.f32.mxu0 %vm273_vm1, %v3601_v8 }
 0x153   : > { %5050 = vmatmul.mubr.msk.f32.gmra.mrb[34].mxu1 %vm273_vm1, %v1882_v9  ;;  %5274 = vmatmul.mubr.msk.f32.gmra.mrb[34].mxu0 %vm273_vm1, %v3602_v10 }
 0x1be   : > { %v4944_v12 = vpop.f32.mrb[0].mxu1 }
 0x1bf   : > { %v1632_v13 = vpop.f32.mrb[1].mxu1 }
 0x1c2   : > { %v4947_v14 = vpop.f32.mrb[2].mxu1 }
 0x1c3   : > { %v1642_v15 = vpop.f32.mrb[3].mxu1 }
 0x1c6   : > { %v4950_v16 = vpop.f32.mrb[4].mxu1 }
 0x1c7   : > { %v1652_v17 = vpop.f32.mrb[5].mxu1 }
 0x1ca   : > { %v4953_v18 = vpop.f32.mrb[6].mxu1 }
 0x1cb   : > { %v1662_v19 = vpop.f32.mrb[7].mxu1 }
 0x1ce   : > { %v4956_v20 = vpop.f32.mrb[8].mxu1 }
 0x1cf   : > { %v1672_v21 = vpop.f32.mrb[9].mxu1 }
 0x1d2   : > { %v4959_v22 = vpop.f32.mrb[10].mxu1 }
 0x1d3   : > { %v1682_v23 = vpop.f32.mrb[11].mxu1 }
 0x1d6   : > { %v4962_v24 = vpop.f32.mrb[12].mxu1 }
 0x1d7   : > { %v1692_v25 = vpop.f32.mrb[13].mxu1 }
 0x1da   : > { %v4965_v26 = vpop.f32.mrb[14].mxu1 }
 0x1db   : > { %v1702_v27 = vpop.f32.mrb[15].mxu1 }
 0x1de   : > { %v4968_v11 = vpop.f32.mrb[16].mxu1 }
 0x1df   : > { %v1712_v28 = vpop.f32.mrb[17].mxu1 }
 0x1e2   : > { %v5224_v29 = vpop.f32.mrb[0].mxu0 }
 0x1e3   : > { %v5278_v30 = vadd.f32 %v5224_v29, %v4944_v12  ;;  %v3782_v31 = vpop.f32.mrb[1].mxu0 }
 0x1e4   : > { %v5279_v32 = vadd.f32 %v3782_v31, %v1632_v13 }
 0x1e5   : > { %3999 = vst.msk [vmem:[%s6554_s14 + $0x8] sm:$0xff] %vm3997_vm2, %v5278_v30 }
 0x1e6   : > { %3998 = vst.msk [vmem:[%s6554_s14] sm:$0xff] %vm3997_vm2, %v5279_v32  ;;  %v5227_v33 = vpop.f32.mrb[2].mxu0 }
 0x1e7   : > { %v5280_v34 = vadd.f32 %v5227_v33, %v4947_v14  ;;  %v3792_v35 = vpop.f32.mrb[3].mxu0 }
 0x1e8   : > { %v5281_v36 = vadd.f32 %v3792_v35, %v1642_v15 }
 0x1e9   : > { %4001 = vst.msk [vmem:[%s6554_s14 + $0x18] sm:$0xff] %vm3997_vm2, %v5280_v34 }
 0x1ea   : > { %4000 = vst.msk [vmem:[%s6554_s14 + $0x10] sm:$0xff] %vm3997_vm2, %v5281_v36  ;;  %v5230_v37 = vpop.f32.mrb[4].mxu0 }
 0x1eb   : > { %v5282_v38 = vadd.f32 %v5230_v37, %v4950_v16  ;;  %v3802_v39 = vpop.f32.mrb[5].mxu0 }
 0x1ec   : > { %v5283_v40 = vadd.f32 %v3802_v39, %v1652_v17 }
 0x1ed   : > { %4003 = vst.msk [vmem:[%s6554_s14 + $0x28] sm:$0xff] %vm3997_vm2, %v5282_v38 }
 0x1ee   : > { %4002 = vst.msk [vmem:[%s6554_s14 + $0x20] sm:$0xff] %vm3997_vm2, %v5283_v40  ;;  %v5233_v41 = vpop.f32.mrb[6].mxu0 }
 0x1ef   : > { %v5284_v42 = vadd.f32 %v5233_v41, %v4953_v18  ;;  %v3812_v43 = vpop.f32.mrb[7].mxu0 }
 0x1f0   : > { %v5285_v44 = vadd.f32 %v3812_v43, %v1662_v19 }
 0x1f1   : > { %4005 = vst.msk [vmem:[%s6554_s14 + $0x38] sm:$0xff] %vm3997_vm2, %v5284_v42 }
 0x1f2   : > { %4004 = vst.msk [vmem:[%s6554_s14 + $0x30] sm:$0xff] %vm3997_vm2, %v5285_v44  ;;  %v5236_v45 = vpop.f32.mrb[8].mxu0 }
 0x1f3   : > { %v5286_v46 = vadd.f32 %v5236_v45, %v4956_v20  ;;  %v3822_v49 = vpop.f32.mrb[9].mxu0 }
 0x1f4   : > { %v5287_v51 = vadd.f32 %v3822_v49, %v1672_v21 }
 0x1f5   : > { %4007 = vst.msk [vmem:[%s6554_s14 + $0x48] sm:$0xff] %vm3997_vm2, %v5286_v46 }
 0x1f6   : > { %4006 = vst.msk [vmem:[%s6554_s14 + $0x40] sm:$0xff] %vm3997_vm2, %v5287_v51  ;;  %v5239_v53 = vpop.f32.mrb[10].mxu0 }
 0x1f7   : > { %v5288_v55 = vadd.f32 %v5239_v53, %v4959_v22  ;;  %v3832_v57 = vpop.f32.mrb[11].mxu0 }
 0x1f8   : > { %v5289_v59 = vadd.f32 %v3832_v57, %v1682_v23 }
 0x1f9   : > { %4009 = vst.msk [vmem:[%s6554_s14 + $0x58] sm:$0xff] %vm3997_vm2, %v5288_v55 }
 0x1fa   : > { %4008 = vst.msk [vmem:[%s6554_s14 + $0x50] sm:$0xff] %vm3997_vm2, %v5289_v59  ;;  %v5242_v61 = vpop.f32.mrb[12].mxu0 }
 0x1fb   : > { %v5290_v63 = vadd.f32 %v5242_v61, %v4962_v24  ;;  %v3842_v2 = vpop.f32.mrb[13].mxu0 }
 0x1fc   : > { %v5291_v4 = vadd.f32 %v3842_v2, %v1692_v25 }
 0x1fd   : > { %4011 = vst.msk [vmem:[%s6554_s14 + $0x68] sm:$0xff] %vm3997_vm2, %v5290_v63 }
 0x1fe   : > { %4010 = vst.msk [vmem:[%s6554_s14 + $0x60] sm:$0xff] %vm3997_vm2, %v5291_v4  ;;  %v5245_v47 = vpop.f32.mrb[14].mxu0 }
 0x1ff   : > { %v5292_v6 = vadd.f32 %v5245_v47, %v4965_v26  ;;  %v3852_v48 = vpop.f32.mrb[15].mxu0 }
 0x200   : > { %v5293_v50 = vadd.f32 %v3852_v48, %v1702_v27 }
 0x201   : > { %4013 = vst.msk [vmem:[%s6554_s14 + $0x78] sm:$0xff] %vm3997_vm2, %v5292_v6 }
 0x202   : > { %4012 = vst.msk [vmem:[%s6554_s14 + $0x70] sm:$0xff] %vm3997_vm2, %v5293_v50  ;;  %v5248_v52 = vpop.f32.mrb[16].mxu0 }
 0x203   : > { %v5294_v54 = vadd.f32 %v5248_v52, %v4968_v11  ;;  %v3862_v56 = vpop.f32.mrb[17].mxu0 }
 0x204   : > { %v5295_v58 = vadd.f32 %v3862_v56, %v1712_v28 }
 0x205   : > { %4015 = vst.msk [vmem:[%s6554_s14 + $0x88] sm:$0xff] %vm3997_vm2, %v5294_v54 }
 0x206   : > { %4014 = vst.msk [vmem:[%s6554_s14 + $0x80] sm:$0xff] %vm3997_vm2, %v5295_v58  ;;  %v5027_v60 = vpop.f32.mrb[18].mxu1  ;;  %v5251_v62 = vpop.f32.mrb[18].mxu0 }
 0x207   : > { %v5296_v0 = vadd.f32 %v5251_v62, %v5027_v60  ;;  %v2152_v3 = vpop.f32.mrb[19].mxu1  ;;  %v3872_v5 = vpop.f32.mrb[19].mxu0 }
 0x208   : > { %v5297_v1 = vadd.f32 %v3872_v5, %v2152_v3 }
 0x209   : > { %4017 = vst.msk [vmem:[%s6554_s14 + $0x98] sm:$0xff] %vm3997_vm2, %v5296_v0 }
 0x20a   : > { %4016 = vst.msk [vmem:[%s6554_s14 + $0x90] sm:$0xff] %vm3997_vm2, %v5297_v1  ;;  %v5030_v7 = vpop.f32.mrb[20].mxu1  ;;  %v5254_v8 = vpop.f32.mrb[20].mxu0 }
 0x20b   : > { %v5298_v9 = vadd.f32 %v5254_v8, %v5030_v7  ;;  %v2162_v10 = vpop.f32.mrb[21].mxu1  ;;  %v3882_v12 = vpop.f32.mrb[21].mxu0 }
 0x20c   : > { %v5299_v13 = vadd.f32 %v3882_v12, %v2162_v10 }
 0x20d   : > { %4019 = vst.msk [vmem:[%s6554_s14 + $0xa8] sm:$0xff] %vm3997_vm2, %v5298_v9 }
 0x20e   : > { %4018 = vst.msk [vmem:[%s6554_s14 + $0xa0] sm:$0xff] %vm3997_vm2, %v5299_v13  ;;  %v5033_v14 = vpop.f32.mrb[22].mxu1  ;;  %v5257_v15 = vpop.f32.mrb[22].mxu0 }
 0x20f   : > { %v5300_v16 = vadd.f32 %v5257_v15, %v5033_v14  ;;  %v2172_v17 = vpop.f32.mrb[23].mxu1  ;;  %v3892_v18 = vpop.f32.mrb[23].mxu0 }
 0x210   : > { %v5301_v19 = vadd.f32 %v3892_v18, %v2172_v17 }
 0x211   : > { %4021 = vst.msk [vmem:[%s6554_s14 + $0xb8] sm:$0xff] %vm3997_vm2, %v5300_v16 }
 0x212   : > { %4020 = vst.msk [vmem:[%s6554_s14 + $0xb0] sm:$0xff] %vm3997_vm2, %v5301_v19  ;;  %v5036_v20 = vpop.f32.mrb[24].mxu1  ;;  %v5260_v21 = vpop.f32.mrb[24].mxu0 }
 0x213   : > { %v5302_v22 = vadd.f32 %v5260_v21, %v5036_v20  ;;  %v2182_v23 = vpop.f32.mrb[25].mxu1  ;;  %v3902_v24 = vpop.f32.mrb[25].mxu0 }
 0x214   : > { %v5303_v25 = vadd.f32 %v3902_v24, %v2182_v23 }
 0x215   : > { %4023 = vst.msk [vmem:[%s6554_s14 + $0xc8] sm:$0xff] %vm3997_vm2, %v5302_v22 }
 0x216   : > { %4022 = vst.msk [vmem:[%s6554_s14 + $0xc0] sm:$0xff] %vm3997_vm2, %v5303_v25  ;;  %v5039_v26 = vpop.f32.mrb[26].mxu1  ;;  %v5263_v27 = vpop.f32.mrb[26].mxu0 }
 0x217   : > { %v5304_v11 = vadd.f32 %v5263_v27, %v5039_v26  ;;  %v2192_v28 = vpop.f32.mrb[27].mxu1  ;;  %v3912_v29 = vpop.f32.mrb[27].mxu0 }
 0x218   : > { %v5305_v30 = vadd.f32 %v3912_v29, %v2192_v28 }
 0x219   : > { %4025 = vst.msk [vmem:[%s6554_s14 + $0xd8] sm:$0xff] %vm3997_vm2, %v5304_v11 }
 0x21a   : > { %4024 = vst.msk [vmem:[%s6554_s14 + $0xd0] sm:$0xff] %vm3997_vm2, %v5305_v30  ;;  %v5042_v31 = vpop.f32.mrb[28].mxu1  ;;  %v5266_v32 = vpop.f32.mrb[28].mxu0 }
 0x21b   : > { %v5306_v33 = vadd.f32 %v5266_v32, %v5042_v31  ;;  %v2202_v34 = vpop.f32.mrb[29].mxu1  ;;  %v3922_v35 = vpop.f32.mrb[29].mxu0 }
 0x21c   : > { %v5307_v36 = vadd.f32 %v3922_v35, %v2202_v34 }
 0x21d   : > { %4027 = vst.msk [vmem:[%s6554_s14 + $0xe8] sm:$0xff] %vm3997_vm2, %v5306_v33 }
 0x21e   : > { %4026 = vst.msk [vmem:[%s6554_s14 + $0xe0] sm:$0xff] %vm3997_vm2, %v5307_v36  ;;  %v5045_v37 = vpop.f32.mrb[30].mxu1  ;;  %v5269_v38 = vpop.f32.mrb[30].mxu0 }
 0x21f   : > { %v5308_v39 = vadd.f32 %v5269_v38, %v5045_v37  ;;  %v2212_v40 = vpop.f32.mrb[31].mxu1  ;;  %v3932_v41 = vpop.f32.mrb[31].mxu0 }
 0x220   : > { %v5309_v42 = vadd.f32 %v3932_v41, %v2212_v40 }
 0x221   : > { %4029 = vst.msk [vmem:[%s6554_s14 + $0xf8] sm:$0xff] %vm3997_vm2, %v5308_v39 }
 0x222   : > { %4028 = vst.msk [vmem:[%s6554_s14 + $0xf0] sm:$0xff] %vm3997_vm2, %v5309_v42  ;;  %v5048_v43 = vpop.f32.mrb[32].mxu1  ;;  %v5272_v44 = vpop.f32.mrb[32].mxu0 }
 0x223   : > { %v5310_v45 = vadd.f32 %v5272_v44, %v5048_v43  ;;  %v2222_v46 = vpop.f32.mrb[33].mxu1  ;;  %v3942_v49 = vpop.f32.mrb[33].mxu0 }
 0x224   : > { %v5311_v51 = vadd.f32 %v3942_v49, %v2222_v46 }
 0x225   : > { %4031 = vst.msk [vmem:[%s6554_s14 + $0x108] sm:$0xff] %vm3997_vm2, %v5310_v45 }
 0x226   : > { %4030 = vst.msk [vmem:[%s6554_s14 + $0x100] sm:$0xff] %vm3997_vm2, %v5311_v51  ;;  %v5051_v53 = vpop.f32.mrb[34].mxu1  ;;  %v5275_v55 = vpop.f32.mrb[34].mxu0 }
 0x227   : > { %v5312_v57 = vadd.f32 %v5275_v55, %v5051_v53  ;;  %v2232_v59 = vpop.f32.mrb[35].mxu1  ;;  %v3952_v61 = vpop.f32.mrb[35].mxu0 }
 0x228   : > { %v5313_v63 = vadd.f32 %v3952_v61, %v2232_v59 }
 0x229   : > { %4033 = vst.msk [vmem:[%s6554_s14 + $0x118] sm:$0xff] %vm3997_vm2, %v5312_v57 }
 0x22a   : > { %4032 = vst.msk [vmem:[%s6554_s14 + $0x110] sm:$0xff] %vm3997_vm2, %v5313_v63 }
 0x22b PF: > { %s14_s15 = sadd.s32 1, %s5582_s15  }
 0x22c   : > { %p11_p4 = scmp.ge.s32.totalorder %s14_s15, 4  }
 0x22e   :  { %13 = sbr.rel (!%p11_p4) target bundleno = 1 (0x1), region = 74 }

// kernel: resnet_v2_forward.19
= control target key start
LH: loop header
LB: loop body
LE: loop exit
PB: predicated region body
PF: predicated region fallthrough
CT: control target
= control target key end

     0   :  { %s56_s0 = inlined_call_operand.vmem [shape: f32[16,128], index: 0, kind: input, shape index: {}]   ;;  %s57_s1 = inlined_call_operand.vmem [shape: f32[16,128], index: 1, kind: input, shape index: {}]   ;;  %s58_s2 = inlined_call_operand.vmem [shape: f32[16,128], index: 2, kind: output, shape index: {}]  }
   0x1   :  { %v11_v0 = vld [vmem:[%s56_s0] sm:$0xff]  ;;  %v12_v2 = vld [vmem:[%s56_s0 + $0x8] sm:$0xff] }
   0x2   :  { %v13_v1 = vld [vmem:[%s57_s1] sm:$0xff]  ;;  %v14_v4 = vld [vmem:[%s57_s1 + $0x8] sm:$0xff] }
   0x3   :  { %v15_v3 = vadd.f32 %v13_v1, %v11_v0  ;;  %v16_v5 = vadd.f32 %v14_v4, %v12_v2 }
   0x5   :  { %17 = vst [vmem:[%s58_s2] sm:$0xff] %v15_v3  ;;  %18 = vst [vmem:[%s58_s2 + $0x8] sm:$0xff] %v16_v5 }

// kernel: resnet_v2_forward.17
= control target key start
LH: loop header
LB: loop body
LE: loop exit
PB: predicated region body
PF: predicated region fallthrough
CT: control target
= control target key end

     0   :  { %s2356_s15 = smov 0   ;;  %s2629_s0 = inlined_call_operand.vmem [shape: f32[1,2,110,16], index: 0, kind: input, shape index: {}]   ;;  %s2630_s1 = inlined_call_operand.vmem [shape: f32[9,16,16], index: 1, kind: input, shape index: {}]   ;;  %s2631_s2 = inlined_call_operand.vmem [shape: f32[1,16], index: 2, kind: input, shape index: {}]   ;;  %s2632_s3 = inlined_call_operand.vmem [shape: f32[1,16], index: 3, kind: input, shape index: {}]   ;;  %s2633_s4 = inlined_call_operand.vmem [shape: f32[2,80,16], index: 4, kind: output, shape index: {}]  }
   0x1 LB: > { %s1799_s16 = sadd.s32 4294967295, %s2329_s15   ;;  %p1803_p0 = scmp.ge.s32.totalorder %s2329_s15, 1  ;;  %s2329_s15 = sphi %s2356_s15, %s14_s15  }
   0x2   : > { %p162_p1 = scmp.lt.s32.totalorder %s2329_s15, 3 }
   0x4   : > { %p163_p2 = pnand %p1803_p0, %p162_p1 }
   0x5   : > { %v1852_v0 = vld [vmem:[%s2630_s1 + $0x40] sm:$0xff] (!%p163_p2)  ;;  %v1853_v1 = vld [vmem:[%s2630_s1 + $0x48] sm:$0xff] (!%p163_p2)  ;;  %v1806_v2 = vld [vmem:[%s2630_s1 + $0x10] sm:$0xff] (!%p163_p2)  ;;  %p188_p3 = scmp.lt.s32.totalorder (!%p163_p2), %s1799_s16, 1  ;;  %vm223_vm0 = vcmask (!%p163_p2), 130048  }
   0x6   : > { %166 = sbr.rel (%p163_p2) target bundleno = 329 (0x149), region = 36  ;;  %v2373_v3 = vpack.c.bf16 (!%p163_p2), %v1853_v1, %v1852_v0  ;;  %v1807_v4 = vld [vmem:[%s2630_s1 + $0x18] sm:$0xff] (!%p163_p2)  ;;  %v1864_v5 = vld [vmem:[%s2630_s1 + $0x50] sm:$0xff] (!%p163_p2)  ;;  %v208_v9 = vld [vmem:[%s2630_s1] sm:$0xff] (!%p163_p2) }
   0x7   : > { %v1865_v6 = vld [vmem:[%s2630_s1 + $0x58] sm:$0xff] (!%p163_p2)  ;;  %v2195_v7 = vpack.c.bf16 (!%p163_p2), %v1807_v4, %v1806_v2  ;;  %v209_v10 = vld [vmem:[%s2630_s1 + $0x8] sm:$0xff] (!%p163_p2)  ;;  %v1876_v12 = vld [vmem:[%s2630_s1 + $0x60] sm:$0xff] (!%p163_p2) }
   0x8   : > { %v2215_v8 = vpack.c.bf16 (!%p163_p2), %v1865_v6, %v1864_v5  ;;  %2212 = vmatprep.subr.bf16.mxu0 (!%p163_p2), %v2373_v3  ;;  %v2199_v11 = vpack.c.bf16 (!%p163_p2), %v209_v10, %v208_v9  ;;  %v1877_v13 = vld [vmem:[%s2630_s1 + $0x68] sm:$0xff] (!%p163_p2)  ;;  %v1828_v14 = vld [vmem:[%s2630_s1 + $0x20] sm:$0xff] (!%p163_p2)  ;;  %v1888_v32 = vld [vmem:[%s2630_s1 + $0x70] sm:$0xff] (!%p163_p2) }
   0x9   : > { %2196 = vmatprep.subr.bf16.mxu1 (!%p163_p2), %v2195_v7  ;;  %2214 = vmatpush3.bf16.msra.mxu0 (!%p163_p2), %v2373_v3  ;;  %v1829_v15 = vld [vmem:[%s2630_s1 + $0x28] sm:$0xff] (!%p163_p2)  ;;  %v2219_v22 = vpack.c.bf16 (!%p163_p2), %v1877_v13, %v1876_v12  ;;  %v1889_v33 = vld [vmem:[%s2630_s1 + $0x78] sm:$0xff] (!%p163_p2)  ;;  %v1840_v43 = vld [vmem:[%s2630_s1 + $0x30] sm:$0xff] (!%p163_p2) }
   0xa   : > { %2198 = vmatpush3.bf16.msra.mxu1 (!%p163_p2), %v2195_v7  ;;  %2216 = vmatprep.subr.bf16.mxu0 (!%p163_p2), %v2215_v8  ;;  %v2203_v23 = vpack.c.bf16 (!%p163_p2), %v1829_v15, %v1828_v14  ;;  %v2223_v37 = vpack.c.bf16 (!%p163_p2), %v1889_v33, %v1888_v32  ;;  %v1841_v44 = vld [vmem:[%s2630_s1 + $0x38] sm:$0xff] (!%p163_p2)  ;;  %v1900_v57 = vld [vmem:[%s2630_s1 + $0x80] sm:$0xff] (!%p163_p2)  ;;  %v1901_v58 = vld [vmem:[%s2630_s1 + $0x88] sm:$0xff] (!%p163_p2) }
   0xb   : > { %2200 = vmatprep.subr.bf16.mxu1 (!%p163_p2), %v2199_v11  ;;  %v2207_v49 = vpack.c.bf16 (!%p163_p2), %v1841_v44, %v1840_v43  ;;  %v2227_v61 = vpack.c.bf16 (!%p163_p2), %v1901_v58, %v1900_v57 }
   0xd   : > { %s2635_s16 = smov (!%p188_p3, %s1799_s16), 1 }
   0xe   : > { %s2313_s7 = smul.u32 112, %s2635_s16 }
   0xf   : > { %s2314_s9 = smul.u32 80, %s2635_s16 }
  0x10   : > { %s2410_s20 = scalar_lea.vmem %s2629_s0, %s2313_s7 }
  0x11   : > { %v210_v16 = vld [vmem:[%s2410_s20 + $0x1] sm:$0xff]  ;;  %v850_v17 = vld [vmem:[%s2410_s20 + $0xb] sm:$0xff]  ;;  %v851_v19 = vld [vmem:[%s2410_s20 + $0x13] sm:$0xff]  ;;  %s2604_s14 = scalar_lea.vmem %s2633_s4, %s2314_s9 }
  0x12   : > { %v211_v18 = vld [vmem:[%s2410_s20 + $0x9] sm:$0xff]  ;;  %2028 = vmatprep.mubr.msk.f32.mxu1 %vm223_vm0, %v210_v16  ;;  %2104 = vmatprep.mubr.msk.f32.mxu0 %vm223_vm0, %v850_v17  ;;  %v212_v20 = vld [vmem:[%s2410_s20 + $0x11] sm:$0xff]  ;;  %v852_v21 = vld [vmem:[%s2410_s20 + $0x1b] sm:$0xff] }
  0x13   : > { %2029 = vmatmul.mubr.msk.f32.vlgmr.msra.gmra.mrb[0].mxu1 %vm223_vm0, %v211_v18  ;;  %2105 = vmatmul.mubr.msk.f32.vlgmr.msra.gmra.mrb[0].mxu0 %vm223_vm0, %v851_v19  ;;  %v213_v24 = vld [vmem:[%s2410_s20 + $0x19] sm:$0xff]  ;;  %v853_v25 = vld [vmem:[%s2410_s20 + $0x23] sm:$0xff]  ;;  %v854_v27 = vld [vmem:[%s2410_s20 + $0x2b] sm:$0xff] }
  0x14   : > { %2218 = vmatpush3.bf16.msra.mxu0 %v2215_v8  ;;  %2031 = vmatprep.mubr.msk.f32.mxu1 %vm223_vm0, %v212_v20  ;;  %v214_v26 = vld [vmem:[%s2410_s20 + $0x21] sm:$0xff]  ;;  %v215_v28 = vld [vmem:[%s2410_s20 + $0x29] sm:$0xff]  ;;  %v855_v29 = vld [vmem:[%s2410_s20 + $0x33] sm:$0xff] }
  0x15   : > { %2107 = vmatprep.mubr.msk.f32.mxu0 %vm223_vm0, %v852_v21  ;;  %2202 = vmatpush3.bf16.msra.mxu1 %v2199_v11  ;;  %v216_v30 = vld [vmem:[%s2410_s20 + $0x31] sm:$0xff]  ;;  %v217_v34 = vld [vmem:[%s2410_s20 + $0x39] sm:$0xff]  ;;  %v218_v36 = vld [vmem:[%s2410_s20 + $0x41] sm:$0xff] }
  0x16   : > { %2220 = vmatprep.subr.bf16.mxu0 %v2219_v22  ;;  %2204 = vmatprep.subr.bf16.mxu1 %v2203_v23  ;;  %v1018_v31 = vld [vmem:[%s2410_s20 + $0xc] sm:$0xff]  ;;  %v1019_v35 = vld [vmem:[%s2410_s20 + $0x14] sm:$0xff]  ;;  %v1020_v38 = vld [vmem:[%s2410_s20 + $0x1c] sm:$0xff] }
  0x17   : > { %2032 = vmatmul.mubr.msk.f32.gmra.mrb[2].mxu1 %vm223_vm0, %v213_v24  ;;  %2108 = vmatmul.mubr.msk.f32.gmra.mrb[2].mxu0 %vm223_vm0, %v853_v25  ;;  %v219_v39 = vld [vmem:[%s2410_s20 + $0x49] sm:$0xff]  ;;  %v198_v41 = vld [vmem:[%s2410_s20] sm:$0xff]  ;;  %v1023_v46 = vld [vmem:[%s2410_s20 + $0x34] sm:$0xff] }
  0x18   : > { %2034 = vmatprep.mubr.msk.f32.mxu1 %vm223_vm0, %v214_v26  ;;  %2110 = vmatprep.mubr.msk.f32.mxu0 %vm223_vm0, %v854_v27  ;;  %v1021_v40 = vld [vmem:[%s2410_s20 + $0x24] sm:$0xff]  ;;  %v1022_v42 = vld [vmem:[%s2410_s20 + $0x2c] sm:$0xff]  ;;  %v1024_v48 = vld [vmem:[%s2410_s20 + $0x3c] sm:$0xff] }
  0x19   : > { %v199_v45 = vld [vmem:[%s2410_s20 + $0x8] sm:$0xff]  ;;  %v200_v47 = vld [vmem:[%s2410_s20 + $0x10] sm:$0xff]  ;;  %v201_v50 = vld [vmem:[%s2410_s20 + $0x18] sm:$0xff] }
  0x1a   : > { %v1025_v51 = vld [vmem:[%s2410_s20 + $0x44] sm:$0xff]  ;;  %v1026_v53 = vld [vmem:[%s2410_s20 + $0x4c] sm:$0xff]  ;;  %v1027_v55 = vld [vmem:[%s2410_s20 + $0x54] sm:$0xff] }
  0x1b   : > { %2035 = vmatmul.mubr.msk.f32.gmra.mrb[4].mxu1 %vm223_vm0, %v215_v28  ;;  %2111 = vmatmul.mubr.msk.f32.gmra.mrb[4].mxu0 %vm223_vm0, %v855_v29  ;;  %v202_v52 = vld [vmem:[%s2410_s20 + $0x20] sm:$0xff]  ;;  %v203_v54 = vld [vmem:[%s2410_s20 + $0x28] sm:$0xff]  ;;  %v204_v56 = vld [vmem:[%s2410_s20 + $0x30] sm:$0xff] }
  0x1c   : > { %2037 = vmatprep.mubr.msk.f32.mxu1 %vm223_vm0, %v216_v30  ;;  %2123 = vmatprep.mubr.msk.f32.mxu0 %vm223_vm0, %v1018_v31  ;;  %v205_v59 = vld [vmem:[%s2410_s20 + $0x38] sm:$0xff]  ;;  %v206_v60 = vld [vmem:[%s2410_s20 + $0x40] sm:$0xff]  ;;  %v207_v62 = vld [vmem:[%s2410_s20 + $0x48] sm:$0xff] }
  0x1d   : > { %v514_v63 = vld [vmem:[%s2410_s20 + $0x2] sm:$0xff]  ;;  %v515_v0 = vld [vmem:[%s2410_s20 + $0xa] sm:$0xff]  ;;  %v516_v1 = vld [vmem:[%s2410_s20 + $0x12] sm:$0xff] }
  0x1e   : > { %v517_v2 = vld [vmem:[%s2410_s20 + $0x1a] sm:$0xff]  ;;  %v518_v4 = vld [vmem:[%s2410_s20 + $0x22] sm:$0xff]  ;;  %v519_v5 = vld [vmem:[%s2410_s20 + $0x2a] sm:$0xff] }
  0x1f   : > { %2038 = vmatmul.mubr.msk.f32.gmra.mrb[6].mxu1 %vm223_vm0, %v217_v34  ;;  %2124 = vmatmul.mubr.msk.f32.vlgmr.msra.gmra.mrb[0].mxu0 %vm223_vm0, %v1019_v35  ;;  %v1195_v6 = vld [vmem:[%s2410_s20 + $0x5c] sm:$0xff]  ;;  %v520_v7 = vld [vmem:[%s2410_s20 + $0x32] sm:$0xff]  ;;  %v1356_v12 = vld [vmem:[%s2410_s20 + $0x25] sm:$0xff] }
  0x20   : > { %2222 = vmatpush3.bf16.msra.mxu0 %v2219_v22  ;;  %2040 = vmatprep.mubr.msk.f32.mxu1 %vm223_vm0, %v218_v36  ;;  %v1354_v8 = vld [vmem:[%s2410_s20 + $0x15] sm:$0xff]  ;;  %v1355_v10 = vld [vmem:[%s2410_s20 + $0x1d] sm:$0xff]  ;;  %v523_v13 = vld [vmem:[%s2410_s20 + $0x4a] sm:$0xff] }
  0x21   : > { %2126 = vmatprep.mubr.msk.f32.mxu0 %vm223_vm0, %v1020_v38  ;;  %2224 = vmatprep.subr.bf16.mxu0 %v2223_v37  ;;  %v521_v9 = vld [vmem:[%s2410_s20 + $0x3a] sm:$0xff]  ;;  %v522_v11 = vld [vmem:[%s2410_s20 + $0x42] sm:$0xff]  ;;  %v1357_v14 = vld [vmem:[%s2410_s20 + $0x2d] sm:$0xff] }
  0x22   : > { %v1358_v15 = vld [vmem:[%s2410_s20 + $0x35] sm:$0xff]  ;;  %v1359_v16 = vld [vmem:[%s2410_s20 + $0x3d] sm:$0xff]  ;;  %v1360_v17 = vld [vmem:[%s2410_s20 + $0x45] sm:$0xff] }
  0x23   : > { %2041 = vmatmul.mubr.msk.f32.gmra.mrb[8].mxu1 %vm223_vm0, %v219_v39  ;;  %2127 = vmatmul.mubr.msk.f32.gmra.mrb[2].mxu0 %vm223_vm0, %v1021_v40  ;;  %v1361_v18 = vld [vmem:[%s2410_s20 + $0x4d] sm:$0xff]  ;;  %v1362_v19 = vld [vmem:[%s2410_s20 + $0x55] sm:$0xff]  ;;  %v1363_v20 = vld [vmem:[%s2410_s20 + $0x5d] sm:$0xff] }
  0x24   : > { %2047 = vmatprep.mubr.msk.f32.mxu1 %vm223_vm0, %v198_v41  ;;  %2129 = vmatprep.mubr.msk.f32.mxu0 %vm223_vm0, %v1022_v42  ;;  %v1522_v21 = vld [vmem:[%s2410_s20 + $0x16] sm:$0xff]  ;;  %v1524_v22 = vld [vmem:[%s2410_s20 + $0x26] sm:$0xff]  ;;  %v1525_v24 = vld [vmem:[%s2410_s20 + $0x2e] sm:$0xff] }
  0x25   : > { %v856_v25 = vld [vmem:[%s2410_s20 + $0x3b] sm:$0xff]  ;;  %v857_v27 = vld [vmem:[%s2410_s20 + $0x43] sm:$0xff]  ;;  %v858_v29 = vld [vmem:[%s2410_s20 + $0x4b] sm:$0xff] }
  0x26   : > { %v1526_v26 = vld [vmem:[%s2410_s20 + $0x36] sm:$0xff]  ;;  %v1527_v28 = vld [vmem:[%s2410_s20 + $0x3e] sm:$0xff]  ;;  %v1528_v30 = vld [vmem:[%s2410_s20 + $0x46] sm:$0xff] }
  0x27   : > { %2048 = vmatmul.mubr.msk.f32.vlgmr.msra.gmra.mrb[0].mxu1 %vm223_vm0, %v199_v45  ;;  %2130 = vmatmul.mubr.msk.f32.gmra.mrb[4].mxu0 %vm223_vm0, %v1023_v46  ;;  %v859_v31 = vld [vmem:[%s2410_s20 + $0x53] sm:$0xff]  ;;  %v1531_v34 = vld [vmem:[%s2410_s20 + $0x5e] sm:$0xff] }
  0x28   : > { %2050 = vmatprep.mubr.msk.f32.mxu1 %vm223_vm0, %v200_v47  ;;  %2132 = vmatprep.mubr.msk.f32.mxu0 %vm223_vm0, %v1024_v48  ;;  %v1529_v32 = vld [vmem:[%s2410_s20 + $0x4e] sm:$0xff]  ;;  %v1530_v33 = vld [vmem:[%s2410_s20 + $0x56] sm:$0xff]  ;;  %v1913_v45 = vld [vmem:[%s2632_s3] ss:$0 sm:$0xff] }
  0x29   : > { %2206 = vmatpush3.bf16.msra.mxu1 %v2203_v23  ;;  %v691_v23 = vld [vmem:[%s2410_s20 + $0x52] sm:$0xff] }
  0x2a   : > { %2208 = vmatprep.subr.bf16.mxu1 %v2207_v49 }
  0x2b   : > { %2051 = vmatmul.mubr.msk.f32.gmra.mrb[2].mxu1 %vm223_vm0, %v201_v50  ;;  %2133 = vmatmul.mubr.msk.f32.gmra.mrb[6].mxu0 %vm223_vm0, %v1025_v51 }
  0x2c   : > { %2053 = vmatprep.mubr.msk.f32.mxu1 %vm223_vm0, %v202_v52  ;;  %2135 = vmatprep.mubr.msk.f32.mxu0 %vm223_vm0, %v1026_v53 }
  0x2f   : > { %2054 = vmatmul.mubr.msk.f32.gmra.mrb[4].mxu1 %vm223_vm0, %v203_v54  ;;  %2136 = vmatmul.mubr.msk.f32.gmra.mrb[8].mxu0 %vm223_vm0, %v1027_v55 }
  0x30   : > { %2056 = vmatprep.mubr.msk.f32.mxu1 %vm223_vm0, %v204_v56  ;;  %2142 = vmatprep.mubr.msk.f32.mxu0 %vm223_vm0, %v1019_v35 }
  0x33   : > { %2057 = vmatmul.mubr.msk.f32.gmra.mrb[6].mxu1 %vm223_vm0, %v205_v59  ;;  %2143 = vmatmul.mubr.msk.f32.vlgmr.msra.gmra.mrb[0].mxu0 %vm223_vm0, %v1020_v38 }
  0x34   : > { %2226 = vmatpush3.bf16.msra.mxu0 %v2223_v37  ;;  %2059 = vmatprep.mubr.msk.f32.mxu1 %vm223_vm0, %v206_v60 }
  0x35   : > { %2145 = vmatprep.mubr.msk.f32.mxu0 %vm223_vm0, %v1021_v40  ;;  %2228 = vmatprep.subr.bf16.mxu0 %v2227_v61 }
  0x37   : > { %2060 = vmatmul.mubr.msk.f32.gmra.mrb[8].mxu1 %vm223_vm0, %v207_v62  ;;  %2146 = vmatmul.mubr.msk.f32.gmra.mrb[2].mxu0 %vm223_vm0, %v1022_v42  ;;  %v1912_v42 = vld [vmem:[%s2631_s2] ss:$0 sm:$0xff] }
  0x38   : > { %2066 = vmatprep.mubr.msk.f32.mxu1 %vm223_vm0, %v514_v63  ;;  %2148 = vmatprep.mubr.msk.f32.mxu0 %vm223_vm0, %v1023_v46 }
  0x3b   : > { %2067 = vmatmul.mubr.msk.f32.vlgmr.msra.gmra.mrb[0].mxu1 %vm223_vm0, %v515_v0  ;;  %2149 = vmatmul.mubr.msk.f32.gmra.mrb[4].mxu0 %vm223_vm0, %v1024_v48 }
  0x3c   : > { %2069 = vmatprep.mubr.msk.f32.mxu1 %vm223_vm0, %v516_v1  ;;  %2151 = vmatprep.mubr.msk.f32.mxu0 %vm223_vm0, %v1025_v51 }
  0x3d   : > { %2210 = vmatpush3.bf16.msra.mxu1 %v2207_v49 }
  0x3e   : > { %2231 = vmatprep.subr.bf16.mxu1 %v2373_v3 }
  0x3f   : > { %2070 = vmatmul.mubr.msk.f32.gmra.mrb[2].mxu1 %vm223_vm0, %v517_v2  ;;  %2152 = vmatmul.mubr.msk.f32.gmra.mrb[6].mxu0 %vm223_vm0, %v1026_v53 }
  0x40   : > { %2072 = vmatprep.mubr.msk.f32.mxu1 %vm223_vm0, %v518_v4  ;;  %2154 = vmatprep.mubr.msk.f32.mxu0 %vm223_vm0, %v1027_v55 }
  0x43   : > { %2073 = vmatmul.mubr.msk.f32.gmra.mrb[4].mxu1 %vm223_vm0, %v519_v5  ;;  %2155 = vmatmul.mubr.msk.f32.gmra.mrb[8].mxu0 %vm223_vm0, %v1195_v6 }
  0x44   : > { %2075 = vmatprep.mubr.msk.f32.mxu1 %vm223_vm0, %v520_v7  ;;  %2161 = vmatprep.mubr.msk.f32.mxu0 %vm223_vm0, %v1354_v8 }
  0x47   : > { %2076 = vmatmul.mubr.msk.f32.gmra.mrb[6].mxu1 %vm223_vm0, %v521_v9  ;;  %2162 = vmatmul.mubr.msk.f32.vlgmr.msra.gmra.mrb[0].mxu0 %vm223_vm0, %v1355_v10 }
  0x48   : > { %2230 = vmatpush3.bf16.msra.mxu0 %v2227_v61  ;;  %2078 = vmatprep.mubr.msk.f32.mxu1 %vm223_vm0, %v522_v11 }
  0x49   : > { %2164 = vmatprep.mubr.msk.f32.mxu0 %vm223_vm0, %v1356_v12 }
  0x4b   : > { %2079 = vmatmul.mubr.msk.f32.gmra.mrb[8].mxu1 %vm223_vm0, %v523_v13  ;;  %2165 = vmatmul.mubr.msk.f32.gmra.mrb[2].mxu0 %vm223_vm0, %v1357_v14 }
  0x4c   : > { %2085 = vmatprep.mubr.msk.f32.mxu1 %vm223_vm0, %v515_v0  ;;  %2167 = vmatprep.mubr.msk.f32.mxu0 %vm223_vm0, %v1358_v15 }
  0x4f   : > { %2086 = vmatmul.mubr.msk.f32.vlgmr.msra.gmra.mrb[0].mxu1 %vm223_vm0, %v516_v1  ;;  %2168 = vmatmul.mubr.msk.f32.gmra.mrb[4].mxu0 %vm223_vm0, %v1359_v16 }
  0x50   : > { %2088 = vmatprep.mubr.msk.f32.mxu1 %vm223_vm0, %v517_v2  ;;  %2170 = vmatprep.mubr.msk.f32.mxu0 %vm223_vm0, %v1360_v17 }
  0x51   : > { %2232 = vmatpush3.bf16.msra.mxu1 %v2373_v3  ;;  %v1523_v3 = vld [vmem:[%s2410_s20 + $0x1e] sm:$0xff] }
  0x53   : > { %2089 = vmatmul.mubr.msk.f32.gmra.mrb[2].mxu1 %vm223_vm0, %v518_v4  ;;  %2171 = vmatmul.mubr.msk.f32.gmra.mrb[6].mxu0 %vm223_vm0, %v1361_v18 }
  0x54   : > { %2091 = vmatprep.mubr.msk.f32.mxu1 %vm223_vm0, %v519_v5  ;;  %2173 = vmatprep.mubr.msk.f32.mxu0 %vm223_vm0, %v1362_v19 }
  0x57   : > { %2092 = vmatmul.mubr.msk.f32.gmra.mrb[4].mxu1 %vm223_vm0, %v520_v7  ;;  %2174 = vmatmul.mubr.msk.f32.gmra.mrb[8].mxu0 %vm223_vm0, %v1363_v20 }
  0x58   : > { %2094 = vmatprep.mubr.msk.f32.mxu1 %vm223_vm0, %v521_v9  ;;  %2180 = vmatprep.mubr.msk.f32.mxu0 %vm223_vm0, %v1522_v21 }
  0x5b   : > { %2095 = vmatmul.mubr.msk.f32.gmra.mrb[6].mxu1 %vm223_vm0, %v522_v11  ;;  %2181 = vmatmul.mubr.msk.f32.vlgmr.msra.gmra.mrb[0].mxu0 %vm223_vm0, %v1523_v3 }
  0x5c   : > { %2097 = vmatprep.mubr.msk.f32.mxu1 %vm223_vm0, %v523_v13  ;;  %2183 = vmatprep.mubr.msk.f32.mxu0 %vm223_vm0, %v1524_v22 }
  0x5f   : > { %2098 = vmatmul.mubr.msk.f32.gmra.mrb[8].mxu1 %vm223_vm0, %v691_v23  ;;  %2184 = vmatmul.mubr.msk.f32.gmra.mrb[2].mxu0 %vm223_vm0, %v1525_v24 }
  0x60   : > { %2113 = vmatprep.mubr.msk.f32.mxu1 %vm223_vm0, %v856_v25  ;;  %2186 = vmatprep.mubr.msk.f32.mxu0 %vm223_vm0, %v1526_v26 }
  0x63   : > { %2114 = vmatmul.mubr.msk.f32.vlgmr.msra.gmra.mrb[6].mxu1 %vm223_vm0, %v857_v27  ;;  %2187 = vmatmul.mubr.msk.f32.gmra.mrb[4].mxu0 %vm223_vm0, %v1527_v28 }
  0x64   : > { %2116 = vmatprep.mubr.msk.f32.mxu1 %vm223_vm0, %v858_v29  ;;  %2189 = vmatprep.mubr.msk.f32.mxu0 %vm223_vm0, %v1528_v30 }
  0x67   : > { %2117 = vmatmul.mubr.msk.f32.gmra.mrb[8].mxu1 %vm223_vm0, %v859_v31  ;;  %2190 = vmatmul.mubr.msk.f32.gmra.mrb[6].mxu0 %vm223_vm0, %v1529_v32 }
  0x68   : > { %2192 = vmatprep.mubr.msk.f32.mxu0 %vm223_vm0, %v1530_v33 }
  0x6b   : > { %2193 = vmatmul.mubr.msk.f32.gmra.mrb[8].mxu0 %vm223_vm0, %v1531_v34 }
 0x122   : > { %v2087_v35 = vpop.f32.mrb[0].mxu1 }
 0x123   : > { %v791_v36 = vpop.f32.mrb[1].mxu1 }
 0x126   : > { %v2090_v37 = vpop.f32.mrb[2].mxu1 }
 0x127   : > { %v801_v38 = vpop.f32.mrb[3].mxu1 }
 0x12a   : > { %v2093_v39 = vpop.f32.mrb[4].mxu1 }
 0x12b   : > { %v811_v40 = vpop.f32.mrb[5].mxu1 }
 0x12e   : > { %v2182_v41 = vpop.f32.mrb[0].mxu0 }
 0x12f   : > { %v2233_v43 = vadd.f32 %v2182_v41, %v2087_v35  ;;  %v1631_v44 = vpop.f32.mrb[1].mxu0 }
 0x130   : > { %v2234_v46 = vadd.f32 %v1631_v44, %v791_v36 }
 0x131   : > { %v1698_v47 = vmul.f32 %v2233_v43, %v1912_v42 }
 0x132   : > { %v1697_v48 = vmul.f32 %v2234_v46, %v1912_v42  ;;  %v2185_v49 = vpop.f32.mrb[2].mxu0 }
 0x133   : > { %v1715_v50 = vadd.f32 %v1913_v45, %v1698_v47  ;;  %v2235_v51 = vadd.f32 %v2185_v49, %v2090_v37  ;;  %v1641_v52 = vpop.f32.mrb[3].mxu0 }
 0x134   : > { %v1714_v53 = vadd.f32 %v1913_v45, %v1697_v48  ;;  %v2236_v54 = vadd.f32 %v1641_v52, %v801_v38 }
 0x135   : > { %v1725_v55 = vmax.f32 %v1715_v50, 0.0  ;;  %v1700_v56 = vmul.f32 %v2235_v51, %v1912_v42 }
 0x136   : > { %v1724_v57 = vmax.f32 %v1714_v53, 0.0  ;;  %v1699_v58 = vmul.f32 %v2236_v54, %v1912_v42  ;;  %v2115_v59 = vpop.f32.mrb[6].mxu1  ;;  %v2188_v60 = vpop.f32.mrb[4].mxu0 }
 0x137   : > { %1735 = vst.msk [vmem:[%s2604_s14 + $0x8] sm:$0xff] %vm223_vm0, %v1725_v55  ;;  %v1717_v61 = vadd.f32 %v1913_v45, %v1700_v56  ;;  %v2237_v62 = vadd.f32 %v2188_v60, %v2093_v39  ;;  %v989_v63 = vpop.f32.mrb[7].mxu1  ;;  %v1651_v0 = vpop.f32.mrb[5].mxu0 }
 0x138   : > { %1734 = vst.msk [vmem:[%s2604_s14] sm:$0xff] %vm223_vm0, %v1724_v57  ;;  %v1716_v1 = vadd.f32 %v1913_v45, %v1699_v58  ;;  %v2238_v2 = vadd.f32 %v1651_v0, %v811_v40 }
 0x139   : > { %v1727_v4 = vmax.f32 %v1717_v61, 0.0  ;;  %v1702_v5 = vmul.f32 %v2237_v62, %v1912_v42 }
 0x13a   : > { %v1726_v6 = vmax.f32 %v1716_v1, 0.0  ;;  %v1701_v7 = vmul.f32 %v2238_v2, %v1912_v42  ;;  %v2118_v8 = vpop.f32.mrb[8].mxu1  ;;  %v2191_v9 = vpop.f32.mrb[6].mxu0 }
 0x13b   : > { %1737 = vst.msk [vmem:[%s2604_s14 + $0x18] sm:$0xff] %vm223_vm0, %v1727_v4  ;;  %v1719_v10 = vadd.f32 %v1913_v45, %v1702_v5  ;;  %v2239_v11 = vadd.f32 %v2191_v9, %v2115_v59  ;;  %v999_v12 = vpop.f32.mrb[9].mxu1  ;;  %v1661_v13 = vpop.f32.mrb[7].mxu0 }
 0x13c   : > { %1736 = vst.msk [vmem:[%s2604_s14 + $0x10] sm:$0xff] %vm223_vm0, %v1726_v6  ;;  %v1718_v14 = vadd.f32 %v1913_v45, %v1701_v7  ;;  %v2240_v15 = vadd.f32 %v1661_v13, %v989_v63 }
 0x13d   : > { %v1729_v16 = vmax.f32 %v1719_v10, 0.0  ;;  %v1704_v17 = vmul.f32 %v2239_v11, %v1912_v42 }
 0x13e   : > { %v1728_v18 = vmax.f32 %v1718_v14, 0.0  ;;  %v1703_v19 = vmul.f32 %v2240_v15, %v1912_v42  ;;  %v2194_v20 = vpop.f32.mrb[8].mxu0 }
 0x13f   : > { %1739 = vst.msk [vmem:[%s2604_s14 + $0x28] sm:$0xff] %vm223_vm0, %v1729_v16  ;;  %v1721_v21 = vadd.f32 %v1913_v45, %v1704_v17  ;;  %v2241_v3 = vadd.f32 %v2194_v20, %v2118_v8  ;;  %v1671_v22 = vpop.f32.mrb[9].mxu0 }
 0x140   : > { %1738 = vst.msk [vmem:[%s2604_s14 + $0x20] sm:$0xff] %vm223_vm0, %v1728_v18  ;;  %v1720_v23 = vadd.f32 %v1913_v45, %v1703_v19  ;;  %v2242_v24 = vadd.f32 %v1671_v22, %v999_v12 }
 0x141   : > { %v1731_v25 = vmax.f32 %v1721_v21, 0.0  ;;  %v1706_v26 = vmul.f32 %v2241_v3, %v1912_v42 }
 0x142   : > { %v1730_v27 = vmax.f32 %v1720_v23, 0.0  ;;  %v1705_v28 = vmul.f32 %v2242_v24, %v1912_v42 }
 0x143   : > { %1741 = vst.msk [vmem:[%s2604_s14 + $0x38] sm:$0xff] %vm223_vm0, %v1731_v25  ;;  %v1723_v29 = vadd.f32 %v1913_v45, %v1706_v26 }
 0x144   : > { %1740 = vst.msk [vmem:[%s2604_s14 + $0x30] sm:$0xff] %vm223_vm0, %v1730_v27  ;;  %v1722_v30 = vadd.f32 %v1913_v45, %v1705_v28 }
 0x145   : > { %v1733_v31 = vmax.f32 %v1723_v29, 0.0 }
 0x146   : > { %v1732_v32 = vmax.f32 %v1722_v30, 0.0 }
 0x147   : > { %1743 = vst.msk [vmem:[%s2604_s14 + $0x48] sm:$0xff] %vm223_vm0, %v1733_v31 }
 0x148   : > { %1742 = vst.msk [vmem:[%s2604_s14 + $0x40] sm:$0xff] %vm223_vm0, %v1732_v32 }
 0x149 PF: > { %s14_s15 = sadd.s32 1, %s2329_s15  }
 0x14a   : > { %p11_p4 = scmp.ge.s32.totalorder %s14_s15, 4  }
 0x14c   :  { %13 = sbr.rel (!%p11_p4) target bundleno = 1 (0x1), region = 74 }

// kernel: resnet_v2_forward.16
= control target key start
LH: loop header
LB: loop body
LE: loop exit
PB: predicated region body
PF: predicated region fallthrough
CT: control target
= control target key end

     0   :  { %s527_s15 = smov 0   ;;  %s575_s0 = inlined_call_operand.vmem [shape: f32[1,2,64,16], index: 0, kind: input, shape index: {}]   ;;  %s576_s1 = inlined_call_operand.vmem [shape: f32[1,16,16], index: 1, kind: input, shape index: {}]   ;;  %s577_s2 = inlined_call_operand.vmem [shape: f32[1,16], index: 2, kind: input, shape index: {}]   ;;  %s578_s3 = inlined_call_operand.vmem [shape: f32[1,16], index: 3, kind: input, shape index: {}]   ;;  %s579_s4 = inlined_call_operand.vmem [shape: f32[2,64,16], index: 4, kind: output, shape index: {}]  }
   0x1 LB: > { %s431_s16 = sadd.s32 4294967295, %s500_s15   ;;  %p435_p0 = scmp.ge.s32.totalorder %s500_s15, 1  ;;  %s500_s15 = sphi %s527_s15, %s14_s15  }
   0x2   : > { %p162_p1 = scmp.lt.s32.totalorder %s500_s15, 3 }
   0x4   : > { %p163_p2 = pnand %p435_p0, %p162_p1 }
   0x5   : > { %v206_v0 = vld [vmem:[%s576_s1] sm:$0xff] (!%p163_p2)  ;;  %v207_v1 = vld [vmem:[%s576_s1 + $0x8] sm:$0xff] (!%p163_p2)  ;;  %p188_p3 = scmp.lt.s32.totalorder (!%p163_p2), %s431_s16, 1  ;;  %vm208_vm0 = vcmask (!%p163_p2), 130048  }
   0x6   : > { %166 = sbr.rel (%p163_p2) target bundleno = 241 (0xf1), region = 36  ;;  %v480_v2 = vpack.c.bf16 (!%p163_p2), %v207_v1, %v206_v0  ;;  %v448_v11 = vld [vmem:[%s577_s2] ss:$0 sm:$0xff] (!%p163_p2) }
   0x7   : > { %v449_v13 = vld [vmem:[%s578_s3] ss:$0 sm:$0xff] (!%p163_p2) }
   0x8   : > { %481 = vmatprep.subr.bf16.mxu0 (!%p163_p2), %v480_v2  ;;  %484 = vmatprep.subr.bf16.mxu1 (!%p163_p2), %v480_v2 }
   0x9   : > { %483 = vmatpush3.bf16.msra.mxu0 (!%p163_p2), %v480_v2  ;;  %485 = vmatpush3.bf16.msra.mxu1 (!%p163_p2), %v480_v2 }
   0xd   : > { %s581_s16 = smov (!%p188_p3, %s431_s16), 1 }
   0xe   : > { %s452_s21 = sshll.u32 %s581_s16, 6 }
   0xf   : > { %s192_s24 = scalar_lea.vmem %s575_s0, %s452_s21  ;;  %s197_s5 = scalar_lea.vmem %s579_s4, %s452_s21 }
  0x10   : > { %v198_v3 = vld [vmem:[%s192_s24] sm:$0xff]  ;;  %v199_v5 = vld [vmem:[%s192_s24 + $0x8] sm:$0xff]  ;;  %v200_v7 = vld [vmem:[%s192_s24 + $0x10] sm:$0xff] }
  0x11   : > { %v202_v4 = vld [vmem:[%s192_s24 + $0x20] sm:$0xff]  ;;  %468 = vmatprep.mubr.msk.f32.mxu0 %vm208_vm0, %v198_v3  ;;  %v203_v6 = vld [vmem:[%s192_s24 + $0x28] sm:$0xff]  ;;  %v204_v8 = vld [vmem:[%s192_s24 + $0x30] sm:$0xff] }
  0x12   : > { %474 = vmatprep.mubr.msk.f32.mxu1 %vm208_vm0, %v202_v4  ;;  %469 = vmatmul.mubr.msk.f32.vlgmr.msra.gmra.mrb[0].mxu0 %vm208_vm0, %v199_v5  ;;  %v201_v9 = vld [vmem:[%s192_s24 + $0x18] sm:$0xff] }
  0x13   : > { %475 = vmatmul.mubr.msk.f32.vlgmr.msra.gmra.mrb[0].mxu1 %vm208_vm0, %v203_v6  ;;  %471 = vmatprep.mubr.msk.f32.mxu0 %vm208_vm0, %v200_v7  ;;  %v205_v10 = vld [vmem:[%s192_s24 + $0x38] sm:$0xff] }
  0x14   : > { %477 = vmatprep.mubr.msk.f32.mxu1 %vm208_vm0, %v204_v8 }
  0x16   : > { %472 = vmatmul.mubr.msk.f32.gmra.mrb[2].mxu0 %vm208_vm0, %v201_v9 }
  0x17   : > { %478 = vmatmul.mubr.msk.f32.gmra.mrb[2].mxu1 %vm208_vm0, %v205_v10 }
  0xe5   : > { %v470_v12 = vpop.f32.mrb[0].mxu0 }
  0xe6   : > { %v476_v14 = vpop.f32.mrb[0].mxu1  ;;  %v346_v15 = vmul.f32 %v470_v12, %v448_v11  ;;  %v299_v17 = vpop.f32.mrb[1].mxu0 }
  0xe7   : > { %v350_v16 = vmul.f32 %v476_v14, %v448_v11  ;;  %v319_v18 = vpop.f32.mrb[1].mxu1  ;;  %v345_v19 = vmul.f32 %v448_v11, %v299_v17 }
  0xe8   : > { %v349_v20 = vmul.f32 %v448_v11, %v319_v18  ;;  %v361_v21 = vadd.f32 %v449_v13, %v346_v15 }
  0xe9   : > { %v365_v22 = vadd.f32 %v449_v13, %v350_v16  ;;  %v360_v23 = vadd.f32 %v449_v13, %v345_v19  ;;  %v473_v25 = vpop.f32.mrb[2].mxu0 }
  0xea   : > { %v364_v24 = vadd.f32 %v449_v13, %v349_v20  ;;  %v479_v26 = vpop.f32.mrb[2].mxu1  ;;  %369 = vst.msk [vmem:[%s197_s5 + $0x8] sm:$0xff] %vm208_vm0, %v361_v21  ;;  %v348_v27 = vmul.f32 %v473_v25, %v448_v11  ;;  %v309_v29 = vpop.f32.mrb[3].mxu0 }
  0xeb   : > { %373 = vst.msk [vmem:[%s197_s5 + $0x28] sm:$0xff] %vm208_vm0, %v365_v22  ;;  %v352_v28 = vmul.f32 %v479_v26, %v448_v11  ;;  %v329_v30 = vpop.f32.mrb[3].mxu1  ;;  %368 = vst.msk [vmem:[%s197_s5] sm:$0xff] %vm208_vm0, %v360_v23  ;;  %v347_v31 = vmul.f32 %v448_v11, %v309_v29 }
  0xec   : > { %372 = vst.msk [vmem:[%s197_s5 + $0x20] sm:$0xff] %vm208_vm0, %v364_v24  ;;  %v351_v32 = vmul.f32 %v448_v11, %v329_v30  ;;  %v363_v33 = vadd.f32 %v449_v13, %v348_v27 }
  0xed   : > { %v367_v34 = vadd.f32 %v449_v13, %v352_v28  ;;  %v362_v35 = vadd.f32 %v449_v13, %v347_v31 }
  0xee   : > { %v366_v36 = vadd.f32 %v449_v13, %v351_v32  ;;  %371 = vst.msk [vmem:[%s197_s5 + $0x18] sm:$0xff] %vm208_vm0, %v363_v33 }
  0xef   : > { %375 = vst.msk [vmem:[%s197_s5 + $0x38] sm:$0xff] %vm208_vm0, %v367_v34  ;;  %370 = vst.msk [vmem:[%s197_s5 + $0x10] sm:$0xff] %vm208_vm0, %v362_v35 }
  0xf0   : > { %374 = vst.msk [vmem:[%s197_s5 + $0x30] sm:$0xff] %vm208_vm0, %v366_v36 }
  0xf1 PF: > { %s14_s15 = sadd.s32 1, %s500_s15  }
  0xf2   : > { %p11_p4 = scmp.ge.s32.totalorder %s14_s15, 4  }
  0xf4   :  { %13 = sbr.rel (!%p11_p4) target bundleno = 1 (0x1), region = 66 }

// kernel: resnet_v2_forward.18
= control target key start
LH: loop header
LB: loop body
LE: loop exit
PB: predicated region body
PF: predicated region fallthrough
CT: control target
= control target key end

     0   :  { %s2310_s15 = smov 0   ;;  %s2577_s0 = inlined_call_operand.vmem [shape: f32[1,2,110,16], index: 0, kind: input, shape index: {}]   ;;  %s2578_s1 = inlined_call_operand.vmem [shape: f32[9,16,16], index: 1, kind: input, shape index: {}]   ;;  %s2579_s2 = inlined_call_operand.vmem [shape: f32[1,16], index: 2, kind: input, shape index: {}]   ;;  %s2580_s3 = inlined_call_operand.vmem [shape: f32[1,16], index: 3, kind: input, shape index: {}]   ;;  %s2581_s4 = inlined_call_operand.vmem [shape: f32[2,80,16], index: 4, kind: output, shape index: {}]  }
   0x1 LB: > { %s1755_s16 = sadd.s32 4294967295, %s2283_s15   ;;  %p1759_p0 = scmp.ge.s32.totalorder %s2283_s15, 1  ;;  %s2283_s15 = sphi %s2310_s15, %s14_s15  }
   0x2   : > { %p162_p1 = scmp.lt.s32.totalorder %s2283_s15, 3 }
   0x4   : > { %p163_p2 = pnand %p1759_p0, %p162_p1 }
   0x5   : > { %v1808_v0 = vld [vmem:[%s2578_s1 + $0x40] sm:$0xff] (!%p163_p2)  ;;  %v1809_v1 = vld [vmem:[%s2578_s1 + $0x48] sm:$0xff] (!%p163_p2)  ;;  %v1762_v2 = vld [vmem:[%s2578_s1 + $0x10] sm:$0xff] (!%p163_p2)  ;;  %p188_p3 = scmp.lt.s32.totalorder (!%p163_p2), %s1755_s16, 1  ;;  %vm223_vm0 = vcmask (!%p163_p2), 130048  }
   0x6   : > { %166 = sbr.rel (%p163_p2) target bundleno = 323 (0x143), region = 36  ;;  %v2327_v3 = vpack.c.bf16 (!%p163_p2), %v1809_v1, %v1808_v0  ;;  %v1763_v4 = vld [vmem:[%s2578_s1 + $0x18] sm:$0xff] (!%p163_p2)  ;;  %v1820_v5 = vld [vmem:[%s2578_s1 + $0x50] sm:$0xff] (!%p163_p2)  ;;  %v208_v9 = vld [vmem:[%s2578_s1] sm:$0xff] (!%p163_p2) }
   0x7   : > { %v1821_v6 = vld [vmem:[%s2578_s1 + $0x58] sm:$0xff] (!%p163_p2)  ;;  %v2149_v7 = vpack.c.bf16 (!%p163_p2), %v1763_v4, %v1762_v2  ;;  %v209_v10 = vld [vmem:[%s2578_s1 + $0x8] sm:$0xff] (!%p163_p2)  ;;  %v1832_v12 = vld [vmem:[%s2578_s1 + $0x60] sm:$0xff] (!%p163_p2) }
   0x8   : > { %v2169_v8 = vpack.c.bf16 (!%p163_p2), %v1821_v6, %v1820_v5  ;;  %2166 = vmatprep.subr.bf16.mxu0 (!%p163_p2), %v2327_v3  ;;  %v2153_v11 = vpack.c.bf16 (!%p163_p2), %v209_v10, %v208_v9  ;;  %v1833_v13 = vld [vmem:[%s2578_s1 + $0x68] sm:$0xff] (!%p163_p2)  ;;  %v1784_v14 = vld [vmem:[%s2578_s1 + $0x20] sm:$0xff] (!%p163_p2)  ;;  %v1844_v32 = vld [vmem:[%s2578_s1 + $0x70] sm:$0xff] (!%p163_p2) }
   0x9   : > { %2150 = vmatprep.subr.bf16.mxu1 (!%p163_p2), %v2149_v7  ;;  %2168 = vmatpush3.bf16.msra.mxu0 (!%p163_p2), %v2327_v3  ;;  %v1785_v15 = vld [vmem:[%s2578_s1 + $0x28] sm:$0xff] (!%p163_p2)  ;;  %v2173_v22 = vpack.c.bf16 (!%p163_p2), %v1833_v13, %v1832_v12  ;;  %v1845_v33 = vld [vmem:[%s2578_s1 + $0x78] sm:$0xff] (!%p163_p2)  ;;  %v1796_v43 = vld [vmem:[%s2578_s1 + $0x30] sm:$0xff] (!%p163_p2) }
   0xa   : > { %2152 = vmatpush3.bf16.msra.mxu1 (!%p163_p2), %v2149_v7  ;;  %2170 = vmatprep.subr.bf16.mxu0 (!%p163_p2), %v2169_v8  ;;  %v2157_v23 = vpack.c.bf16 (!%p163_p2), %v1785_v15, %v1784_v14  ;;  %v2177_v37 = vpack.c.bf16 (!%p163_p2), %v1845_v33, %v1844_v32  ;;  %v1797_v44 = vld [vmem:[%s2578_s1 + $0x38] sm:$0xff] (!%p163_p2)  ;;  %v1856_v57 = vld [vmem:[%s2578_s1 + $0x80] sm:$0xff] (!%p163_p2)  ;;  %v1857_v58 = vld [vmem:[%s2578_s1 + $0x88] sm:$0xff] (!%p163_p2) }
   0xb   : > { %2154 = vmatprep.subr.bf16.mxu1 (!%p163_p2), %v2153_v11  ;;  %v2161_v49 = vpack.c.bf16 (!%p163_p2), %v1797_v44, %v1796_v43  ;;  %v2181_v61 = vpack.c.bf16 (!%p163_p2), %v1857_v58, %v1856_v57 }
   0xd   : > { %s2583_s16 = smov (!%p188_p3, %s1755_s16), 1 }
   0xe   : > { %s2267_s5 = smul.u32 112, %s2583_s16 }
   0xf   : > { %s2268_s29 = smul.u32 80, %s2583_s16 }
  0x10   : > { %s2364_s3 = scalar_lea.vmem %s2577_s0, %s2267_s5 }
  0x11   : > { %v210_v16 = vld [vmem:[%s2364_s3 + $0x1] sm:$0xff]  ;;  %v850_v17 = vld [vmem:[%s2364_s3 + $0xb] sm:$0xff]  ;;  %v851_v19 = vld [vmem:[%s2364_s3 + $0x13] sm:$0xff]  ;;  %s2552_s6 = scalar_lea.vmem %s2581_s4, %s2268_s29 }
  0x12   : > { %v211_v18 = vld [vmem:[%s2364_s3 + $0x9] sm:$0xff]  ;;  %1982 = vmatprep.mubr.msk.f32.mxu1 %vm223_vm0, %v210_v16  ;;  %2058 = vmatprep.mubr.msk.f32.mxu0 %vm223_vm0, %v850_v17  ;;  %v212_v20 = vld [vmem:[%s2364_s3 + $0x11] sm:$0xff]  ;;  %v852_v21 = vld [vmem:[%s2364_s3 + $0x1b] sm:$0xff] }
  0x13   : > { %1983 = vmatmul.mubr.msk.f32.vlgmr.msra.gmra.mrb[0].mxu1 %vm223_vm0, %v211_v18  ;;  %2059 = vmatmul.mubr.msk.f32.vlgmr.msra.gmra.mrb[0].mxu0 %vm223_vm0, %v851_v19  ;;  %v213_v24 = vld [vmem:[%s2364_s3 + $0x19] sm:$0xff]  ;;  %v853_v25 = vld [vmem:[%s2364_s3 + $0x23] sm:$0xff]  ;;  %v854_v27 = vld [vmem:[%s2364_s3 + $0x2b] sm:$0xff] }
  0x14   : > { %2172 = vmatpush3.bf16.msra.mxu0 %v2169_v8  ;;  %1985 = vmatprep.mubr.msk.f32.mxu1 %vm223_vm0, %v212_v20  ;;  %v214_v26 = vld [vmem:[%s2364_s3 + $0x21] sm:$0xff]  ;;  %v215_v28 = vld [vmem:[%s2364_s3 + $0x29] sm:$0xff]  ;;  %v855_v29 = vld [vmem:[%s2364_s3 + $0x33] sm:$0xff] }
  0x15   : > { %2061 = vmatprep.mubr.msk.f32.mxu0 %vm223_vm0, %v852_v21  ;;  %2156 = vmatpush3.bf16.msra.mxu1 %v2153_v11  ;;  %v216_v30 = vld [vmem:[%s2364_s3 + $0x31] sm:$0xff]  ;;  %v217_v34 = vld [vmem:[%s2364_s3 + $0x39] sm:$0xff]  ;;  %v218_v36 = vld [vmem:[%s2364_s3 + $0x41] sm:$0xff] }
  0x16   : > { %2174 = vmatprep.subr.bf16.mxu0 %v2173_v22  ;;  %2158 = vmatprep.subr.bf16.mxu1 %v2157_v23  ;;  %v1018_v31 = vld [vmem:[%s2364_s3 + $0xc] sm:$0xff]  ;;  %v1019_v35 = vld [vmem:[%s2364_s3 + $0x14] sm:$0xff]  ;;  %v1020_v38 = vld [vmem:[%s2364_s3 + $0x1c] sm:$0xff] }
  0x17   : > { %1986 = vmatmul.mubr.msk.f32.gmra.mrb[2].mxu1 %vm223_vm0, %v213_v24  ;;  %2062 = vmatmul.mubr.msk.f32.gmra.mrb[2].mxu0 %vm223_vm0, %v853_v25  ;;  %v219_v39 = vld [vmem:[%s2364_s3 + $0x49] sm:$0xff]  ;;  %v198_v41 = vld [vmem:[%s2364_s3] sm:$0xff]  ;;  %v1023_v46 = vld [vmem:[%s2364_s3 + $0x34] sm:$0xff] }
  0x18   : > { %1988 = vmatprep.mubr.msk.f32.mxu1 %vm223_vm0, %v214_v26  ;;  %2064 = vmatprep.mubr.msk.f32.mxu0 %vm223_vm0, %v854_v27  ;;  %v1021_v40 = vld [vmem:[%s2364_s3 + $0x24] sm:$0xff]  ;;  %v1022_v42 = vld [vmem:[%s2364_s3 + $0x2c] sm:$0xff]  ;;  %v1024_v48 = vld [vmem:[%s2364_s3 + $0x3c] sm:$0xff] }
  0x19   : > { %v199_v45 = vld [vmem:[%s2364_s3 + $0x8] sm:$0xff]  ;;  %v200_v47 = vld [vmem:[%s2364_s3 + $0x10] sm:$0xff]  ;;  %v201_v50 = vld [vmem:[%s2364_s3 + $0x18] sm:$0xff] }
  0x1a   : > { %v1025_v51 = vld [vmem:[%s2364_s3 + $0x44] sm:$0xff]  ;;  %v1026_v53 = vld [vmem:[%s2364_s3 + $0x4c] sm:$0xff]  ;;  %v1027_v55 = vld [vmem:[%s2364_s3 + $0x54] sm:$0xff] }
  0x1b   : > { %1989 = vmatmul.mubr.msk.f32.gmra.mrb[4].mxu1 %vm223_vm0, %v215_v28  ;;  %2065 = vmatmul.mubr.msk.f32.gmra.mrb[4].mxu0 %vm223_vm0, %v855_v29  ;;  %v202_v52 = vld [vmem:[%s2364_s3 + $0x20] sm:$0xff]  ;;  %v203_v54 = vld [vmem:[%s2364_s3 + $0x28] sm:$0xff]  ;;  %v204_v56 = vld [vmem:[%s2364_s3 + $0x30] sm:$0xff] }
  0x1c   : > { %1991 = vmatprep.mubr.msk.f32.mxu1 %vm223_vm0, %v216_v30  ;;  %2077 = vmatprep.mubr.msk.f32.mxu0 %vm223_vm0, %v1018_v31  ;;  %v205_v59 = vld [vmem:[%s2364_s3 + $0x38] sm:$0xff]  ;;  %v206_v60 = vld [vmem:[%s2364_s3 + $0x40] sm:$0xff]  ;;  %v207_v62 = vld [vmem:[%s2364_s3 + $0x48] sm:$0xff] }
  0x1d   : > { %v514_v63 = vld [vmem:[%s2364_s3 + $0x2] sm:$0xff]  ;;  %v515_v0 = vld [vmem:[%s2364_s3 + $0xa] sm:$0xff]  ;;  %v516_v1 = vld [vmem:[%s2364_s3 + $0x12] sm:$0xff] }
  0x1e   : > { %v517_v2 = vld [vmem:[%s2364_s3 + $0x1a] sm:$0xff]  ;;  %v518_v4 = vld [vmem:[%s2364_s3 + $0x22] sm:$0xff]  ;;  %v519_v5 = vld [vmem:[%s2364_s3 + $0x2a] sm:$0xff] }
  0x1f   : > { %1992 = vmatmul.mubr.msk.f32.gmra.mrb[6].mxu1 %vm223_vm0, %v217_v34  ;;  %2078 = vmatmul.mubr.msk.f32.vlgmr.msra.gmra.mrb[0].mxu0 %vm223_vm0, %v1019_v35  ;;  %v1195_v6 = vld [vmem:[%s2364_s3 + $0x5c] sm:$0xff]  ;;  %v520_v7 = vld [vmem:[%s2364_s3 + $0x32] sm:$0xff]  ;;  %v1356_v12 = vld [vmem:[%s2364_s3 + $0x25] sm:$0xff] }
  0x20   : > { %2176 = vmatpush3.bf16.msra.mxu0 %v2173_v22  ;;  %1994 = vmatprep.mubr.msk.f32.mxu1 %vm223_vm0, %v218_v36  ;;  %v1354_v8 = vld [vmem:[%s2364_s3 + $0x15] sm:$0xff]  ;;  %v1355_v10 = vld [vmem:[%s2364_s3 + $0x1d] sm:$0xff]  ;;  %v523_v13 = vld [vmem:[%s2364_s3 + $0x4a] sm:$0xff] }
  0x21   : > { %2080 = vmatprep.mubr.msk.f32.mxu0 %vm223_vm0, %v1020_v38  ;;  %2178 = vmatprep.subr.bf16.mxu0 %v2177_v37  ;;  %v521_v9 = vld [vmem:[%s2364_s3 + $0x3a] sm:$0xff]  ;;  %v522_v11 = vld [vmem:[%s2364_s3 + $0x42] sm:$0xff]  ;;  %v1357_v14 = vld [vmem:[%s2364_s3 + $0x2d] sm:$0xff] }
  0x22   : > { %v1358_v15 = vld [vmem:[%s2364_s3 + $0x35] sm:$0xff]  ;;  %v1359_v16 = vld [vmem:[%s2364_s3 + $0x3d] sm:$0xff]  ;;  %v1360_v17 = vld [vmem:[%s2364_s3 + $0x45] sm:$0xff] }
  0x23   : > { %1995 = vmatmul.mubr.msk.f32.gmra.mrb[8].mxu1 %vm223_vm0, %v219_v39  ;;  %2081 = vmatmul.mubr.msk.f32.gmra.mrb[2].mxu0 %vm223_vm0, %v1021_v40  ;;  %v1361_v18 = vld [vmem:[%s2364_s3 + $0x4d] sm:$0xff]  ;;  %v1362_v19 = vld [vmem:[%s2364_s3 + $0x55] sm:$0xff]  ;;  %v1363_v20 = vld [vmem:[%s2364_s3 + $0x5d] sm:$0xff] }
  0x24   : > { %2001 = vmatprep.mubr.msk.f32.mxu1 %vm223_vm0, %v198_v41  ;;  %2083 = vmatprep.mubr.msk.f32.mxu0 %vm223_vm0, %v1022_v42  ;;  %v1522_v21 = vld [vmem:[%s2364_s3 + $0x16] sm:$0xff]  ;;  %v1524_v22 = vld [vmem:[%s2364_s3 + $0x26] sm:$0xff]  ;;  %v1525_v24 = vld [vmem:[%s2364_s3 + $0x2e] sm:$0xff] }
  0x25   : > { %v856_v25 = vld [vmem:[%s2364_s3 + $0x3b] sm:$0xff]  ;;  %v857_v27 = vld [vmem:[%s2364_s3 + $0x43] sm:$0xff]  ;;  %v858_v29 = vld [vmem:[%s2364_s3 + $0x4b] sm:$0xff] }
  0x26   : > { %v1526_v26 = vld [vmem:[%s2364_s3 + $0x36] sm:$0xff]  ;;  %v1527_v28 = vld [vmem:[%s2364_s3 + $0x3e] sm:$0xff]  ;;  %v1528_v30 = vld [vmem:[%s2364_s3 + $0x46] sm:$0xff] }
  0x27   : > { %2002 = vmatmul.mubr.msk.f32.vlgmr.msra.gmra.mrb[0].mxu1 %vm223_vm0, %v199_v45  ;;  %2084 = vmatmul.mubr.msk.f32.gmra.mrb[4].mxu0 %vm223_vm0, %v1023_v46  ;;  %v859_v31 = vld [vmem:[%s2364_s3 + $0x53] sm:$0xff]  ;;  %v1531_v34 = vld [vmem:[%s2364_s3 + $0x5e] sm:$0xff] }
  0x28   : > { %2004 = vmatprep.mubr.msk.f32.mxu1 %vm223_vm0, %v200_v47  ;;  %2086 = vmatprep.mubr.msk.f32.mxu0 %vm223_vm0, %v1024_v48  ;;  %v1529_v32 = vld [vmem:[%s2364_s3 + $0x4e] sm:$0xff]  ;;  %v1530_v33 = vld [vmem:[%s2364_s3 + $0x56] sm:$0xff] }
  0x29   : > { %2160 = vmatpush3.bf16.msra.mxu1 %v2157_v23  ;;  %v691_v23 = vld [vmem:[%s2364_s3 + $0x52] sm:$0xff] }
  0x2a   : > { %2162 = vmatprep.subr.bf16.mxu1 %v2161_v49 }
  0x2b   : > { %2005 = vmatmul.mubr.msk.f32.gmra.mrb[2].mxu1 %vm223_vm0, %v201_v50  ;;  %2087 = vmatmul.mubr.msk.f32.gmra.mrb[6].mxu0 %vm223_vm0, %v1025_v51 }
  0x2c   : > { %2007 = vmatprep.mubr.msk.f32.mxu1 %vm223_vm0, %v202_v52  ;;  %2089 = vmatprep.mubr.msk.f32.mxu0 %vm223_vm0, %v1026_v53 }
  0x2f   : > { %2008 = vmatmul.mubr.msk.f32.gmra.mrb[4].mxu1 %vm223_vm0, %v203_v54  ;;  %2090 = vmatmul.mubr.msk.f32.gmra.mrb[8].mxu0 %vm223_vm0, %v1027_v55 }
  0x30   : > { %2010 = vmatprep.mubr.msk.f32.mxu1 %vm223_vm0, %v204_v56  ;;  %2096 = vmatprep.mubr.msk.f32.mxu0 %vm223_vm0, %v1019_v35 }
  0x33   : > { %2011 = vmatmul.mubr.msk.f32.gmra.mrb[6].mxu1 %vm223_vm0, %v205_v59  ;;  %2097 = vmatmul.mubr.msk.f32.vlgmr.msra.gmra.mrb[0].mxu0 %vm223_vm0, %v1020_v38 }
  0x34   : > { %2180 = vmatpush3.bf16.msra.mxu0 %v2177_v37  ;;  %2013 = vmatprep.mubr.msk.f32.mxu1 %vm223_vm0, %v206_v60 }
  0x35   : > { %2099 = vmatprep.mubr.msk.f32.mxu0 %vm223_vm0, %v1021_v40  ;;  %2182 = vmatprep.subr.bf16.mxu0 %v2181_v61 }
  0x37   : > { %2014 = vmatmul.mubr.msk.f32.gmra.mrb[8].mxu1 %vm223_vm0, %v207_v62  ;;  %2100 = vmatmul.mubr.msk.f32.gmra.mrb[2].mxu0 %vm223_vm0, %v1022_v42 }
  0x38   : > { %2020 = vmatprep.mubr.msk.f32.mxu1 %vm223_vm0, %v514_v63  ;;  %2102 = vmatprep.mubr.msk.f32.mxu0 %vm223_vm0, %v1023_v46 }
  0x3b   : > { %2021 = vmatmul.mubr.msk.f32.vlgmr.msra.gmra.mrb[0].mxu1 %vm223_vm0, %v515_v0  ;;  %2103 = vmatmul.mubr.msk.f32.gmra.mrb[4].mxu0 %vm223_vm0, %v1024_v48 }
  0x3c   : > { %2023 = vmatprep.mubr.msk.f32.mxu1 %vm223_vm0, %v516_v1  ;;  %2105 = vmatprep.mubr.msk.f32.mxu0 %vm223_vm0, %v1025_v51 }
  0x3d   : > { %2164 = vmatpush3.bf16.msra.mxu1 %v2161_v49 }
  0x3e   : > { %2185 = vmatprep.subr.bf16.mxu1 %v2327_v3 }
  0x3f   : > { %2024 = vmatmul.mubr.msk.f32.gmra.mrb[2].mxu1 %vm223_vm0, %v517_v2  ;;  %2106 = vmatmul.mubr.msk.f32.gmra.mrb[6].mxu0 %vm223_vm0, %v1026_v53 }
  0x40   : > { %2026 = vmatprep.mubr.msk.f32.mxu1 %vm223_vm0, %v518_v4  ;;  %2108 = vmatprep.mubr.msk.f32.mxu0 %vm223_vm0, %v1027_v55 }
  0x43   : > { %2027 = vmatmul.mubr.msk.f32.gmra.mrb[4].mxu1 %vm223_vm0, %v519_v5  ;;  %2109 = vmatmul.mubr.msk.f32.gmra.mrb[8].mxu0 %vm223_vm0, %v1195_v6 }
  0x44   : > { %2029 = vmatprep.mubr.msk.f32.mxu1 %vm223_vm0, %v520_v7  ;;  %2115 = vmatprep.mubr.msk.f32.mxu0 %vm223_vm0, %v1354_v8 }
  0x47   : > { %2030 = vmatmul.mubr.msk.f32.gmra.mrb[6].mxu1 %vm223_vm0, %v521_v9  ;;  %2116 = vmatmul.mubr.msk.f32.vlgmr.msra.gmra.mrb[0].mxu0 %vm223_vm0, %v1355_v10 }
  0x48   : > { %2184 = vmatpush3.bf16.msra.mxu0 %v2181_v61  ;;  %2032 = vmatprep.mubr.msk.f32.mxu1 %vm223_vm0, %v522_v11 }
  0x49   : > { %2118 = vmatprep.mubr.msk.f32.mxu0 %vm223_vm0, %v1356_v12 }
  0x4b   : > { %2033 = vmatmul.mubr.msk.f32.gmra.mrb[8].mxu1 %vm223_vm0, %v523_v13  ;;  %2119 = vmatmul.mubr.msk.f32.gmra.mrb[2].mxu0 %vm223_vm0, %v1357_v14 }
  0x4c   : > { %2039 = vmatprep.mubr.msk.f32.mxu1 %vm223_vm0, %v515_v0  ;;  %2121 = vmatprep.mubr.msk.f32.mxu0 %vm223_vm0, %v1358_v15 }
  0x4f   : > { %2040 = vmatmul.mubr.msk.f32.vlgmr.msra.gmra.mrb[0].mxu1 %vm223_vm0, %v516_v1  ;;  %2122 = vmatmul.mubr.msk.f32.gmra.mrb[4].mxu0 %vm223_vm0, %v1359_v16 }
  0x50   : > { %2042 = vmatprep.mubr.msk.f32.mxu1 %vm223_vm0, %v517_v2  ;;  %2124 = vmatprep.mubr.msk.f32.mxu0 %vm223_vm0, %v1360_v17 }
  0x51   : > { %2186 = vmatpush3.bf16.msra.mxu1 %v2327_v3  ;;  %v1523_v3 = vld [vmem:[%s2364_s3 + $0x1e] sm:$0xff] }
  0x53   : > { %2043 = vmatmul.mubr.msk.f32.gmra.mrb[2].mxu1 %vm223_vm0, %v518_v4  ;;  %2125 = vmatmul.mubr.msk.f32.gmra.mrb[6].mxu0 %vm223_vm0, %v1361_v18 }
  0x54   : > { %2045 = vmatprep.mubr.msk.f32.mxu1 %vm223_vm0, %v519_v5  ;;  %2127 = vmatprep.mubr.msk.f32.mxu0 %vm223_vm0, %v1362_v19 }
  0x57   : > { %2046 = vmatmul.mubr.msk.f32.gmra.mrb[4].mxu1 %vm223_vm0, %v520_v7  ;;  %2128 = vmatmul.mubr.msk.f32.gmra.mrb[8].mxu0 %vm223_vm0, %v1363_v20 }
  0x58   : > { %2048 = vmatprep.mubr.msk.f32.mxu1 %vm223_vm0, %v521_v9  ;;  %2134 = vmatprep.mubr.msk.f32.mxu0 %vm223_vm0, %v1522_v21 }
  0x5b   : > { %2049 = vmatmul.mubr.msk.f32.gmra.mrb[6].mxu1 %vm223_vm0, %v522_v11  ;;  %2135 = vmatmul.mubr.msk.f32.vlgmr.msra.gmra.mrb[0].mxu0 %vm223_vm0, %v1523_v3 }
  0x5c   : > { %2051 = vmatprep.mubr.msk.f32.mxu1 %vm223_vm0, %v523_v13  ;;  %2137 = vmatprep.mubr.msk.f32.mxu0 %vm223_vm0, %v1524_v22 }
  0x5f   : > { %2052 = vmatmul.mubr.msk.f32.gmra.mrb[8].mxu1 %vm223_vm0, %v691_v23  ;;  %2138 = vmatmul.mubr.msk.f32.gmra.mrb[2].mxu0 %vm223_vm0, %v1525_v24 }
  0x60   : > { %2067 = vmatprep.mubr.msk.f32.mxu1 %vm223_vm0, %v856_v25  ;;  %2140 = vmatprep.mubr.msk.f32.mxu0 %vm223_vm0, %v1526_v26 }
  0x63   : > { %2068 = vmatmul.mubr.msk.f32.vlgmr.msra.gmra.mrb[6].mxu1 %vm223_vm0, %v857_v27  ;;  %2141 = vmatmul.mubr.msk.f32.gmra.mrb[4].mxu0 %vm223_vm0, %v1527_v28 }
  0x64   : > { %2070 = vmatprep.mubr.msk.f32.mxu1 %vm223_vm0, %v858_v29  ;;  %2143 = vmatprep.mubr.msk.f32.mxu0 %vm223_vm0, %v1528_v30 }
  0x67   : > { %2071 = vmatmul.mubr.msk.f32.gmra.mrb[8].mxu1 %vm223_vm0, %v859_v31  ;;  %2144 = vmatmul.mubr.msk.f32.gmra.mrb[6].mxu0 %vm223_vm0, %v1529_v32 }
  0x68   : > { %2146 = vmatprep.mubr.msk.f32.mxu0 %vm223_vm0, %v1530_v33 }
  0x6b   : > { %2147 = vmatmul.mubr.msk.f32.gmra.mrb[8].mxu0 %vm223_vm0, %v1531_v34 }
 0x122   : > { %v2041_v35 = vpop.f32.mrb[0].mxu1 }
 0x123   : > { %v791_v36 = vpop.f32.mrb[1].mxu1 }
 0x126   : > { %v2044_v37 = vpop.f32.mrb[2].mxu1 }
 0x127   : > { %v801_v38 = vpop.f32.mrb[3].mxu1 }
 0x12a   : > { %v2047_v39 = vpop.f32.mrb[4].mxu1 }
 0x12b   : > { %v811_v40 = vpop.f32.mrb[5].mxu1 }
 0x12e   : > { %v2136_v41 = vpop.f32.mrb[0].mxu0 }
 0x12f   : > { %v2187_v42 = vadd.f32 %v2136_v41, %v2041_v35  ;;  %v1631_v43 = vpop.f32.mrb[1].mxu0 }
 0x130   : > { %v2188_v44 = vadd.f32 %v1631_v43, %v791_v36 }
 0x131   : > { %1691 = vst.msk [vmem:[%s2552_s6 + $0x8] sm:$0xff] %vm223_vm0, %v2187_v42 }
 0x132   : > { %1690 = vst.msk [vmem:[%s2552_s6] sm:$0xff] %vm223_vm0, %v2188_v44  ;;  %v2139_v45 = vpop.f32.mrb[2].mxu0 }
 0x133   : > { %v2189_v46 = vadd.f32 %v2139_v45, %v2044_v37  ;;  %v1641_v47 = vpop.f32.mrb[3].mxu0 }
 0x134   : > { %v2190_v48 = vadd.f32 %v1641_v47, %v801_v38 }
 0x135   : > { %1693 = vst.msk [vmem:[%s2552_s6 + $0x18] sm:$0xff] %vm223_vm0, %v2189_v46 }
 0x136   : > { %1692 = vst.msk [vmem:[%s2552_s6 + $0x10] sm:$0xff] %vm223_vm0, %v2190_v48  ;;  %v2069_v49 = vpop.f32.mrb[6].mxu1  ;;  %v2142_v50 = vpop.f32.mrb[4].mxu0 }
 0x137   : > { %v2191_v51 = vadd.f32 %v2142_v50, %v2047_v39  ;;  %v989_v52 = vpop.f32.mrb[7].mxu1  ;;  %v1651_v53 = vpop.f32.mrb[5].mxu0 }
 0x138   : > { %v2192_v54 = vadd.f32 %v1651_v53, %v811_v40 }
 0x139   : > { %1695 = vst.msk [vmem:[%s2552_s6 + $0x28] sm:$0xff] %vm223_vm0, %v2191_v51 }
 0x13a   : > { %1694 = vst.msk [vmem:[%s2552_s6 + $0x20] sm:$0xff] %vm223_vm0, %v2192_v54  ;;  %v2072_v55 = vpop.f32.mrb[8].mxu1  ;;  %v2145_v56 = vpop.f32.mrb[6].mxu0 }
 0x13b   : > { %v2193_v57 = vadd.f32 %v2145_v56, %v2069_v49  ;;  %v999_v58 = vpop.f32.mrb[9].mxu1  ;;  %v1661_v59 = vpop.f32.mrb[7].mxu0 }
 0x13c   : > { %v2194_v60 = vadd.f32 %v1661_v59, %v989_v52 }
 0x13d   : > { %1697 = vst.msk [vmem:[%s2552_s6 + $0x38] sm:$0xff] %vm223_vm0, %v2193_v57 }
 0x13e   : > { %1696 = vst.msk [vmem:[%s2552_s6 + $0x30] sm:$0xff] %vm223_vm0, %v2194_v60  ;;  %v2148_v61 = vpop.f32.mrb[8].mxu0 }
 0x13f   : > { %v2195_v62 = vadd.f32 %v2148_v61, %v2072_v55  ;;  %v1671_v63 = vpop.f32.mrb[9].mxu0 }
 0x140   : > { %v2196_v0 = vadd.f32 %v1671_v63, %v999_v58 }
 0x141   : > { %1699 = vst.msk [vmem:[%s2552_s6 + $0x48] sm:$0xff] %vm223_vm0, %v2195_v62 }
 0x142   : > { %1698 = vst.msk [vmem:[%s2552_s6 + $0x40] sm:$0xff] %vm223_vm0, %v2196_v0 }
 0x143 PF: > { %s14_s15 = sadd.s32 1, %s2283_s15  }
 0x144   : > { %p11_p4 = scmp.ge.s32.totalorder %s14_s15, 4  }
 0x146   :  { %13 = sbr.rel (!%p11_p4) target bundleno = 1 (0x1), region = 74 }

// kernel: resnet_v2_forward.21
= control target key start
LH: loop header
LB: loop body
LE: loop exit
PB: predicated region body
PF: predicated region fallthrough
CT: control target
= control target key end

     0   :  { %s433_s15 = smov 0   ;;  %s462_s0 = inlined_call_operand.vmem [shape: f32[1,2,16,16], index: 0, kind: input, shape index: {}]   ;;  %s463_s1 = inlined_call_operand.vmem [shape: f32[1,16,32], index: 1, kind: input, shape index: {}]   ;;  %s464_s2 = inlined_call_operand.vmem [shape: f32[1,32], index: 2, kind: input, shape index: {}]   ;;  %s465_s3 = inlined_call_operand.vmem [shape: f32[1,32], index: 3, kind: input, shape index: {}]   ;;  %s466_s4 = inlined_call_operand.vmem [shape: f32[2,16,32], index: 4, kind: output, shape index: {}]  }
   0x1 LB: > { %s360_s16 = sadd.s32 4294967295, %s406_s15   ;;  %p364_p0 = scmp.ge.s32.totalorder %s406_s15, 1  ;;  %s406_s15 = sphi %s433_s15, %s14_s15  }
   0x2   : > { %p162_p1 = scmp.lt.s32.totalorder %s406_s15, 3 }
   0x4   : > { %p163_p2 = pnand %p364_p0, %p162_p1 }
   0x5   : > { %v200_v0 = vld [vmem:[%s463_s1] sm:$0xff] (!%p163_p2)  ;;  %v201_v1 = vld [vmem:[%s463_s1 + $0x8] sm:$0xff] (!%p163_p2)  ;;  %p188_p3 = scmp.lt.s32.totalorder (!%p163_p2), %s360_s16, 1  ;;  %vm202_vm0 = vcmask (!%p163_p2), 130048   ;;  %vm302_vm1 = vcmask (!%p163_p2), 261120  }
   0x6   : > { %166 = sbr.rel (%p163_p2) target bundleno = 236 (0xec), region = 36  ;;  %v388_v2 = vpack.c.bf16 (!%p163_p2), %v201_v1, %v200_v0  ;;  %v371_v5 = vld [vmem:[%s464_s2] ss:$0 sm:$0xff] (!%p163_p2) }
   0x7   : > { %v372_v7 = vld [vmem:[%s465_s3] ss:$0 sm:$0xff] (!%p163_p2) }
   0x8   : > { %389 = vmatprep.subr.bf16.mxu0 (!%p163_p2), %v388_v2 }
   0x9   : > { %391 = vmatpush3.bf16.msra.mxu0 (!%p163_p2), %v388_v2 }
   0xd   : > { %s468_s16 = smov (!%p188_p3, %s360_s16), 1 }
   0xe   : > { %s375_s21 = sshll.u32 %s468_s16, 4 }
   0xf   : > { %s192_s24 = scalar_lea.vmem %s462_s0, %s375_s21  ;;  %s197_s5 = scalar_lea.vmem %s466_s4, %s375_s21 }
  0x10   : > { %v198_v3 = vld [vmem:[%s192_s24] sm:$0xff]  ;;  %v199_v4 = vld [vmem:[%s192_s24 + $0x8] sm:$0xff] }
  0x11   : > { %385 = vmatprep.mubr.msk.f32.mxu0 %vm202_vm0, %v198_v3 }
  0x12   : > { %386 = vmatmul.mubr.msk.f32.vlgmr.msra.gmra.mrb[0].mxu0 %vm202_vm0, %v199_v4 }
  0xe5   : > { %v387_v6 = vpop.f32.mrb[0].mxu0 }
  0xe6   : > { %v292_v8 = vmul.f32 %v387_v6, %v371_v5  ;;  %v275_v9 = vpop.f32.mrb[1].mxu0 }
  0xe7   : > { %v291_v10 = vmul.f32 %v371_v5, %v275_v9 }
  0xe8   : > { %v301_v11 = vadd.f32 %v372_v7, %v292_v8 }
  0xe9   : > { %v300_v12 = vadd.f32 %v372_v7, %v291_v10 }
  0xea   : > { %304 = vst.msk [vmem:[%s197_s5 + $0x8] sm:$0xff] %vm302_vm1, %v301_v11 }
  0xeb   : > { %303 = vst.msk [vmem:[%s197_s5] sm:$0xff] %vm302_vm1, %v300_v12 }
  0xec PF: > { %s14_s15 = sadd.s32 1, %s406_s15  }
  0xed   : > { %p11_p4 = scmp.ge.s32.totalorder %s14_s15, 4  }
  0xef   :  { %13 = sbr.rel (!%p11_p4) target bundleno = 1 (0x1), region = 66 }

// kernel: resnet_v2_forward.24
= control target key start
LH: loop header
LB: loop body
LE: loop exit
PB: predicated region body
PF: predicated region fallthrough
CT: control target
= control target key end

     0   :  { %s43_s0 = inlined_call_operand.vmem [shape: f32[8,128], index: 0, kind: input, shape index: {}]   ;;  %s44_s1 = inlined_call_operand.vmem [shape: f32[8,128], index: 1, kind: input, shape index: {}]   ;;  %s45_s2 = inlined_call_operand.vmem [shape: f32[8,128], index: 2, kind: output, shape index: {}]  }
   0x1   :  { %v11_v0 = vld [vmem:[%s43_s0] sm:$0xff] }
   0x2   :  { %v12_v1 = vld [vmem:[%s44_s1] sm:$0xff] }
   0x3   :  { %v13_v2 = vadd.f32 %v12_v1, %v11_v0 }
   0x5   :  { %14 = vst [vmem:[%s45_s2] sm:$0xff] %v13_v2 }

// kernel: resnet_v2_forward.22
= control target key start
LH: loop header
LB: loop body
LE: loop exit
PB: predicated region body
PF: predicated region fallthrough
CT: control target
= control target key end

     0   :  { %s1650_s15 = smov 0   ;;  %s1652_s16 = smov 0   ;;  %s1906_s0 = inlined_call_operand.vmem [shape: f32[4,2,30,16], index: 0, kind: input, shape index: {}]   ;;  %s1907_s1 = inlined_call_operand.vmem [shape: f32[9,16,32], index: 1, kind: input, shape index: {}]   ;;  %s1908_s2 = inlined_call_operand.vmem [shape: f32[1,32], index: 2, kind: input, shape index: {}]   ;;  %s1909_s3 = inlined_call_operand.vmem [shape: f32[1,32], index: 3, kind: input, shape index: {}]   ;;  %s1910_s4 = inlined_call_operand.vmem [shape: f32[2,20,32], index: 4, kind: output, shape index: {}]  }
   0x1   :  { %s1654_s17 = smov 0  }
   0x2 LB: > { %s1261_s18 = sadd.s32 4294967295, %s1620_s17   ;;  %s1667_s19 = sadd.s32 1, %s1620_s17   ;;  %s1620_s17 = sphi %s1654_s17, %s1913_s17   ;;  %s1616_s16 = sphi %s1652_s16, %s1912_s16   ;;  %s1612_s15 = sphi %s1650_s15, %s1911_s15  }
   0x3   : > { %s18_s20 = ssub.s32 %s1620_s17, %s1667_s19  ;;  %s21_s21 = sadd.s32 1, %s1616_s16 }
   0x4   : > { %p19_p0 = scmp.eq.s32.totalorder %s18_s20, 0  ;;  %p28_p1 = scmp.ne.s32.totalorder %s1616_s16, %s1612_s15 }
   0x5   : > { %p29_p2 = scmp.eq.s32.totalorder %s1620_s17, 0  ;;  %p1264_p4 = scmp.ge.s32.totalorder %s1620_s17, 2 }
   0x6   : > { %s1676_s22 = scalar_select %p19_p0, %s1616_s16, %s21_s21  }
   0x7   : > { %p30_p3 = por %p29_p2, %p28_p1  ;;  %152 = sbr.rel (%p1264_p4) target bundleno = 26 (0x1a), region = 28 }
   0xe   : > { %155 = sbr.rel (!%p30_p3) target bundleno = 26 (0x1a), region = 32  ;;  %s157_s23 = sand.u32 (%p30_p3), 1, %s1616_s16  }
   0xf   : > { %s1333_s24 = sshll.u32 (%p30_p3), %s1620_s17, 5  ;;  %s1265_s25 = sshll.u32 (%p30_p3), %s157_s23, 7 }
  0x10   : > { %s1684_s28 = scalar_lea.vmem (%p30_p3), %s1906_s0, %s1333_s24  ;;  %s159_s29 = scalar_lea.vmem (%p30_p3), [#allocation2], %s1265_s25 }
  0x11   : > { %v220_v0 = vld [vmem:[%s1684_s28] sm:$0xff] (%p30_p3)  ;;  %v222_v1 = vld [vmem:[%s1684_s28 + $0x8] sm:$0xff] (%p30_p3)  ;;  %v224_v2 = vld [vmem:[%s1684_s28 + $0x10] sm:$0xff] (%p30_p3) }
  0x12   : > { %221 = vst [vmem:[%s159_s29] sm:$0xff] (%p30_p3), %v220_v0  ;;  %223 = vst [vmem:[%s159_s29 + $0x8] sm:$0xff] (%p30_p3), %v222_v1  ;;  %v226_v3 = vld [vmem:[%s1684_s28 + $0x18] sm:$0xff] (%p30_p3)  ;;  %v228_v4 = vld [vmem:[%s1684_s28 + $0x40] sm:$0xff] (%p30_p3) }
  0x13   : > { %225 = vst [vmem:[%s159_s29 + $0x10] sm:$0xff] (%p30_p3), %v224_v2  ;;  %v230_v5 = vld [vmem:[%s1684_s28 + $0x48] sm:$0xff] (%p30_p3)  ;;  %227 = vst [vmem:[%s159_s29 + $0x18] sm:$0xff] (%p30_p3), %v226_v3  ;;  %v232_v6 = vld [vmem:[%s1684_s28 + $0x50] sm:$0xff] (%p30_p3) }
  0x14   : > { %229 = vst [vmem:[%s159_s29 + $0x20] sm:$0xff] (%p30_p3), %v228_v4  ;;  %231 = vst [vmem:[%s159_s29 + $0x28] sm:$0xff] (%p30_p3), %v230_v5  ;;  %v234_v7 = vld [vmem:[%s1684_s28 + $0x58] sm:$0xff] (%p30_p3)  ;;  %v236_v8 = vld [vmem:[%s1684_s28 + $0x80] sm:$0xff] (%p30_p3) }
  0x15   : > { %233 = vst [vmem:[%s159_s29 + $0x30] sm:$0xff] %v232_v6  ;;  %235 = vst [vmem:[%s159_s29 + $0x38] sm:$0xff] %v234_v7  ;;  %v238_v9 = vld [vmem:[%s1684_s28 + $0x88] sm:$0xff]  ;;  %v240_v10 = vld [vmem:[%s1684_s28 + $0x90] sm:$0xff] }
  0x16   : > { %237 = vst [vmem:[%s159_s29 + $0x40] sm:$0xff] %v236_v8  ;;  %v242_v11 = vld [vmem:[%s1684_s28 + $0x98] sm:$0xff]  ;;  %239 = vst [vmem:[%s159_s29 + $0x48] sm:$0xff] %v238_v9  ;;  %v244_v12 = vld [vmem:[%s1684_s28 + $0xc0] sm:$0xff] }
  0x17   : > { %241 = vst [vmem:[%s159_s29 + $0x50] sm:$0xff] %v240_v10  ;;  %243 = vst [vmem:[%s159_s29 + $0x58] sm:$0xff] %v242_v11  ;;  %v246_v13 = vld [vmem:[%s1684_s28 + $0xc8] sm:$0xff]  ;;  %v248_v14 = vld [vmem:[%s1684_s28 + $0xd0] sm:$0xff] }
  0x18   : > { %245 = vst [vmem:[%s159_s29 + $0x60] sm:$0xff] %v244_v12  ;;  %247 = vst [vmem:[%s159_s29 + $0x68] sm:$0xff] %v246_v13  ;;  %v250_v15 = vld [vmem:[%s1684_s28 + $0xd8] sm:$0xff] }
  0x19   : > { %249 = vst [vmem:[%s159_s29 + $0x70] sm:$0xff] %v248_v14  ;;  %251 = vst [vmem:[%s159_s29 + $0x78] sm:$0xff] %v250_v15 }
  0x1a PF: > { %p1268_p5 = scmp.ge.s32.totalorder %s1620_s17, 1  ;;  %p256_p6 = scmp.lt.s32.totalorder %s1620_s17, 3 }
  0x1c   : > { %p257_p7 = pnand %p1268_p5, %p256_p6 }
  0x1d   : > { %v1274_v16 = vld [vmem:[%s1907_s1 + $0x10] sm:$0xff] (!%p257_p7)  ;;  %v1275_v17 = vld [vmem:[%s1907_s1 + $0x18] sm:$0xff] (!%p257_p7)  ;;  %v1298_v18 = vld [vmem:[%s1907_s1 + $0x40] sm:$0xff] (!%p257_p7)  ;;  %v1622_v19 = vmov (!%p257_p7), 0.0|0.0   ;;  %s263_s12 = sand.u32 (!%p257_p7), 1, %s1612_s15   ;;  %vm1623_vm0 = vmmov (!%p257_p7), 0  }
  0x1e   : > { %260 = sbr.rel (%p257_p7) target bundleno = 309 (0x135), region = 70  ;;  %1496 = vmatprep.subr.bf16.mxu1 (!%p257_p7), %v1622_v19  ;;  %1508 = vmatprep.subr.bf16.mxu0 (!%p257_p7), %v1622_v19  ;;  %v1497_v20 = vpack.c.bf16 (!%p257_p7), %v1275_v17, %v1274_v16  ;;  %v1299_v21 = vld [vmem:[%s1907_s1 + $0x48] sm:$0xff] (!%p257_p7)  ;;  %v296_v22 = vld [vmem:[%s1907_s1] sm:$0xff] (!%p257_p7)  ;;  %v1624_v25 = vmov (!%p257_p7), 0.0   ;;  %s1269_s23 = sshll.u32 (!%p257_p7), %s263_s12, 7  ;;  %v1306_v26 = vld [vmem:[%s1907_s1 + $0x50] sm:$0xff] (!%p257_p7) }
  0x1f   : > { %v297_v23 = vld [vmem:[%s1907_s1 + $0x8] sm:$0xff] (!%p257_p7)  ;;  %v1725_v24 = vpack.c.bf16 (!%p257_p7), %v1299_v21, %v1298_v18  ;;  %1383 = vmatprep.mubr.msk.f32.mxu1 (!%p257_p7), %vm1623_vm0, %v1624_v25  ;;  %1435 = vmatprep.mubr.msk.f32.mxu0 (!%p257_p7), %vm1623_vm0, %v1624_v25  ;;  %v1307_v27 = vld [vmem:[%s1907_s1 + $0x58] sm:$0xff] (!%p257_p7)  ;;  %vm305_vm1 = vcmask (!%p257_p7), 130048   ;;  %s1738_s27 = scalar_lea.vmem (!%p257_p7), [#allocation2], %s1269_s23  ;;  %v1311_v33 = vld [vmem:[%s1907_s1 + $0x60] sm:$0xff] (!%p257_p7)  ;;  %p288_p8 = scmp.lt.s32.totalorder (!%p257_p7), %s1261_s18, 1 }
  0x20   : > { %1498 = vmatpush3.bf16.msra.mxu1 (!%p257_p7), %v1497_v20  ;;  %v1500_v28 = vpack.c.bf16 (!%p257_p7), %v297_v23, %v296_v22  ;;  %v1271_v29 = vld [vmem:[%s1738_s27 + $0x20] sm:$0xff] (!%p257_p7)  ;;  %v1512_v31 = vpack.c.bf16 (!%p257_p7), %v1307_v27, %v1306_v26  ;;  %v1272_v32 = vld [vmem:[%s1738_s27 + $0x28] sm:$0xff] (!%p257_p7)  ;;  %v1273_v35 = vld [vmem:[%s1738_s27 + $0x30] sm:$0xf] (!%p257_p7)  ;;  %vm1195_vm2 = vcmask (!%p257_p7), 261120   ;;  %vm1198_vm3 = vcmask (!%p257_p7), 257024  }
  0x21   : > { %1510 = vmatpush3.bf16.msra.mxu0 (!%p257_p7), %v1725_v24  ;;  %1499 = vmatprep.subr.bf16.mxu1 (!%p257_p7), %v1622_v19  ;;  %v1295_v30 = vld [vmem:[%s1738_s27 + $0x60] sm:$0xff] (!%p257_p7)  ;;  %v1312_v34 = vld [vmem:[%s1907_s1 + $0x68] sm:$0xff] (!%p257_p7)  ;;  %v1305_v44 = vld [vmem:[%s1738_s27 + $0x51] sm:$0xf] (!%p257_p7) }
  0x22   : > { %1511 = vmatprep.subr.bf16.mxu0 (!%p257_p7), %v1622_v19  ;;  %v1303_v36 = vld [vmem:[%s1738_s27 + $0x41] sm:$0xff] (!%p257_p7)  ;;  %v1515_v37 = vpack.c.bf16 (!%p257_p7), %v1312_v34, %v1311_v33  ;;  %v1304_v42 = vld [vmem:[%s1738_s27 + $0x49] sm:$0xff] (!%p257_p7)  ;;  %v1320_v46 = vld [vmem:[%s1907_s1 + $0x78] sm:$0xff] (!%p257_p7) }
  0x23   : > { %1384 = vmatmul.mubr.msk.f32.vlgmr.msra.gmra.mrb[0].mxu1 (!%p257_p7), %vm305_vm1, %v1271_v29  ;;  %v1282_v38 = vld [vmem:[%s1907_s1 + $0x20] sm:$0xff] (!%p257_p7)  ;;  %v1283_v39 = vld [vmem:[%s1907_s1 + $0x28] sm:$0xff] (!%p257_p7)  ;;  %v1319_v45 = vld [vmem:[%s1907_s1 + $0x70] sm:$0xff] (!%p257_p7) }
  0x24   : > { %1436 = vmatmul.mubr.msk.f32.vlgmr.msra.gmra.mrb[0].mxu0 (!%p257_p7), %vm305_vm1, %v1295_v30  ;;  %1501 = vmatpush3.bf16.msra.mxu1 (!%p257_p7), %v1500_v28  ;;  %v293_v40 = vld [vmem:[%s1738_s27] sm:$0xff] (!%p257_p7)  ;;  %v1503_v41 = vpack.c.bf16 (!%p257_p7), %v1283_v39, %v1282_v38  ;;  %v294_v43 = vld [vmem:[%s1738_s27 + $0x8] sm:$0xff] (!%p257_p7)  ;;  %v295_v47 = vld [vmem:[%s1738_s27 + $0x10] sm:$0xf] (!%p257_p7)  ;;  %v1518_v49 = vpack.c.bf16 (!%p257_p7), %v1320_v46, %v1319_v45 }
  0x25   : > { %1513 = vmatpush3.bf16.msra.mxu0 %v1512_v31  ;;  %1386 = vmatprep.mubr.msk.f32.mxu1 %vm1623_vm0, %v1624_v25  ;;  %v878_v48 = vld [vmem:[%s1738_s27 + $0x5] sm:$0xff]  ;;  %v1290_v50 = vld [vmem:[%s1907_s1 + $0x30] sm:$0xff]  ;;  %v1291_v51 = vld [vmem:[%s1907_s1 + $0x38] sm:$0xff]  ;;  %s1915_s18 = smov (!%p288_p8, %s1261_s18), 1 }
  0x26   : > { %1448 = vmatprep.mubr.msk.f32.mxu0 %vm1623_vm0, %v1624_v25  ;;  %1514 = vmatprep.subr.bf16.mxu0 %v1622_v19  ;;  %v484_v52 = vld [vmem:[%s1738_s27 + $0x1] sm:$0xff]  ;;  %v1506_v53 = vpack.c.bf16 %v1291_v51, %v1290_v50  ;;  %v879_v54 = vld [vmem:[%s1738_s27 + $0xd] sm:$0xff]  ;;  %v880_v56 = vld [vmem:[%s1738_s27 + $0x15] sm:$0xf]  ;;  %s1570_s30 = smul.u32 24, %s1915_s18 }
  0x27   : > { %1387 = vmatmul.mubr.msk.f32.gmra.mrb[2].mxu1 %vm305_vm1, %v1272_v32  ;;  %1502 = vmatprep.subr.bf16.mxu1 %v1622_v19  ;;  %v485_v55 = vld [vmem:[%s1738_s27 + $0x9] sm:$0xff]  ;;  %v1324_v57 = vld [vmem:[%s1907_s1 + $0x80] sm:$0xff]  ;;  %v486_v59 = vld [vmem:[%s1738_s27 + $0x11] sm:$0xf] }
  0x28   : > { %1389 = vmatprep.mubr.msk.f32.mxu1 %vm1623_vm0, %v1624_v25  ;;  %v1325_v58 = vld [vmem:[%s1907_s1 + $0x88] sm:$0xff]  ;;  %v1287_v62 = vld [vmem:[%s1738_s27 + $0x40] sm:$0xff]  ;;  %v1318_v1 = vld [vmem:[%s1738_s27 + $0x35] sm:$0xf]  ;;  %s292_s7 = scalar_lea.vmem %s1910_s4, %s1570_s30 }
  0x29   : > { %v1316_v60 = vld [vmem:[%s1738_s27 + $0x25] sm:$0xff]  ;;  %v1521_v61 = vpack.c.bf16 %v1325_v58, %v1324_v57  ;;  %v1317_v63 = vld [vmem:[%s1738_s27 + $0x2d] sm:$0xff]  ;;  %v1076_v7 = vld [vmem:[%s1738_s27 + $0x16] sm:$0xf] }
  0x2a   : > { %v1288_v0 = vld [vmem:[%s1738_s27 + $0x48] sm:$0xff]  ;;  %v1289_v2 = vld [vmem:[%s1738_s27 + $0x50] sm:$0xf]  ;;  %v1329_v11 = vld [vmem:[%s1908_s2] ss:$0 sm:$0xff] }
  0x2b   : > { %1390 = vmatmul.mubr.msk.f32.gmra.mrb[4].mxu1 %vm305_vm1, %v1273_v35  ;;  %v1074_v3 = vld [vmem:[%s1738_s27 + $0x6] sm:$0xff]  ;;  %v1075_v5 = vld [vmem:[%s1738_s27 + $0xe] sm:$0xff]  ;;  %v1330_v14 = vld [vmem:[%s1909_s3] ss:$0 sm:$0xff] }
  0x2c   : > { %1449 = vmatmul.mubr.msk.f32.vlgmr.msra.gmra.mrb[0].mxu0 %vm305_vm1, %v1303_v36  ;;  %1396 = vmatprep.mubr.msk.f32.mxu1 %vm1623_vm0, %v1624_v25  ;;  %v1296_v4 = vld [vmem:[%s1738_s27 + $0x68] sm:$0xff]  ;;  %v1297_v6 = vld [vmem:[%s1738_s27 + $0x70] sm:$0xf] }
  0x2d   : > { %1516 = vmatpush3.bf16.msra.mxu0 %v1515_v37  ;;  %1451 = vmatprep.mubr.msk.f32.mxu0 %vm1623_vm0, %v1624_v25 }
  0x2e   : > { %1517 = vmatprep.subr.bf16.mxu0 %v1622_v19 }
  0x2f   : > { %1397 = vmatmul.mubr.msk.f32.vlgmr.msra.gmra.mrb[0].mxu1 %vm305_vm1, %v293_v40 }
  0x30   : > { %1452 = vmatmul.mubr.msk.f32.gmra.mrb[2].mxu0 %vm305_vm1, %v1304_v42  ;;  %1504 = vmatpush3.bf16.msra.mxu1 %v1503_v41 }
  0x31   : > { %1399 = vmatprep.mubr.msk.f32.mxu1 %vm1623_vm0, %v1624_v25  ;;  %1454 = vmatprep.mubr.msk.f32.mxu0 %vm1623_vm0, %v1624_v25 }
  0x32   : > { %1505 = vmatprep.subr.bf16.mxu1 %v1622_v19 }
  0x33   : > { %1400 = vmatmul.mubr.msk.f32.gmra.mrb[2].mxu1 %vm305_vm1, %v294_v43 }
  0x34   : > { %1455 = vmatmul.mubr.msk.f32.gmra.mrb[4].mxu0 %vm305_vm1, %v1305_v44  ;;  %1402 = vmatprep.mubr.msk.f32.mxu1 %vm1623_vm0, %v1624_v25 }
  0x35   : > { %1461 = vmatprep.mubr.msk.f32.mxu0 %vm1623_vm0, %v1624_v25 }
  0x37   : > { %1403 = vmatmul.mubr.msk.f32.gmra.mrb[4].mxu1 %vm305_vm1, %v295_v47 }
  0x38   : > { %1462 = vmatmul.mubr.msk.f32.vlgmr.msra.gmra.mrb[0].mxu0 %vm305_vm1, %v878_v48  ;;  %1409 = vmatprep.mubr.msk.f32.mxu1 %vm1623_vm0, %v1624_v25 }
  0x39   : > { %1519 = vmatpush3.bf16.msra.mxu0 %v1518_v49  ;;  %1464 = vmatprep.mubr.msk.f32.mxu0 %vm1623_vm0, %v1624_v25 }
  0x3a   : > { %1520 = vmatprep.subr.bf16.mxu0 %v1622_v19 }
  0x3b   : > { %1410 = vmatmul.mubr.msk.f32.vlgmr.msra.gmra.mrb[0].mxu1 %vm305_vm1, %v484_v52 }
  0x3c   : > { %1465 = vmatmul.mubr.msk.f32.gmra.mrb[2].mxu0 %vm305_vm1, %v879_v54  ;;  %1507 = vmatpush3.bf16.msra.mxu1 %v1506_v53 }
  0x3d   : > { %1412 = vmatprep.mubr.msk.f32.mxu1 %vm1623_vm0, %v1624_v25  ;;  %1467 = vmatprep.mubr.msk.f32.mxu0 %vm1623_vm0, %v1624_v25 }
  0x3e   : > { %1523 = vmatprep.subr.bf16.mxu1 %v1622_v19 }
  0x3f   : > { %1413 = vmatmul.mubr.msk.f32.gmra.mrb[2].mxu1 %vm305_vm1, %v485_v55 }
  0x40   : > { %1468 = vmatmul.mubr.msk.f32.gmra.mrb[4].mxu0 %vm305_vm1, %v880_v56  ;;  %1415 = vmatprep.mubr.msk.f32.mxu1 %vm1623_vm0, %v1624_v25 }
  0x41   : > { %1474 = vmatprep.mubr.msk.f32.mxu0 %vm1623_vm0, %v1624_v25 }
  0x43   : > { %1416 = vmatmul.mubr.msk.f32.gmra.mrb[4].mxu1 %vm305_vm1, %v486_v59 }
  0x44   : > { %1475 = vmatmul.mubr.msk.f32.vlgmr.msra.gmra.mrb[0].mxu0 %vm305_vm1, %v1316_v60  ;;  %1422 = vmatprep.mubr.msk.f32.mxu1 %vm1623_vm0, %v1624_v25 }
  0x45   : > { %1522 = vmatpush3.bf16.msra.mxu0 %v1521_v61  ;;  %1477 = vmatprep.mubr.msk.f32.mxu0 %vm1623_vm0, %v1624_v25 }
  0x47   : > { %1423 = vmatmul.mubr.msk.f32.vlgmr.msra.gmra.mrb[0].mxu1 %vm305_vm1, %v1287_v62 }
  0x48   : > { %1478 = vmatmul.mubr.msk.f32.gmra.mrb[2].mxu0 %vm305_vm1, %v1317_v63  ;;  %1524 = vmatpush3.bf16.msra.mxu1 %v1725_v24 }
  0x49   : > { %1425 = vmatprep.mubr.msk.f32.mxu1 %vm1623_vm0, %v1624_v25  ;;  %1480 = vmatprep.mubr.msk.f32.mxu0 %vm1623_vm0, %v1624_v25 }
  0x4b   : > { %1426 = vmatmul.mubr.msk.f32.gmra.mrb[2].mxu1 %vm305_vm1, %v1288_v0 }
  0x4c   : > { %1481 = vmatmul.mubr.msk.f32.gmra.mrb[4].mxu0 %vm305_vm1, %v1318_v1  ;;  %1428 = vmatprep.mubr.msk.f32.mxu1 %vm1623_vm0, %v1624_v25 }
  0x4d   : > { %1487 = vmatprep.mubr.msk.f32.mxu0 %vm1623_vm0, %v1624_v25 }
  0x4f   : > { %1429 = vmatmul.mubr.msk.f32.gmra.mrb[4].mxu1 %vm305_vm1, %v1289_v2 }
  0x50   : > { %1488 = vmatmul.mubr.msk.f32.vlgmr.msra.gmra.mrb[0].mxu0 %vm305_vm1, %v1074_v3  ;;  %1438 = vmatprep.mubr.msk.f32.mxu1 %vm1623_vm0, %v1624_v25 }
  0x51   : > { %1490 = vmatprep.mubr.msk.f32.mxu0 %vm1623_vm0, %v1624_v25 }
  0x53   : > { %1439 = vmatmul.mubr.msk.f32.vlgmr.msra.gmra.mrb[2].mxu1 %vm305_vm1, %v1296_v4 }
  0x54   : > { %1491 = vmatmul.mubr.msk.f32.gmra.mrb[2].mxu0 %vm305_vm1, %v1075_v5  ;;  %1441 = vmatprep.mubr.msk.f32.mxu1 %vm1623_vm0, %v1624_v25 }
  0x55   : > { %1493 = vmatprep.mubr.msk.f32.mxu0 %vm1623_vm0, %v1624_v25 }
  0x57   : > { %1442 = vmatmul.mubr.msk.f32.gmra.mrb[4].mxu1 %vm305_vm1, %v1297_v6 }
  0x58   : > { %1494 = vmatmul.mubr.msk.f32.gmra.mrb[4].mxu0 %vm305_vm1, %v1076_v7 }
 0x11a   : > { %v664_v8 = vpop.f32.mrb[0].mxu1 }
 0x11b   : > { %v1424_v9 = vpop.f32.mrb[1].mxu1 }
 0x123   : > { %v1155_v10 = vpop.f32.mrb[0].mxu0 }
 0x124   : > { %v1525_v12 = vadd.f32 %v1155_v10, %v664_v8  ;;  %v1489_v13 = vpop.f32.mrb[1].mxu0 }
 0x126   : > { %v1179_v15 = vmul.f32 %v1525_v12, %v1329_v11  ;;  %v768_v16 = vpop.f32.mrb[2].mxu1 }
 0x127   : > { %v1160_v17 = vpop.f32.mrb[2].mxu0  ;;  %v1440_v18 = vpop.f32.mrb[3].mxu1 }
 0x128   : > { %v1189_v19 = vadd.f32 %v1330_v14, %v1179_v15  ;;  %v1526_v20 = vadd.f32 %v1160_v17, %v768_v16  ;;  %v1492_v21 = vpop.f32.mrb[3].mxu0 }
 0x12a   : > { %v1192_v22 = vmax.f32 %v1189_v19, 0.0  ;;  %v1180_v23 = vmul.f32 %v1526_v20, %v1329_v11  ;;  %v773_v24 = vpop.f32.mrb[4].mxu1 }
 0x12b   : > { %v1165_v25 = vpop.f32.mrb[4].mxu0  ;;  %v1443_v26 = vpop.f32.mrb[5].mxu1 }
 0x12c   : > { %1196 = vst.msk [vmem:[%s292_s7] sm:$0xff] %vm1195_vm2, %v1192_v22  ;;  %v1190_v27 = vadd.f32 %v1330_v14, %v1180_v23  ;;  %v1527_v28 = vadd.f32 %v1165_v25, %v773_v24  ;;  %v1495_v29 = vpop.f32.mrb[5].mxu0 }
 0x12e   : > { %v1193_v30 = vmax.f32 %v1190_v27, 0.0  ;;  %v1181_v31 = vmul.f32 %v1527_v28, %v1329_v11 }
 0x130   : > { %1197 = vst.msk [vmem:[%s292_s7 + $0x8] sm:$0xff] %vm1195_vm2, %v1193_v30  ;;  %v1191_v32 = vadd.f32 %v1330_v14, %v1181_v31 }
 0x132   : > { %v1194_v33 = vmax.f32 %v1191_v32, 0.0 }
 0x134   : > { %1199 = vst.msk [vmem:[%s292_s7 + $0x10] sm:$0xf] %vm1198_vm3, %v1194_v33 }
 0x135 PF: > { %p11_p9 = scmp.ge.s32.totalorder %s1667_s19, 4   ;;  %s1911_s15 = smov %s1616_s16 }
 0x136   : > { %s1912_s16 = smov %s1676_s22  ;;  %s1913_s17 = smov %s1667_s19 }
 0x137   :  { %13 = sbr.rel (!%p11_p9) target bundleno = 2 (0x2), region = 120 }

// kernel: tile.53
= control target key start
LH: loop header
LB: loop body
LE: loop exit
PB: predicated region body
PF: predicated region fallthrough
CT: control target
= control target key end

     0   :  { %s22_s0 = inlined_call_operand.vmem [shape: f32[32], index: 0, kind: input, shape index: {}]   ;;  %s23_s1 = inlined_call_operand.vmem [shape: f32[4,32], index: 1, kind: output, shape index: {}]  }
   0x1   :  { %v4_v0 = vld [vmem:[%s22_s0] ss:$0 sm:$0xff] }
   0x2   :  { %5 = vst [vmem:[%s23_s1] sm:$0xf] %v4_v0 }

// kernel: tile.54
= control target key start
LH: loop header
LB: loop body
LE: loop exit
PB: predicated region body
PF: predicated region fallthrough
CT: control target
= control target key end

     0   :  { %vm7_vm0 = vcmask 261120   ;;  %s37_s8 = smov 32   ;;  %s38_s9 = smov 64   ;;  %vm13_vm1 = vcmask 1048320   ;;  %vm19_vm2 = vcmask 785920   ;;  %vm25_vm3 = vcmask 523520   ;;  %s55_s0 = inlined_call_operand.vmem [shape: f32[4,32], index: 0, kind: input, shape index: {}]   ;;  %s56_s1 = inlined_call_operand.vmem [shape: f32[1,128], index: 1, kind: output, shape index: {}]  }
   0x1   :  { %v4_v0 = vld [vmem:[%s55_s0] sm:$0xf]  ;;  %s36_s0 = smov 96  }
   0x2   :  { %5 = vst [vmem:[#allocation1] sm:$0xf] %v4_v0 }
   0x9   :  { %v10_v1 = vld [vmem:[#allocation1 + $0x3] sm:$0x1]   ;;  %v22_v2 = vld [vmem:[#allocation1 + $0x1] sm:$0x1]   ;;  %v6_v3 = vld [vmem:[#allocation1] sm:$0x1]  }
   0xa   :  { %11 = vrot.lane.b32.xlu0 %v10_v1, %s36_s0  ;;  %23 = vrot.lane.b32.xlu1 %v22_v2, %s37_s8  ;;  %v16_v4 = vld [vmem:[#allocation1 + $0x2] sm:$0x1]   ;;  %8 = vst.msk [vmem:[#allocation0] sm:$0x1] %vm7_vm0, %v6_v3  }
   0xe   :  { %17 = vrot.lane.b32.xlu0 %v16_v4, %s38_s9 }
  0x7c   :  { %v12_v5 = vpop.permute.xlu0 %11   ;;  %v24_v6 = vpop.permute.xlu1 %23  }
  0x7d   :  { %14 = vst.msk [vmem:[#allocation0] sm:$0x1] %vm13_vm1, %v12_v5  }
  0x80   :  { %v18_v7 = vpop.permute.xlu0 %17  }
  0x81   :  { %20 = vst.msk [vmem:[#allocation0] sm:$0x1] %vm19_vm2, %v18_v7  }
  0x82   :  { %26 = vst.msk [vmem:[#allocation0] sm:$0x1] %vm25_vm3, %v24_v6  }
  0x89   :  { %v30_v8 = vld [vmem:[#allocation0] sm:$0x1] }
  0x8a   :  { %32 = vst [vmem:[%s56_s1] sm:$0x1] %v30_v8 }

// kernel: resnet_v2_forward.23
= control target key start
LH: loop header
LB: loop body
LE: loop exit
PB: predicated region body
PF: predicated region fallthrough
CT: control target
= control target key end

     0   :  { %s1586_s15 = smov 0   ;;  %s1852_s0 = inlined_call_operand.vmem [shape: f32[1,2,42,32], index: 0, kind: input, shape index: {}]   ;;  %s1853_s1 = inlined_call_operand.vmem [shape: f32[9,32,32], index: 1, kind: input, shape index: {}]   ;;  %s1854_s2 = inlined_call_operand.vmem [shape: f32[1,32], index: 2, kind: input, shape index: {}]   ;;  %s1855_s3 = inlined_call_operand.vmem [shape: f32[1,32], index: 3, kind: input, shape index: {}]   ;;  %s1856_s4 = inlined_call_operand.vmem [shape: f32[2,24,32], index: 4, kind: output, shape index: {}]  }
   0x1 LB: > { %s1150_s16 = sadd.s32 4294967295, %s1556_s15   ;;  %p1154_p0 = scmp.ge.s32.totalorder %s1556_s15, 1  ;;  %s1556_s15 = sphi %s1586_s15, %s14_s15  }
   0x2   : > { %p162_p1 = scmp.lt.s32.totalorder %s1556_s15, 3 }
   0x4   : > { %p163_p2 = pnand %p1154_p0, %p162_p1 }
   0x5   : > { %v1157_v0 = vld [vmem:[%s1853_s1 + $0x20] sm:$0xff] (!%p163_p2)  ;;  %v1158_v1 = vld [vmem:[%s1853_s1 + $0x28] sm:$0xff] (!%p163_p2)  ;;  %v1558_v3 = vmov (!%p163_p2), 0.0|0.0   ;;  %v1159_v6 = vld [vmem:[%s1853_s1 + $0x30] sm:$0xff] (!%p163_p2)  ;;  %p188_p3 = scmp.lt.s32.totalorder (!%p163_p2), %s1150_s16, 1  ;;  %vm1559_vm0 = vmmov (!%p163_p2), 0  }
   0x6   : > { %166 = sbr.rel (%p163_p2) target bundleno = 286 (0x11e), region = 36  ;;  %v1181_v2 = vld [vmem:[%s1853_s1 + $0x80] sm:$0xff] (!%p163_p2)  ;;  %1434 = vmatprep.subr.bf16.mxu1 (!%p163_p2), %v1558_v3  ;;  %1458 = vmatprep.subr.bf16.mxu0 (!%p163_p2), %v1558_v3  ;;  %v1435_v4 = vpack.c.bf16 (!%p163_p2), %v1158_v1, %v1157_v0  ;;  %v1182_v5 = vld [vmem:[%s1853_s1 + $0x88] sm:$0xff] (!%p163_p2)  ;;  %v1160_v7 = vld [vmem:[%s1853_s1 + $0x38] sm:$0xff] (!%p163_p2)  ;;  %v1560_v11 = vmov (!%p163_p2), 0.0   ;;  %vm213_vm1 = vcmask (!%p163_p2), 261120  }
   0x7   : > { %v1614_v8 = vpack.c.bf16 (!%p163_p2), %v1182_v5, %v1181_v2  ;;  %v1183_v9 = vld [vmem:[%s1853_s1 + $0x90] sm:$0xff] (!%p163_p2)  ;;  %v1184_v10 = vld [vmem:[%s1853_s1 + $0x98] sm:$0xff] (!%p163_p2)  ;;  %1289 = vmatprep.mubr.msk.f32.mxu1 (!%p163_p2), %vm1559_vm0, %v1560_v11  ;;  %1357 = vmatprep.mubr.msk.f32.mxu0 (!%p163_p2), %vm1559_vm0, %v1560_v11  ;;  %v1438_v12 = vpack.c.bf16 (!%p163_p2), %v1160_v7, %v1159_v6  ;;  %v201_v14 = vld [vmem:[%s1853_s1] sm:$0xff] (!%p163_p2) }
   0x8   : > { %1436 = vmatpush3.bf16.msra.mxu1 (!%p163_p2), %v1435_v4  ;;  %v1630_v13 = vpack.c.bf16 (!%p163_p2), %v1184_v10, %v1183_v9  ;;  %v202_v15 = vld [vmem:[%s1853_s1 + $0x8] sm:$0xff] (!%p163_p2)  ;;  %v1188_v16 = vld [vmem:[%s1853_s1 + $0xa0] sm:$0xff] (!%p163_p2)  ;;  %v1190_v22 = vld [vmem:[%s1853_s1 + $0xb0] sm:$0xff] (!%p163_p2) }
   0x9   : > { %1460 = vmatpush3.bf16.msra.mxu0 (!%p163_p2), %v1614_v8  ;;  %1437 = vmatprep.subr.bf16.mxu1 (!%p163_p2), %v1558_v3  ;;  %v1189_v17 = vld [vmem:[%s1853_s1 + $0xa8] sm:$0xff] (!%p163_p2)  ;;  %v1441_v18 = vpack.c.bf16 (!%p163_p2), %v202_v15, %v201_v14  ;;  %v1191_v23 = vld [vmem:[%s1853_s1 + $0xb8] sm:$0xff] (!%p163_p2)  ;;  %v203_v24 = vld [vmem:[%s1853_s1 + $0x10] sm:$0xff] (!%p163_p2) }
   0xa   : > { %1461 = vmatprep.subr.bf16.mxu0 (!%p163_p2), %v1558_v3  ;;  %v1465_v21 = vpack.c.bf16 (!%p163_p2), %v1189_v17, %v1188_v16  ;;  %v204_v25 = vld [vmem:[%s1853_s1 + $0x18] sm:$0xff] (!%p163_p2)  ;;  %v1468_v28 = vpack.c.bf16 (!%p163_p2), %v1191_v23, %v1190_v22  ;;  %v1195_v30 = vld [vmem:[%s1853_s1 + $0xc0] sm:$0xff] (!%p163_p2)  ;;  %v1196_v31 = vld [vmem:[%s1853_s1 + $0xc8] sm:$0xff] (!%p163_p2) }
   0xb   : > { %v1444_v29 = vpack.c.bf16 (!%p163_p2), %v204_v25, %v203_v24  ;;  %v1471_v34 = vpack.c.bf16 (!%p163_p2), %v1196_v31, %v1195_v30  ;;  %v1167_v35 = vld [vmem:[%s1853_s1 + $0x40] sm:$0xff] (!%p163_p2)  ;;  %v1168_v36 = vld [vmem:[%s1853_s1 + $0x48] sm:$0xff] (!%p163_p2)  ;;  %v1197_v37 = vld [vmem:[%s1853_s1 + $0xd0] sm:$0xff] (!%p163_p2) }
   0xc   : > { %1439 = vmatpush3.bf16.msra.mxu1 (!%p163_p2), %v1438_v12  ;;  %v1198_v38 = vld [vmem:[%s1853_s1 + $0xd8] sm:$0xff] (!%p163_p2)  ;;  %v1447_v40 = vpack.c.bf16 (!%p163_p2), %v1168_v36, %v1167_v35  ;;  %v1169_v43 = vld [vmem:[%s1853_s1 + $0x50] sm:$0xff] (!%p163_p2)  ;;  %v1202_v47 = vld [vmem:[%s1853_s1 + $0xe0] sm:$0xff] (!%p163_p2) }
   0xd   : > { %s1858_s16 = smov (!%p188_p3, %s1150_s16), 1  ;;  %1463 = vmatpush3.bf16.msra.mxu0 %v1630_v13  ;;  %1440 = vmatprep.subr.bf16.mxu1 %v1558_v3  ;;  %v1474_v42 = vpack.c.bf16 %v1198_v38, %v1197_v37  ;;  %v1170_v44 = vld [vmem:[%s1853_s1 + $0x58] sm:$0xff]  ;;  %v1203_v48 = vld [vmem:[%s1853_s1 + $0xe8] sm:$0xff]  ;;  %v1174_v51 = vld [vmem:[%s1853_s1 + $0x60] sm:$0xff] }
   0xe   : > { %s1537_s9 = smul.u32 48, %s1858_s16  ;;  %1464 = vmatprep.subr.bf16.mxu0 %v1558_v3  ;;  %v1450_v46 = vpack.c.bf16 %v1170_v44, %v1169_v43  ;;  %v1477_v50 = vpack.c.bf16 %v1203_v48, %v1202_v47  ;;  %v1175_v52 = vld [vmem:[%s1853_s1 + $0x68] sm:$0xff]  ;;  %v1204_v53 = vld [vmem:[%s1853_s1 + $0xf0] sm:$0xff]  ;;  %v1205_v54 = vld [vmem:[%s1853_s1 + $0xf8] sm:$0xff] }
   0xf   : > { %v1453_v56 = vpack.c.bf16 %v1175_v52, %v1174_v51  ;;  %v1480_v58 = vpack.c.bf16 %v1205_v54, %v1204_v53  ;;  %v1176_v59 = vld [vmem:[%s1853_s1 + $0x70] sm:$0xff]  ;;  %v1177_v60 = vld [vmem:[%s1853_s1 + $0x78] sm:$0xff]  ;;  %v1209_v0 = vld [vmem:[%s1853_s1 + $0x100] sm:$0xff]  ;;  %s1538_s14 = smul.u32 24, %s1858_s16 }
  0x10   : > { %s1649_s3 = scalar_lea.vmem %s1852_s0, %s1537_s9  ;;  %v1456_v63 = vpack.c.bf16 %v1177_v60, %v1176_v59  ;;  %v1210_v1 = vld [vmem:[%s1853_s1 + $0x108] sm:$0xff]  ;;  %v1211_v6 = vld [vmem:[%s1853_s1 + $0x110] sm:$0xff]  ;;  %v1212_v7 = vld [vmem:[%s1853_s1 + $0x118] sm:$0xff] }
  0x11   : > { %v205_v19 = vld [vmem:[%s1649_s3 + $0x1] sm:$0xff]  ;;  %v206_v26 = vld [vmem:[%s1649_s3 + $0x9] sm:$0xff]  ;;  %v207_v32 = vld [vmem:[%s1649_s3 + $0x11] sm:$0xff]  ;;  %v1483_v5 = vpack.c.bf16 %v1210_v1, %v1209_v0  ;;  %v1486_v12 = vpack.c.bf16 %v1212_v7, %v1211_v6  ;;  %s197_s18 = scalar_lea.vmem %s1856_s4, %s1538_s14 }
  0x12   : > { %v592_v20 = vld [vmem:[%s1649_s3 + $0x7] sm:$0xff]  ;;  %1290 = vmatmul.mubr.msk.f32.vlgmr.msra.gmra.mrb[0].mxu1 %vm213_vm1, %v205_v19  ;;  %v593_v27 = vld [vmem:[%s1649_s3 + $0xf] sm:$0xff]  ;;  %v694_v45 = vld [vmem:[%s1649_s3 + $0x18] sm:$0xff] }
  0x13   : > { %1358 = vmatmul.mubr.msk.f32.vlgmr.msra.gmra.mrb[0].mxu0 %vm213_vm1, %v592_v20  ;;  %1442 = vmatpush3.bf16.msra.mxu1 %v1441_v18  ;;  %v692_v33 = vld [vmem:[%s1649_s3 + $0x8] sm:$0xff]  ;;  %v198_v39 = vld [vmem:[%s1649_s3] sm:$0xff]  ;;  %v693_v41 = vld [vmem:[%s1649_s3 + $0x10] sm:$0xff] }
  0x14   : > { %1466 = vmatpush3.bf16.msra.mxu0 %v1465_v21  ;;  %1292 = vmatprep.mubr.msk.f32.mxu1 %vm1559_vm0, %v1560_v11  ;;  %v792_v49 = vld [vmem:[%s1649_s3 + $0xc] sm:$0xff]  ;;  %v392_v55 = vld [vmem:[%s1649_s3 + $0x2] sm:$0xff]  ;;  %v793_v57 = vld [vmem:[%s1649_s3 + $0x14] sm:$0xff] }
  0x15   : > { %1360 = vmatprep.mubr.msk.f32.mxu0 %vm1559_vm0, %v1560_v11  ;;  %1467 = vmatprep.subr.bf16.mxu0 %v1558_v3  ;;  %v393_v61 = vld [vmem:[%s1649_s3 + $0xa] sm:$0xff]  ;;  %v794_v62 = vld [vmem:[%s1649_s3 + $0x1c] sm:$0xff]  ;;  %v394_v2 = vld [vmem:[%s1649_s3 + $0x12] sm:$0xff] }
  0x16   : > { %1293 = vmatmul.mubr.msk.f32.gmra.mrb[2].mxu1 %vm213_vm1, %v206_v26  ;;  %1443 = vmatprep.subr.bf16.mxu1 %v1558_v3  ;;  %v892_v4 = vld [vmem:[%s1649_s3 + $0xd] sm:$0xff]  ;;  %v893_v10 = vld [vmem:[%s1649_s3 + $0x15] sm:$0xff]  ;;  %v894_v15 = vld [vmem:[%s1649_s3 + $0x1d] sm:$0xff] }
  0x17   : > { %1361 = vmatmul.mubr.msk.f32.gmra.mrb[2].mxu0 %vm213_vm1, %v593_v27  ;;  %1295 = vmatprep.mubr.msk.f32.mxu1 %vm1559_vm0, %v1560_v11  ;;  %v492_v9 = vld [vmem:[%s1649_s3 + $0x6] sm:$0xff]  ;;  %v493_v14 = vld [vmem:[%s1649_s3 + $0xe] sm:$0xff]  ;;  %v994_v16 = vld [vmem:[%s1649_s3 + $0x1e] sm:$0xff] }
  0x18   : > { %1469 = vmatpush3.bf16.msra.mxu0 %v1468_v28  ;;  %1445 = vmatpush3.bf16.msra.mxu1 %v1444_v29 }
  0x19   : > { %1374 = vmatprep.mubr.msk.f32.mxu0 %vm1559_vm0, %v1560_v11  ;;  %1470 = vmatprep.subr.bf16.mxu0 %v1558_v3 }
  0x1a   : > { %1296 = vmatmul.mubr.msk.f32.gmra.mrb[4].mxu1 %vm213_vm1, %v207_v32  ;;  %1446 = vmatprep.subr.bf16.mxu1 %v1558_v3 }
  0x1b   : > { %1375 = vmatmul.mubr.msk.f32.vlgmr.msra.gmra.mrb[0].mxu0 %vm213_vm1, %v692_v33  ;;  %1306 = vmatprep.mubr.msk.f32.mxu1 %vm1559_vm0, %v1560_v11 }
  0x1c   : > { %1472 = vmatpush3.bf16.msra.mxu0 %v1471_v34  ;;  %1377 = vmatprep.mubr.msk.f32.mxu0 %vm1559_vm0, %v1560_v11 }
  0x1d   : > { %1473 = vmatprep.subr.bf16.mxu0 %v1558_v3 }
  0x1e   : > { %1307 = vmatmul.mubr.msk.f32.vlgmr.msra.gmra.mrb[0].mxu1 %vm213_vm1, %v198_v39 }
  0x1f   : > { %1378 = vmatmul.mubr.msk.f32.gmra.mrb[2].mxu0 %vm213_vm1, %v693_v41  ;;  %1448 = vmatpush3.bf16.msra.mxu1 %v1447_v40 }
  0x20   : > { %1309 = vmatprep.mubr.msk.f32.mxu1 %vm1559_vm0, %v1560_v11  ;;  %1380 = vmatprep.mubr.msk.f32.mxu0 %vm1559_vm0, %v1560_v11 }
  0x21   : > { %1475 = vmatpush3.bf16.msra.mxu0 %v1474_v42  ;;  %1449 = vmatprep.subr.bf16.mxu1 %v1558_v3 }
  0x22   : > { %1310 = vmatmul.mubr.msk.f32.gmra.mrb[2].mxu1 %vm213_vm1, %v692_v33  ;;  %1476 = vmatprep.subr.bf16.mxu0 %v1558_v3 }
  0x23   : > { %1381 = vmatmul.mubr.msk.f32.gmra.mrb[4].mxu0 %vm213_vm1, %v694_v45  ;;  %1312 = vmatprep.mubr.msk.f32.mxu1 %vm1559_vm0, %v1560_v11 }
  0x24   : > { %1451 = vmatpush3.bf16.msra.mxu1 %v1450_v46  ;;  %1391 = vmatprep.mubr.msk.f32.mxu0 %vm1559_vm0, %v1560_v11 }
  0x25   : > { %1452 = vmatprep.subr.bf16.mxu1 %v1558_v3 }
  0x26   : > { %1313 = vmatmul.mubr.msk.f32.gmra.mrb[4].mxu1 %vm213_vm1, %v693_v41 }
  0x27   : > { %1392 = vmatmul.mubr.msk.f32.vlgmr.msra.gmra.mrb[0].mxu0 %vm213_vm1, %v792_v49  ;;  %1323 = vmatprep.mubr.msk.f32.mxu1 %vm1559_vm0, %v1560_v11 }
  0x28   : > { %1478 = vmatpush3.bf16.msra.mxu0 %v1477_v50  ;;  %1394 = vmatprep.mubr.msk.f32.mxu0 %vm1559_vm0, %v1560_v11 }
  0x29   : > { %1479 = vmatprep.subr.bf16.mxu0 %v1558_v3 }
  0x2a   : > { %1324 = vmatmul.mubr.msk.f32.vlgmr.msra.gmra.mrb[0].mxu1 %vm213_vm1, %v392_v55 }
  0x2b   : > { %1395 = vmatmul.mubr.msk.f32.gmra.mrb[2].mxu0 %vm213_vm1, %v793_v57  ;;  %1454 = vmatpush3.bf16.msra.mxu1 %v1453_v56 }
  0x2c   : > { %1326 = vmatprep.mubr.msk.f32.mxu1 %vm1559_vm0, %v1560_v11  ;;  %1397 = vmatprep.mubr.msk.f32.mxu0 %vm1559_vm0, %v1560_v11 }
  0x2d   : > { %1481 = vmatpush3.bf16.msra.mxu0 %v1480_v58  ;;  %1455 = vmatprep.subr.bf16.mxu1 %v1558_v3 }
  0x2e   : > { %1327 = vmatmul.mubr.msk.f32.gmra.mrb[2].mxu1 %vm213_vm1, %v393_v61  ;;  %1482 = vmatprep.subr.bf16.mxu0 %v1558_v3 }
  0x2f   : > { %1398 = vmatmul.mubr.msk.f32.gmra.mrb[4].mxu0 %vm213_vm1, %v794_v62  ;;  %1329 = vmatprep.mubr.msk.f32.mxu1 %vm1559_vm0, %v1560_v11 }
  0x30   : > { %1457 = vmatpush3.bf16.msra.mxu1 %v1456_v63  ;;  %1408 = vmatprep.mubr.msk.f32.mxu0 %vm1559_vm0, %v1560_v11 }
  0x31   : > { %1488 = vmatprep.subr.bf16.mxu1 %v1558_v3 }
  0x32   : > { %1330 = vmatmul.mubr.msk.f32.gmra.mrb[4].mxu1 %vm213_vm1, %v394_v2 }
  0x33   : > { %1409 = vmatmul.mubr.msk.f32.vlgmr.msra.gmra.mrb[0].mxu0 %vm213_vm1, %v892_v4  ;;  %1340 = vmatprep.mubr.msk.f32.mxu1 %vm1559_vm0, %v1560_v11 }
  0x34   : > { %1484 = vmatpush3.bf16.msra.mxu0 %v1483_v5  ;;  %1411 = vmatprep.mubr.msk.f32.mxu0 %vm1559_vm0, %v1560_v11 }
  0x35   : > { %1485 = vmatprep.subr.bf16.mxu0 %v1558_v3 }
  0x36   : > { %1341 = vmatmul.mubr.msk.f32.vlgmr.msra.gmra.mrb[0].mxu1 %vm213_vm1, %v492_v9 }
  0x37   : > { %1412 = vmatmul.mubr.msk.f32.gmra.mrb[2].mxu0 %vm213_vm1, %v893_v10  ;;  %1490 = vmatpush3.bf16.msra.mxu1 %v1614_v8  ;;  %v494_v8 = vld [vmem:[%s1649_s3 + $0x16] sm:$0xff] }
  0x38   : > { %1343 = vmatprep.mubr.msk.f32.mxu1 %vm1559_vm0, %v1560_v11  ;;  %1414 = vmatprep.mubr.msk.f32.mxu0 %vm1559_vm0, %v1560_v11 }
  0x39   : > { %1487 = vmatpush3.bf16.msra.mxu0 %v1486_v12  ;;  %1489 = vmatprep.subr.bf16.mxu1 %v1558_v3  ;;  %v594_v3 = vld [vmem:[%s1649_s3 + $0x17] sm:$0xff] }
  0x3a   : > { %1344 = vmatmul.mubr.msk.f32.gmra.mrb[2].mxu1 %vm213_vm1, %v493_v14 }
  0x3b   : > { %1415 = vmatmul.mubr.msk.f32.gmra.mrb[4].mxu0 %vm213_vm1, %v894_v15  ;;  %1346 = vmatprep.mubr.msk.f32.mxu1 %vm1559_vm0, %v1560_v11 }
  0x3c   : > { %1425 = vmatprep.mubr.msk.f32.mxu0 %vm1559_vm0, %v1560_v11  ;;  %1491 = vmatpush3.bf16.msra.mxu1 %v1630_v13 }
  0x3e   : > { %1347 = vmatmul.mubr.msk.f32.gmra.mrb[4].mxu1 %vm213_vm1, %v494_v8 }
  0x3f   : > { %1426 = vmatmul.mubr.msk.f32.vlgmr.msra.gmra.mrb[0].mxu0 %vm213_vm1, %v493_v14  ;;  %1363 = vmatprep.mubr.msk.f32.mxu1 %vm1559_vm0, %v1560_v11 }
  0x40   : > { %1428 = vmatprep.mubr.msk.f32.mxu0 %vm1559_vm0, %v1560_v11 }
  0x43   : > { %1429 = vmatmul.mubr.msk.f32.gmra.mrb[2].mxu0 %vm213_vm1, %v494_v8 }
  0x44   : > { %1431 = vmatprep.mubr.msk.f32.mxu0 %vm1559_vm0, %v1560_v11 }
  0x46   : > { %1364 = vmatmul.mubr.msk.f32.vlgmr.msra.gmra.mrb[4].mxu1 %vm213_vm1, %v594_v3 }
  0x47   : > { %1432 = vmatmul.mubr.msk.f32.gmra.mrb[4].mxu0 %vm213_vm1, %v994_v16 }
 0x109   : > { %v575_v13 = vpop.f32.mrb[0].mxu1 }
 0x10a   : > { %v1342_v17 = vpop.f32.mrb[1].mxu1 }
 0x10d   : > { %v580_v18 = vpop.f32.mrb[2].mxu1 }
 0x10e   : > { %v1345_v19 = vpop.f32.mrb[3].mxu1 }
 0x112   : > { %v1075_v20 = vpop.f32.mrb[0].mxu0 }
 0x113   : > { %v1492_v21 = vadd.f32 %v1075_v20, %v575_v13  ;;  %v1427_v22 = vpop.f32.mrb[1].mxu0 }
 0x115   : > { %1092 = vst.msk [vmem:[%s197_s18] sm:$0xff] %vm213_vm1, %v1492_v21 }
 0x116   : > { %v1080_v11 = vpop.f32.mrb[2].mxu0 }
 0x117   : > { %v1493_v23 = vadd.f32 %v1080_v11, %v580_v18  ;;  %v1430_v24 = vpop.f32.mrb[3].mxu0 }
 0x119   : > { %1093 = vst.msk [vmem:[%s197_s18 + $0x8] sm:$0xff] %vm213_vm1, %v1493_v23  ;;  %v685_v25 = vpop.f32.mrb[4].mxu1 }
 0x11a   : > { %v1085_v26 = vpop.f32.mrb[4].mxu0  ;;  %v1365_v27 = vpop.f32.mrb[5].mxu1 }
 0x11b   : > { %v1494_v28 = vadd.f32 %v1085_v26, %v685_v25  ;;  %v1433_v29 = vpop.f32.mrb[5].mxu0 }
 0x11d   : > { %1094 = vst.msk [vmem:[%s197_s18 + $0x10] sm:$0xff] %vm213_vm1, %v1494_v28 }
 0x11e PF: > { %s14_s15 = sadd.s32 1, %s1556_s15  }
 0x11f   : > { %p11_p4 = scmp.ge.s32.totalorder %s14_s15, 4  }
 0x121   :  { %13 = sbr.rel (!%p11_p4) target bundleno = 1 (0x1), region = 74 }

// kernel: resnet_v2_forward.25
= control target key start
LH: loop header
LB: loop body
LE: loop exit
PB: predicated region body
PF: predicated region fallthrough
CT: control target
= control target key end

     0   :  { %s71_s0 = inlined_call_operand.vmem [shape: f32[8,128], index: 0, kind: input, shape index: {}]   ;;  %s72_s1 = inlined_call_operand.vmem [shape: f32[1,128], index: 1, kind: input, shape index: {}]   ;;  %s73_s2 = inlined_call_operand.vmem [shape: f32[1,128], index: 2, kind: input, shape index: {}]   ;;  %s74_s3 = inlined_call_operand.vmem [shape: f32[8,128], index: 3, kind: output, shape index: {}]  }
   0x1   :  { %v14_v0 = vld [vmem:[%s71_s0] sm:$0xff] }
   0x2   :  { %v37_v1 = vld [vmem:[%s72_s1] ss:$0 sm:$0xff] }
   0x3   :  { %v38_v2 = vld [vmem:[%s73_s2] ss:$0 sm:$0xff]  ;;  %v22_v3 = vmul.f32 %v37_v1, %v14_v0 }
   0x5   :  { %v30_v4 = vadd.f32 %v38_v2, %v22_v3 }
   0x7   :  { %v31_v5 = vmax.f32 %v30_v4, 0.0 }
   0x9   :  { %32 = vst [vmem:[%s74_s3] sm:$0xff] %v31_v5 }

</bundles_post_ra>
